<compile_context>
chip_gen: v7x
topology: tpu7x:2x2x1
jax: 0.10.0
libtpu: 0.0.40
codegen_flags: <defaults>
</compile_context>

<pallas_src>
import math

import numpy as np
import jax
import jax.numpy as jnp
from jax.experimental import pallas as pl
from jax.experimental.pallas import tpu as pltpu

# Flip to jnp.bfloat16 for ~2x MXU throughput / half the memory traffic (f32 accumulate).
MATMUL_DTYPE = jnp.float32

_PARALLEL_1D = pltpu.CompilerParams(dimension_semantics=("parallel",))
_LN_EPS = 1e-5


# ---------------------------------------------------------------------------
# In-kernel helpers
# ---------------------------------------------------------------------------

def _mm(a, b):
    """MXU matmul with f32 accumulation."""
    return jnp.dot(a.astype(MATMUL_DTYPE), b.astype(MATMUL_DTYPE),
                   preferred_element_type=jnp.float32)


def _roll_rows(x, shift):
    """jnp.roll(x, shift, axis=0) with a static shift (two sublane slices + concat)."""
    n = x.shape[0]
    s = shift % n
    if s == 0:
        return x
    return jnp.concatenate([x[n - s:, :], x[:n - s, :]], axis=0)


def _roll_lanes_left(x, s):
    """out[:, j] = x[:, (j + s) % L] for a static s (two lane slices + concat)."""
    n = x.shape[1]
    s = s % n
    if s == 0:
        return x
    return jnp.concatenate([x[:, s:], x[:, :s]], axis=1)


def _circular_mean_corr(k, q, d_model):
    """mean_corr[0, tau] = (1/d_model) * sum_t <k[t, :], q[(t + tau) % L, :]>.

    Exactly the head/channel mean of the FFT-based circular auto-correlation in
    AutoCorrelation, computed directly: one MXU matmul + O(L) static lane rolls.
    (Replaces the previous (L*L, L) diagonal-sum matrix + HBM round trip.)
    """
    m = jax.lax.dot_general(
        k.astype(MATMUL_DTYPE), q.astype(MATMUL_DTYPE),
        dimension_numbers=(((1,), (1,)), ((), ())),
        preferred_element_type=jnp.float32)            # (Lk, Lq): m[t, i] = <k_t, q_i>
    acc = m[0:1, :]
    for t in range(1, m.shape[0]):
        acc = acc + _roll_lanes_left(m[t:t + 1, :], t)
    return acc * (1.0 / d_model)


def _time_delay_agg(vbuf_ref, v, delay_ref, wgt_ref, b):
    """out[t, :] = sum_k w[b, k] * v[(t + delay[b, k]) % L, :]  (inference aggregation).

    v is staged twice into a (2L, D) VMEM scratch so each top-k term is a single
    dynamic-start sublane slice (no dense circulant matrix, no (B, L, L) gather).
    """
    L = v.shape[0]
    top_k = delay_ref.shape[1]
    vbuf_ref[pl.ds(0, L), :] = v
    vbuf_ref[pl.ds(L, L), :] = v
    agg = wgt_ref[b, 0] * vbuf_ref[pl.ds(delay_ref[b, 0], L), :]
    for ki in range(1, top_k):
        agg = agg + wgt_ref[b, ki] * vbuf_ref[pl.ds(delay_ref[b, ki], L), :]
    return agg


def _layernorm_detrended(x, gamma, beta):
    """my_Layernorm: LayerNorm over channels, then subtract the time-mean."""
    mu = jnp.mean(x, axis=-1, keepdims=True)
    xc = x - mu
    var = jnp.mean(xc * xc, axis=-1, keepdims=True)
    xhat = xc * jax.lax.rsqrt(var + _LN_EPS) * gamma + beta
    return xhat - jnp.mean(xhat, axis=0, keepdims=True)


# ---------------------------------------------------------------------------
# Pallas kernels (one grid step per batch element, everything else in VMEM)
# ---------------------------------------------------------------------------

def _decomp_kernel(x_ref, a_ref, s_ref, t_ref):
    # series_decomp: replicate-padded moving average as a banded matmul, fused subtract.
    x = x_ref[0]
    trend = _mm(a_ref[...], x)
    t_ref[0] = trend
    s_ref[0] = x - trend


def _embed_kernel(x_ref, mark_ref, w_ref, o_ref):
    # TokenEmbedding (circular conv k=3, no bias) + timeF temporal linear: ONE matmul.
    x = x_ref[0]
    feats = jnp.concatenate(
        [_roll_rows(x, 1), x, _roll_rows(x, -1), mark_ref[0]], axis=-1)
    o_ref[0] = _mm(feats, w_ref[...])


def _self_qkv_corr_kernel(x_ref, wqkv_ref, bqkv_ref, v_ref, mc_ref):
    # Fused Q|K|V projection + circular-correlation channel mean.
    d = wqkv_ref.shape[0]
    x = x_ref[0]
    qkv = _mm(x, wqkv_ref[...]) + bqkv_ref[...]
    q = qkv[:, :d]
    k = qkv[:, d:2 * d]
    v_ref[0] = qkv[:, 2 * d:]
    mc_ref[0] = _circular_mean_corr(k, q, d)


def _enc_tail_kernel(delay_ref, wgt_ref, x_ref, v_ref, wo_ref, bo_ref, a_ref,
                     w1_ref, w2_ref, o_ref, vbuf_ref):
    # aggregation + out-proj + residual + decomp1 + FFN + residual + decomp2.
    b = pl.program_id(0)
    x = x_ref[0]
    a = a_ref[...]
    agg = _time_delay_agg(vbuf_ref, v_ref[0], delay_ref, wgt_ref, b)
    x1 = x + (_mm(agg, wo_ref[...]) + bo_ref[...])
    s1 = x1 - _mm(a, x1)                                       # decomp1 (seasonal)
    y = _mm(jnp.maximum(_mm(s1, w1_ref[...]), 0.0), w2_ref[...])  # conv1->relu->conv2
    z = s1 + y
    o_ref[0] = z - _mm(a, z)                                    # decomp2 (seasonal)


def _dec_mid_kernel(delay_ref, wgt_ref, x_ref, v_ref, cross_ref,
                    wo_ref, bo_ref, a_ref, wq_ref, bq_ref, wkv_ref, bkv_ref,
                    x1_ref, t1_ref, vc_ref, mc_ref, vbuf_ref):
    # decoder self-attn tail + decomp1 + cross-attn projections + cross correlation.
    b = pl.program_id(0)
    d = wq_ref.shape[0]
    L = x_ref.shape[1]
    S = cross_ref.shape[1]
    x = x_ref[0]
    a = a_ref[...]
    agg = _time_delay_agg(vbuf_ref, v_ref[0], delay_ref, wgt_ref, b)
    x1 = x + (_mm(agg, wo_ref[...]) + bo_ref[...])
    trend1 = _mm(a, x1)
    s1 = x1 - trend1
    x1_ref[0] = s1
    t1_ref[0] = trend1
    # cross attention head: Q from seasonal, fused K|V from encoder output.
    q = _mm(s1, wq_ref[...]) + bq_ref[...]
    kv = _mm(cross_ref[0], wkv_ref[...]) + bkv_ref[...]
    k = kv[:, :d]
    vc = kv[:, d:]
    if L > S:      # pad keys/values with zeros up to the query length (reference)
        vc = jnp.concatenate([vc, jnp.zeros((L - S, d), vc.dtype)], axis=0)
    elif L < S:    # truncate to the query length
        vc = vc[:L]
        k = k[:L]
    vc_ref[0] = vc
    mc_ref[0] = _circular_mean_corr(k, q, d)


def _dec_tail_kernel(delay_ref, wgt_ref, x1_ref, t1_ref, vc_ref,
                     wo_ref, bo_ref, a_ref, w1_ref, w2_ref, wt_ref,
                     x3_ref, rt_ref, vbuf_ref):
    # cross-attn tail + decomp2 + FFN + decomp3 + circular-conv trend projection.
    b = pl.program_id(0)
    x1 = x1_ref[0]
    a = a_ref[...]
    agg = _time_delay_agg(vbuf_ref, vc_ref[0], delay_ref, wgt_ref, b)
    x2 = x1 + (_mm(agg, wo_ref[...]) + bo_ref[...])
    trend2 = _mm(a, x2)
    s2 = x2 - trend2
    y = _mm(jnp.maximum(_mm(s2, w1_ref[...]), 0.0), w2_ref[...])
    z = s2 + y
    trend3 = _mm(a, z)
    x3_ref[0] = z - trend3
    tsum = t1_ref[0] + trend2 + trend3
    feats = jnp.concatenate([_roll_rows(tsum, 1), tsum, _roll_rows(tsum, -1)], axis=-1)
    rt_ref[0] = _mm(feats, wt_ref[...])


def _mylayernorm_kernel(x_ref, g_ref, b_ref, o_ref):
    o_ref[0] = _layernorm_detrended(x_ref[0], g_ref[...], b_ref[...])


def _dec_final_kernel(x_ref, g_ref, b_ref, wp_ref, bp_ref, trend_ref, o_ref):
    # decoder norm + seasonal projection + trend add, fused.
    xhat = _layernorm_detrended(x_ref[0], g_ref[...], b_ref[...])
    o_ref[0] = trend_ref[0] + (_mm(xhat, wp_ref[...]) + bp_ref[...])


# ---------------------------------------------------------------------------
# BlockSpec helpers / wrappers
# ---------------------------------------------------------------------------

def _batch3d(shape):
    return pl.BlockSpec(shape, lambda b: (b, 0, 0))


def _const2d(shape):
    return pl.BlockSpec(shape, lambda b: (0, 0))


def _batch3d_p(shape):          # PrefetchScalarGridSpec index_maps get prefetch refs too
    return pl.BlockSpec(shape, lambda b, *_: (b, 0, 0))


def _const2d_p(shape):
    return pl.BlockSpec(shape, lambda b, *_: (0, 0))


_AVG_CACHE = {}


def _avg_matrix(L, ksize):
    """trend = A @ x : replicate-padded moving average folded into a banded matrix."""
    key = (L, ksize)
    if key not in _AVG_CACHE:
        pad = (ksize - 1) // 2
        A = np.zeros((L, L), np.float32)
        for t in range(L):
            for j in range(ksize):
                s = min(max(t - pad + j, 0), L - 1)
                A[t, s] += 1.0 / ksize
        _AVG_CACHE[key] = jnp.asarray(A)
    return _AVG_CACHE[key]


def series_decomp(x, a_mat):
    B, L, C = x.shape
    return pl.pallas_call(
        _decomp_kernel,
        out_shape=(jax.ShapeDtypeStruct((B, L, C), jnp.float32),
                   jax.ShapeDtypeStruct((B, L, C), jnp.float32)),
        grid=(B,),
        in_specs=[_batch3d((1, L, C)), _const2d((L, L))],
        out_specs=(_batch3d((1, L, C)), _batch3d((1, L, C))),
        compiler_params=_PARALLEL_1D,
    )(x, a_mat)


def data_embedding(x, x_mark, w):
    B, L, C = x.shape
    Cm = x_mark.shape[2]
    D = w.shape[1]
    return pl.pallas_call(
        _embed_kernel,
        out_shape=jax.ShapeDtypeStruct((B, L, D), jnp.float32),
        grid=(B,),
        in_specs=[_batch3d((1, L, C)), _batch3d((1, L, Cm)),
                  _const2d((3 * C + Cm, D))],
        out_specs=_batch3d((1, L, D)),
        compiler_params=_PARALLEL_1D,
    )(x, x_mark, w)


def self_qkv_corr(x, wqkv, bqkv):
    B, L, D = x.shape
    D3 = wqkv.shape[1]
    v, mc = pl.pallas_call(
        _self_qkv_corr_kernel,
        out_shape=(jax.ShapeDtypeStruct((B, L, D), jnp.float32),
                   jax.ShapeDtypeStruct((B, 1, L), jnp.float32)),
        grid=(B,),
        in_specs=[_batch3d((1, L, D)), _const2d((D, D3)), _const2d((1, D3))],
        out_specs=(_batch3d((1, L, D)), _batch3d((1, 1, L))),
        compiler_params=_PARALLEL_1D,
    )(x, wqkv, bqkv)
    return v, mc[:, 0, :]


def topk_delays(mean_corr, factor):
    # Tiny data-dependent glue (top-k / softmax) stays in plain JAX (eval semantics).
    L = mean_corr.shape[-1]
    top_k = max(1, int(factor * math.log(L)))
    weights, delay = jax.lax.top_k(mean_corr, top_k)
    return delay.astype(jnp.int32), jax.nn.softmax(weights, axis=-1)


def encoder_layer_tail(x, v, delays, weights, lp, a_mat):
    B, L, D = x.shape
    F = lp['ffn_w1'].shape[1]
    grid_spec = pltpu.PrefetchScalarGridSpec(
        num_scalar_prefetch=2,
        grid=(B,),
        in_specs=[_batch3d_p((1, L, D)), _batch3d_p((1, L, D)),
                  _const2d_p((D, D)), _const2d_p((1, D)), _const2d_p((L, L)),
                  _const2d_p((D, F)), _const2d_p((F, D))],
        out_specs=_batch3d_p((1, L, D)),
        scratch_shapes=[pltpu.VMEM((2 * L, D), jnp.float32)],
    )
    return pl.pallas_call(
        _enc_tail_kernel,
        out_shape=jax.ShapeDtypeStruct((B, L, D), jnp.float32),
        grid_spec=grid_spec,
        compiler_params=_PARALLEL_1D,
    )(delays, weights, x, v, lp['attn']['wo'], lp['attn']['bo'], a_mat,
      lp['ffn_w1'], lp['ffn_w2'])


def decoder_layer_mid(x, v, cross, delays, weights, lp, a_mat):
    B, L, D = x.shape
    S = cross.shape[1]
    sa, ca = lp['self_attn'], lp['cross_attn']
    grid_spec = pltpu.PrefetchScalarGridSpec(
        num_scalar_prefetch=2,
        grid=(B,),
        in_specs=[_batch3d_p((1, L, D)), _batch3d_p((1, L, D)), _batch3d_p((1, S, D)),
                  _const2d_p((D, D)), _const2d_p((1, D)), _const2d_p((L, L)),
                  _const2d_p((D, D)), _const2d_p((1, D)),
                  _const2d_p((D, 2 * D)), _const2d_p((1, 2 * D))],
        out_specs=(_batch3d_p((1, L, D)), _batch3d_p((1, L, D)),
                   _batch3d_p((1, L, D)), _batch3d_p((1, 1, L))),
        scratch_shapes=[pltpu.VMEM((2 * L, D), jnp.float32)],
    )
    x1, t1, vc, mc = pl.pallas_call(
        _dec_mid_kernel,
        out_shape=(jax.ShapeDtypeStruct((B, L, D), jnp.float32),
                   jax.ShapeDtypeStruct((B, L, D), jnp.float32),
                   jax.ShapeDtypeStruct((B, L, D), jnp.float32),
                   jax.ShapeDtypeStruct((B, 1, L), jnp.float32)),
        grid_spec=grid_spec,
        compiler_params=_PARALLEL_1D,
    )(delays, weights, x, v, cross, sa['wo'], sa['bo'], a_mat,
      ca['wq'], ca['bq'], ca['wkv'], ca['bkv'])
    return x1, t1, vc, mc[:, 0, :]


def decoder_layer_tail(x1, t1, vc, delays, weights, lp, a_mat):
    B, L, D = x1.shape
    F = lp['ffn_w1'].shape[1]
    Co = lp['trend_proj_w'].shape[1]
    ca = lp['cross_attn']
    grid_spec = pltpu.PrefetchScalarGridSpec(
        num_scalar_prefetch=2,
        grid=(B,),
        in_specs=[_batch3d_p((1, L, D)), _batch3d_p((1, L, D)), _batch3d_p((1, L, D)),
                  _const2d_p((D, D)), _const2d_p((1, D)), _const2d_p((L, L)),
                  _const2d_p((D, F)), _const2d_p((F, D)), _const2d_p((3 * D, Co))],
        out_specs=(_batch3d_p((1, L, D)), _batch3d_p((1, L, Co))),
        scratch_shapes=[pltpu.VMEM((2 * L, D), jnp.float32)],
    )
    return pl.pallas_call(
        _dec_tail_kernel,
        out_shape=(jax.ShapeDtypeStruct((B, L, D), jnp.float32),
                   jax.ShapeDtypeStruct((B, L, Co), jnp.float32)),
        grid_spec=grid_spec,
        compiler_params=_PARALLEL_1D,
    )(delays, weights, x1, t1, vc, ca['wo'], ca['bo'], a_mat,
      lp['ffn_w1'], lp['ffn_w2'], lp['trend_proj_w'])


def my_layernorm(x, gamma, beta):
    B, L, D = x.shape
    return pl.pallas_call(
        _mylayernorm_kernel,
        out_shape=jax.ShapeDtypeStruct((B, L, D), jnp.float32),
        grid=(B,),
        in_specs=[_batch3d((1, L, D)), _const2d((1, D)), _const2d((1, D))],
        out_specs=_batch3d((1, L, D)),
        compiler_params=_PARALLEL_1D,
    )(x, gamma, beta)


def decoder_final(x, trend, norm, wp, bp):
    B, L, D = x.shape
    Co = wp.shape[1]
    return pl.pallas_call(
        _dec_final_kernel,
        out_shape=jax.ShapeDtypeStruct((B, L, Co), jnp.float32),
        grid=(B,),
        in_specs=[_batch3d((1, L, D)), _const2d((1, D)), _const2d((1, D)),
                  _const2d((D, Co)), _const2d((1, Co)), _batch3d((1, L, Co))],
        out_specs=_batch3d((1, L, Co)),
        compiler_params=_PARALLEL_1D,
    )(x, norm['gamma'], norm['beta'], wp, bp, trend)


# ---------------------------------------------------------------------------
# Full Autoformer forward (eval mode)
# ---------------------------------------------------------------------------

def autoformer_forward(params, cfg, x_enc, x_mark_enc, x_dec, x_mark_dec):
    B, Ls, Cin = x_enc.shape
    pred_len, label_len = cfg['pred_len'], cfg['label_len']
    Ld = label_len + pred_len
    moving_avg, factor = cfg['moving_avg'], cfg['factor']

    a_enc = _avg_matrix(Ls, moving_avg)
    a_dec = _avg_matrix(Ld, moving_avg)

    # decoder init series
    seasonal_init, trend_init = series_decomp(x_enc, a_enc)
    mean = jnp.broadcast_to(jnp.mean(x_enc, axis=1, keepdims=True), (B, pred_len, Cin))
    zeros = jnp.zeros((B, pred_len, x_dec.shape[2]), jnp.float32)
    trend_init = jnp.concatenate([trend_init[:, -label_len:, :], mean], axis=1)
    seasonal_init = jnp.concatenate([seasonal_init[:, -label_len:, :], zeros], axis=1)

    # encoder
    enc_out = data_embedding(x_enc, x_mark_enc, params['enc_emb_w'])
    for lp in params['encoder_layers']:
        v, mc = self_qkv_corr(enc_out, lp['attn']['wqkv'], lp['attn']['bqkv'])
        delays, weights = topk_delays(mc, factor)
        enc_out = encoder_layer_tail(enc_out, v, delays, weights, lp, a_enc)
    enc_out = my_layernorm(enc_out, params['enc_norm']['gamma'],
                           params['enc_norm']['beta'])

    # decoder
    x = data_embedding(seasonal_init, x_mark_dec, params['dec_emb_w'])
    trend = trend_init
    for lp in params['decoder_layers']:
        v, mc = self_qkv_corr(x, lp['self_attn']['wqkv'], lp['self_attn']['bqkv'])
        d1, wgt1 = topk_delays(mc, factor)
        x1, t1, vc, mc2 = decoder_layer_mid(x, v, enc_out, d1, wgt1, lp, a_dec)
        d2, wgt2 = topk_delays(mc2, factor)
        x, residual_trend = decoder_layer_tail(x1, t1, vc, d2, wgt2, lp, a_dec)
        trend = trend + residual_trend
    dec_out = decoder_final(x, trend, params['dec_norm'],
                            params['dec_proj_w'], params['dec_proj_b'])
    return dec_out[:, -pred_len:, :]


# ---------------------------------------------------------------------------
# Deterministic synthetic parameters (shapes match the PyTorch module; QKV / KV /
# embedding weights stored pre-fused for single-matmul projections)
# ---------------------------------------------------------------------------

def init_params(key, cfg):
    d_model, d_ff = cfg['d_model'], cfg['d_ff']
    enc_in, dec_in, c_out = cfg['enc_in'], cfg['dec_in'], cfg['c_out']
    mark_dim = cfg['mark_dim']
    kit = iter(jax.random.split(key, 256))

    def w(shape, fan_in):
        return (1.0 / math.sqrt(fan_in)) * jax.random.normal(next(kit), shape, jnp.float32)

    def self_attn_block():
        return {
            'wqkv': jnp.concatenate([w((d_model, d_model), d_model) for _ in range(3)], axis=1),
            'bqkv': w((1, 3 * d_model), d_model),
            'wo': w((d_model, d_model), d_model),
            'bo': w((1, d_model), d_model),
        }

    def cross_attn_block():
        return {
            'wq': w((d_model, d_model), d_model), 'bq': w((1, d_model), d_model),
            'wkv': jnp.concatenate([w((d_model, d_model), d_model) for _ in range(2)], axis=1),
            'bkv': w((1, 2 * d_model), d_model),
            'wo': w((d_model, d_model), d_model), 'bo': w((1, d_model), d_model),
        }

    return {
        # [circular conv-3 taps (3*Cin) | timeF temporal (mark_dim)] -> d_model
        'enc_emb_w': jnp.concatenate([w((3 * enc_in, d_model), 3 * enc_in),
                                      w((mark_dim, d_model), mark_dim)], axis=0),
        'dec_emb_w': jnp.concatenate([w((3 * dec_in, d_model), 3 * dec_in),
                                      w((mark_dim, d_model), mark_dim)], axis=0),
        'encoder_layers': [{
            'attn': self_attn_block(),
            'ffn_w1': w((d_model, d_ff), d_model),
            'ffn_w2': w((d_ff, d_model), d_ff),
        } for _ in range(cfg['e_layers'])],
        'enc_norm': {'gamma': jnp.ones((1, d_model), jnp.float32),
                     'beta': jnp.zeros((1, d_model), jnp.float32)},
        'decoder_layers': [{
            'self_attn': self_attn_block(),
            'cross_attn': cross_attn_block(),
            'ffn_w1': w((d_model, d_ff), d_model),
            'ffn_w2': w((d_ff, d_model), d_ff),
            'trend_proj_w': w((3 * d_model, c_out), 3 * d_model),
        } for _ in range(cfg['d_layers'])],
        'dec_norm': {'gamma': jnp.ones((1, d_model), jnp.float32),
                     'beta': jnp.zeros((1, d_model), jnp.float32)},
        'dec_proj_w': w((d_model, c_out), d_model),
        'dec_proj_b': w((1, c_out), d_model),
    }


if __name__ == "__main__":
    cfg = dict(seq_len=16, label_len=8, pred_len=8,
               enc_in=4, dec_in=4, c_out=4,
               d_model=32, n_heads=4, d_ff=32,
               e_layers=1, d_layers=1,
               moving_avg=5, factor=1, mark_dim=4)   # embed='timeF', freq='h', relu

    key = jax.random.PRNGKey(0)
    kp, k1, k2, k3, k4 = jax.random.split(key, 5)
    params = init_params(kp, cfg)

    B = 2
    dec_len = cfg['label_len'] + cfg['pred_len']
    x_enc = jax.random.normal(k1, (B, cfg['seq_len'], cfg['enc_in']), jnp.float32)
    x_mark_enc = jax.random.normal(k2, (B, cfg['seq_len'], cfg['mark_dim']), jnp.float32)
    x_dec = jax.random.normal(k3, (B, dec_len, cfg['dec_in']), jnp.float32)
    x_mark_dec = jax.random.normal(k4, (B, dec_len, cfg['mark_dim']), jnp.float32)

    fwd = jax.jit(lambda p, a, b, c, d: autoformer_forward(p, cfg, a, b, c, d))
    out = jax.block_until_ready(fwd(params, x_enc, x_mark_enc, x_dec, x_mark_dec))

    assert out.shape == (B, cfg['pred_len'], cfg['c_out'])
    assert bool(jnp.all(jnp.isfinite(out)))
    print("KERNEL_OK")
</pallas_src>

<mosaic_0001>
module attributes {stable_mosaic.version = 11 : i64} {
  func.func @_decomp_kernel(%arg0: i32, %arg1: memref<1x16x4xf32, #tpu.memory_space<vmem>>, %arg2: memref<16x16xf32, #tpu.memory_space<vmem>>, %arg3: memref<1x16x4xf32, #tpu.memory_space<vmem>>, %arg4: memref<1x16x4xf32, #tpu.memory_space<vmem>>) attributes {dimension_semantics = [#tpu.dimension_semantics<parallel>], iteration_bounds = array<i64: 2>, scalar_prefetch = 0 : i64, scratch_operands = 0 : i64, tpu.core_type = #tpu.core_type<tc>, window_params = [{transform_indices = @transform_0, window_bounds = array<i64: 1, 16, 4>}, {pipeline_mode = #tpu.pipeline_mode<synchronous>, transform_indices = @transform_1, window_bounds = array<i64: 16, 16>}, {transform_indices = @transform_2, window_bounds = array<i64: 1, 16, 4>}, {transform_indices = @transform_3, window_bounds = array<i64: 1, 16, 4>}]} {
    %c0 = arith.constant 0 : index
    %c0_0 = arith.constant 0 : index
    %c0_1 = arith.constant 0 : index
    %0 = vector.load %arg1[%c0, %c0_0, %c0_1] : memref<1x16x4xf32, #tpu.memory_space<vmem>>, vector<1x16x4xf32>
    %1 = vector.shape_cast %0 : vector<1x16x4xf32> to vector<16x4xf32>
    %c0_2 = arith.constant 0 : index
    %c0_3 = arith.constant 0 : index
    %2 = vector.load %arg2[%c0_2, %c0_3] : memref<16x16xf32, #tpu.memory_space<vmem>>, vector<16x16xf32>
    %cst = arith.constant dense<0.000000e+00> : vector<16x4xf32>
    %3 = tpu.matmul %2, %1, %cst {dimension_numbers = #tpu.dot_dimension_numbers<[1], [0], [0], [1], [0, 0, 1, 1], [], []>} : vector<16x16xf32>, vector<16x4xf32>, vector<16x4xf32> -> vector<16x4xf32>
    %c0_4 = arith.constant 0 : index
    %c0_5 = arith.constant 0 : index
    %c0_6 = arith.constant 0 : index
    %4 = vector.load %arg4[%c0_4, %c0_5, %c0_6] : memref<1x16x4xf32, #tpu.memory_space<vmem>>, vector<1x16x4xf32>
    %5 = vector.shape_cast %4 : vector<1x16x4xf32> to vector<16x4xf32>
    %6 = vector.shape_cast %3 : vector<16x4xf32> to vector<1x16x4xf32>
    tpu.vector_store %arg4[%c0_4, %c0_5, %c0_6], %6 {strides = array<i32>} : memref<1x16x4xf32, #tpu.memory_space<vmem>>, vector<1x16x4xf32>,
    %7 = arith.subf %1, %3 : vector<16x4xf32>
    %c0_7 = arith.constant 0 : index
    %c0_8 = arith.constant 0 : index
    %c0_9 = arith.constant 0 : index
    %8 = vector.load %arg3[%c0_7, %c0_8, %c0_9] : memref<1x16x4xf32, #tpu.memory_space<vmem>>, vector<1x16x4xf32>
    %9 = vector.shape_cast %8 : vector<1x16x4xf32> to vector<16x4xf32>
    %10 = vector.shape_cast %7 : vector<16x4xf32> to vector<1x16x4xf32>
    tpu.vector_store %arg3[%c0_7, %c0_8, %c0_9], %10 {strides = array<i32>} : memref<1x16x4xf32, #tpu.memory_space<vmem>>, vector<1x16x4xf32>,
    return
  }
  func.func @transform_0(%arg0: i32) -> (i32, i32, i32) {
    %c0_i32 = arith.constant 0 : i32
    %c0_i32_0 = arith.constant 0 : i32
    %c0_i32_1 = arith.constant 0 : i32
    return %arg0, %c0_i32, %c0_i32_0 : i32, i32, i32
  }
  func.func @transform_1(%arg0: i32) -> (i32, i32) {
    %c0_i32 = arith.constant 0 : i32
    %c0_i32_0 = arith.constant 0 : i32
    %c0_i32_1 = arith.constant 0 : i32
    return %c0_i32, %c0_i32_0 : i32, i32
  }
  func.func @transform_2(%arg0: i32) -> (i32, i32, i32) {
    %c0_i32 = arith.constant 0 : i32
    %c0_i32_0 = arith.constant 0 : i32
    %c0_i32_1 = arith.constant 0 : i32
    return %arg0, %c0_i32, %c0_i32_0 : i32, i32, i32
  }
  func.func @transform_3(%arg0: i32) -> (i32, i32, i32) {
    %c0_i32 = arith.constant 0 : i32
    %c0_i32_0 = arith.constant 0 : i32
    %c0_i32_1 = arith.constant 0 : i32
    return %arg0, %c0_i32, %c0_i32_0 : i32, i32, i32
  }
}

module attributes {stable_mosaic.version = 11 : i64} {
  func.func @_embed_kernel(%arg0: i32, %arg1: memref<1x16x4xf32, #tpu.memory_space<vmem>>, %arg2: memref<1x16x4xf32, #tpu.memory_space<vmem>>, %arg3: memref<16x32xf32, #tpu.memory_space<vmem>>, %arg4: memref<1x16x32xf32, #tpu.memory_space<vmem>>) attributes {dimension_semantics = [#tpu.dimension_semantics<parallel>], iteration_bounds = array<i64: 2>, scalar_prefetch = 0 : i64, scratch_operands = 0 : i64, tpu.core_type = #tpu.core_type<tc>, window_params = [{transform_indices = @transform_0, window_bounds = array<i64: 1, 16, 4>}, {transform_indices = @transform_1, window_bounds = array<i64: 1, 16, 4>}, {pipeline_mode = #tpu.pipeline_mode<synchronous>, transform_indices = @transform_2, window_bounds = array<i64: 16, 32>}, {transform_indices = @transform_3, window_bounds = array<i64: 1, 16, 32>}]} {
    %c0 = arith.constant 0 : index
    %c0_0 = arith.constant 0 : index
    %c0_1 = arith.constant 0 : index
    %0 = vector.load %arg1[%c0, %c0_0, %c0_1] : memref<1x16x4xf32, #tpu.memory_space<vmem>>, vector<1x16x4xf32>
    %1 = vector.shape_cast %0 : vector<1x16x4xf32> to vector<16x4xf32>
    %2 = vector.extract_strided_slice %1 {offsets = [15, 0], sizes = [1, 4], strides = [1, 1]} : vector<16x4xf32> to vector<1x4xf32>
    %3 = vector.extract_strided_slice %1 {offsets = [0, 0], sizes = [15, 4], strides = [1, 1]} : vector<16x4xf32> to vector<15x4xf32>
    %4 = tpu.concatenate %2, %3 in 0 : vector<1x4xf32>, vector<15x4xf32> -> vector<16x4xf32>
    %5 = vector.extract_strided_slice %1 {offsets = [1, 0], sizes = [15, 4], strides = [1, 1]} : vector<16x4xf32> to vector<15x4xf32>
    %6 = vector.extract_strided_slice %1 {offsets = [0, 0], sizes = [1, 4], strides = [1, 1]} : vector<16x4xf32> to vector<1x4xf32>
    %7 = tpu.concatenate %5, %6 in 0 : vector<15x4xf32>, vector<1x4xf32> -> vector<16x4xf32>
    %c0_2 = arith.constant 0 : index
    %c0_3 = arith.constant 0 : index
    %c0_4 = arith.constant 0 : index
    %8 = vector.load %arg2[%c0_2, %c0_3, %c0_4] : memref<1x16x4xf32, #tpu.memory_space<vmem>>, vector<1x16x4xf32>
    %9 = vector.shape_cast %8 : vector<1x16x4xf32> to vector<16x4xf32>
    %10 = tpu.concatenate %4, %1, %7, %9 in 1 : vector<16x4xf32>, vector<16x4xf32>, vector<16x4xf32>, vector<16x4xf32> -> vector<16x16xf32>
    %c0_5 = arith.constant 0 : index
    %c0_6 = arith.constant 0 : index
    %11 = vector.load %arg3[%c0_5, %c0_6] : memref<16x32xf32, #tpu.memory_space<vmem>>, vector<16x32xf32>
    %cst = arith.constant dense<0.000000e+00> : vector<16x32xf32>
    %12 = tpu.matmul %10, %11, %cst {dimension_numbers = #tpu.dot_dimension_numbers<[1], [0], [0], [1], [0, 0, 1, 1], [], []>} : vector<16x16xf32>, vector<16x32xf32>, vector<16x32xf32> -> vector<16x32xf32>
    %c0_7 = arith.constant 0 : index
    %c0_8 = arith.constant 0 : index
    %c0_9 = arith.constant 0 : index
    %13 = vector.load %arg4[%c0_7, %c0_8, %c0_9] : memref<1x16x32xf32, #tpu.memory_space<vmem>>, vector<1x16x32xf32>
    %14 = vector.shape_cast %13 : vector<1x16x32xf32> to vector<16x32xf32>
    %15 = vector.shape_cast %12 : vector<16x32xf32> to vector<1x16x32xf32>
    tpu.vector_store %arg4[%c0_7, %c0_8, %c0_9], %15 {strides = array<i32>} : memref<1x16x32xf32, #tpu.memory_space<vmem>>, vector<1x16x32xf32>,
    return
  }
  func.func @transform_0(%arg0: i32) -> (i32, i32, i32) {
    %c0_i32 = arith.constant 0 : i32
    %c0_i32_0 = arith.constant 0 : i32
    %c0_i32_1 = arith.constant 0 : i32
    return %arg0, %c0_i32, %c0_i32_0 : i32, i32, i32
  }
  func.func @transform_1(%arg0: i32) -> (i32, i32, i32) {
    %c0_i32 = arith.constant 0 : i32
    %c0_i32_0 = arith.constant 0 : i32
    %c0_i32_1 = arith.constant 0 : i32
    return %arg0, %c0_i32, %c0_i32_0 : i32, i32, i32
  }
  func.func @transform_2(%arg0: i32) -> (i32, i32) {
    %c0_i32 = arith.constant 0 : i32
    %c0_i32_0 = arith.constant 0 : i32
    %c0_i32_1 = arith.constant 0 : i32
    return %c0_i32, %c0_i32_0 : i32, i32
  }
  func.func @transform_3(%arg0: i32) -> (i32, i32, i32) {
    %c0_i32 = arith.constant 0 : i32
    %c0_i32_0 = arith.constant 0 : i32
    %c0_i32_1 = arith.constant 0 : i32
    return %arg0, %c0_i32, %c0_i32_0 : i32, i32, i32
  }
}

module attributes {stable_mosaic.version = 11 : i64} {
  func.func @_self_qkv_corr_kernel(%arg0: i32, %arg1: memref<1x16x32xf32, #tpu.memory_space<vmem>>, %arg2: memref<32x96xf32, #tpu.memory_space<vmem>>, %arg3: memref<1x96xf32, #tpu.memory_space<vmem>>, %arg4: memref<1x16x32xf32, #tpu.memory_space<vmem>>, %arg5: memref<1x1x16xf32, #tpu.memory_space<vmem>>) attributes {dimension_semantics = [#tpu.dimension_semantics<parallel>], iteration_bounds = array<i64: 2>, scalar_prefetch = 0 : i64, scratch_operands = 0 : i64, tpu.core_type = #tpu.core_type<tc>, window_params = [{transform_indices = @transform_0, window_bounds = array<i64: 1, 16, 32>}, {pipeline_mode = #tpu.pipeline_mode<synchronous>, transform_indices = @transform_1, window_bounds = array<i64: 32, 96>}, {pipeline_mode = #tpu.pipeline_mode<synchronous>, transform_indices = @transform_2, window_bounds = array<i64: 1, 96>}, {transform_indices = @transform_3, window_bounds = array<i64: 1, 16, 32>}, {transform_indices = @transform_4, window_bounds = array<i64: 1, 1, 16>}]} {
    %c0 = arith.constant 0 : index
    %c0_0 = arith.constant 0 : index
    %c0_1 = arith.constant 0 : index
    %0 = vector.load %arg1[%c0, %c0_0, %c0_1] : memref<1x16x32xf32, #tpu.memory_space<vmem>>, vector<1x16x32xf32>
    %1 = vector.shape_cast %0 : vector<1x16x32xf32> to vector<16x32xf32>
    %c0_2 = arith.constant 0 : index
    %c0_3 = arith.constant 0 : index
    %2 = vector.load %arg2[%c0_2, %c0_3] : memref<32x96xf32, #tpu.memory_space<vmem>>, vector<32x96xf32>
    %cst = arith.constant dense<0.000000e+00> : vector<16x96xf32>
    %3 = tpu.matmul %1, %2, %cst {dimension_numbers = #tpu.dot_dimension_numbers<[1], [0], [0], [1], [0, 0, 1, 1], [], []>} : vector<16x32xf32>, vector<32x96xf32>, vector<16x96xf32> -> vector<16x96xf32>
    %c0_4 = arith.constant 0 : index
    %c0_5 = arith.constant 0 : index
    %4 = vector.load %arg3[%c0_4, %c0_5] : memref<1x96xf32, #tpu.memory_space<vmem>>, vector<1x96xf32>
    %5 = vector.broadcast %4 : vector<1x96xf32> to vector<16x96xf32>
    %6 = arith.addf %3, %5 : vector<16x96xf32>
    %7 = vector.extract_strided_slice %6 {offsets = [0, 0], sizes = [16, 32], strides = [1, 1]} : vector<16x96xf32> to vector<16x32xf32>
    %8 = vector.extract_strided_slice %6 {offsets = [0, 32], sizes = [16, 32], strides = [1, 1]} : vector<16x96xf32> to vector<16x32xf32>
    %9 = vector.extract_strided_slice %6 {offsets = [0, 64], sizes = [16, 32], strides = [1, 1]} : vector<16x96xf32> to vector<16x32xf32>
    %c0_6 = arith.constant 0 : index
    %c0_7 = arith.constant 0 : index
    %c0_8 = arith.constant 0 : index
    %10 = vector.load %arg4[%c0_6, %c0_7, %c0_8] : memref<1x16x32xf32, #tpu.memory_space<vmem>>, vector<1x16x32xf32>
    %11 = vector.shape_cast %10 : vector<1x16x32xf32> to vector<16x32xf32>
    %12 = vector.shape_cast %9 : vector<16x32xf32> to vector<1x16x32xf32>
    tpu.vector_store %arg4[%c0_6, %c0_7, %c0_8], %12 {strides = array<i32>} : memref<1x16x32xf32, #tpu.memory_space<vmem>>, vector<1x16x32xf32>,
    %cst_9 = arith.constant dense<0.000000e+00> : vector<16x16xf32>
    %13 = tpu.matmul %8, %7, %cst_9 {dimension_numbers = #tpu.dot_dimension_numbers<[1], [1], [0], [0], [0, 0, 1, 0], [], []>} : vector<16x32xf32>, vector<16x32xf32>, vector<16x16xf32> -> vector<16x16xf32>
    %14 = vector.extract_strided_slice %13 {offsets = [0, 0], sizes = [1, 16], strides = [1, 1]} : vector<16x16xf32> to vector<1x16xf32>
    %15 = vector.extract_strided_slice %13 {offsets = [1, 0], sizes = [1, 16], strides = [1, 1]} : vector<16x16xf32> to vector<1x16xf32>
    %16 = vector.extract_strided_slice %15 {offsets = [0, 1], sizes = [1, 15], strides = [1, 1]} : vector<1x16xf32> to vector<1x15xf32>
    %17 = vector.extract_strided_slice %15 {offsets = [0, 0], sizes = [1, 1], strides = [1, 1]} : vector<1x16xf32> to vector<1x1xf32>
    %18 = tpu.concatenate %16, %17 in 1 : vector<1x15xf32>, vector<1x1xf32> -> vector<1x16xf32>
    %19 = arith.addf %14, %18 : vector<1x16xf32>
    %20 = vector.extract_strided_slice %13 {offsets = [2, 0], sizes = [1, 16], strides = [1, 1]} : vector<16x16xf32> to vector<1x16xf32>
    %21 = vector.extract_strided_slice %20 {offsets = [0, 2], sizes = [1, 14], strides = [1, 1]} : vector<1x16xf32> to vector<1x14xf32>
    %22 = vector.extract_strided_slice %20 {offsets = [0, 0], sizes = [1, 2], strides = [1, 1]} : vector<1x16xf32> to vector<1x2xf32>
    %23 = tpu.concatenate %21, %22 in 1 : vector<1x14xf32>, vector<1x2xf32> -> vector<1x16xf32>
    %24 = arith.addf %19, %23 : vector<1x16xf32>
    %25 = vector.extract_strided_slice %13 {offsets = [3, 0], sizes = [1, 16], strides = [1, 1]} : vector<16x16xf32> to vector<1x16xf32>
    %26 = vector.extract_strided_slice %25 {offsets = [0, 3], sizes = [1, 13], strides = [1, 1]} : vector<1x16xf32> to vector<1x13xf32>
    %27 = vector.extract_strided_slice %25 {offsets = [0, 0], sizes = [1, 3], strides = [1, 1]} : vector<1x16xf32> to vector<1x3xf32>
    %28 = tpu.concatenate %26, %27 in 1 : vector<1x13xf32>, vector<1x3xf32> -> vector<1x16xf32>
    %29 = arith.addf %24, %28 : vector<1x16xf32>
    %30 = vector.extract_strided_slice %13 {offsets = [4, 0], sizes = [1, 16], strides = [1, 1]} : vector<16x16xf32> to vector<1x16xf32>
    %31 = vector.extract_strided_slice %30 {offsets = [0, 4], sizes = [1, 12], strides = [1, 1]} : vector<1x16xf32> to vector<1x12xf32>
    %32 = vector.extract_strided_slice %30 {offsets = [0, 0], sizes = [1, 4], strides = [1, 1]} : vector<1x16xf32> to vector<1x4xf32>
    %33 = tpu.concatenate %31, %32 in 1 : vector<1x12xf32>, vector<1x4xf32> -> vector<1x16xf32>
    %34 = arith.addf %29, %33 : vector<1x16xf32>
    %35 = vector.extract_strided_slice %13 {offsets = [5, 0], sizes = [1, 16], strides = [1, 1]} : vector<16x16xf32> to vector<1x16xf32>
    %36 = vector.extract_strided_slice %35 {offsets = [0, 5], sizes = [1, 11], strides = [1, 1]} : vector<1x16xf32> to vector<1x11xf32>
    %37 = vector.extract_strided_slice %35 {offsets = [0, 0], sizes = [1, 5], strides = [1, 1]} : vector<1x16xf32> to vector<1x5xf32>
    %38 = tpu.concatenate %36, %37 in 1 : vector<1x11xf32>, vector<1x5xf32> -> vector<1x16xf32>
    %39 = arith.addf %34, %38 : vector<1x16xf32>
    %40 = vector.extract_strided_slice %13 {offsets = [6, 0], sizes = [1, 16], strides = [1, 1]} : vector<16x16xf32> to vector<1x16xf32>
    %41 = vector.extract_strided_slice %40 {offsets = [0, 6], sizes = [1, 10], strides = [1, 1]} : vector<1x16xf32> to vector<1x10xf32>
    %42 = vector.extract_strided_slice %40 {offsets = [0, 0], sizes = [1, 6], strides = [1, 1]} : vector<1x16xf32> to vector<1x6xf32>
    %43 = tpu.concatenate %41, %42 in 1 : vector<1x10xf32>, vector<1x6xf32> -> vector<1x16xf32>
    %44 = arith.addf %39, %43 : vector<1x16xf32>
    %45 = vector.extract_strided_slice %13 {offsets = [7, 0], sizes = [1, 16], strides = [1, 1]} : vector<16x16xf32> to vector<1x16xf32>
    %46 = vector.extract_strided_slice %45 {offsets = [0, 7], sizes = [1, 9], strides = [1, 1]} : vector<1x16xf32> to vector<1x9xf32>
    %47 = vector.extract_strided_slice %45 {offsets = [0, 0], sizes = [1, 7], strides = [1, 1]} : vector<1x16xf32> to vector<1x7xf32>
    %48 = tpu.concatenate %46, %47 in 1 : vector<1x9xf32>, vector<1x7xf32> -> vector<1x16xf32>
    %49 = arith.addf %44, %48 : vector<1x16xf32>
    %50 = vector.extract_strided_slice %13 {offsets = [8, 0], sizes = [1, 16], strides = [1, 1]} : vector<16x16xf32> to vector<1x16xf32>
    %51 = vector.extract_strided_slice %50 {offsets = [0, 8], sizes = [1, 8], strides = [1, 1]} : vector<1x16xf32> to vector<1x8xf32>
    %52 = vector.extract_strided_slice %50 {offsets = [0, 0], sizes = [1, 8], strides = [1, 1]} : vector<1x16xf32> to vector<1x8xf32>
    %53 = tpu.concatenate %51, %52 in 1 : vector<1x8xf32>, vector<1x8xf32> -> vector<1x16xf32>
    %54 = arith.addf %49, %53 : vector<1x16xf32>
    %55 = vector.extract_strided_slice %13 {offsets = [9, 0], sizes = [1, 16], strides = [1, 1]} : vector<16x16xf32> to vector<1x16xf32>
    %56 = vector.extract_strided_slice %55 {offsets = [0, 9], sizes = [1, 7], strides = [1, 1]} : vector<1x16xf32> to vector<1x7xf32>
    %57 = vector.extract_strided_slice %55 {offsets = [0, 0], sizes = [1, 9], strides = [1, 1]} : vector<1x16xf32> to vector<1x9xf32>
    %58 = tpu.concatenate %56, %57 in 1 : vector<1x7xf32>, vector<1x9xf32> -> vector<1x16xf32>
    %59 = arith.addf %54, %58 : vector<1x16xf32>
    %60 = vector.extract_strided_slice %13 {offsets = [10, 0], sizes = [1, 16], strides = [1, 1]} : vector<16x16xf32> to vector<1x16xf32>
    %61 = vector.extract_strided_slice %60 {offsets = [0, 10], sizes = [1, 6], strides = [1, 1]} : vector<1x16xf32> to vector<1x6xf32>
    %62 = vector.extract_strided_slice %60 {offsets = [0, 0], sizes = [1, 10], strides = [1, 1]} : vector<1x16xf32> to vector<1x10xf32>
    %63 = tpu.concatenate %61, %62 in 1 : vector<1x6xf32>, vector<1x10xf32> -> vector<1x16xf32>
    %64 = arith.addf %59, %63 : vector<1x16xf32>
    %65 = vector.extract_strided_slice %13 {offsets = [11, 0], sizes = [1, 16], strides = [1, 1]} : vector<16x16xf32> to vector<1x16xf32>
    %66 = vector.extract_strided_slice %65 {offsets = [0, 11], sizes = [1, 5], strides = [1, 1]} : vector<1x16xf32> to vector<1x5xf32>
    %67 = vector.extract_strided_slice %65 {offsets = [0, 0], sizes = [1, 11], strides = [1, 1]} : vector<1x16xf32> to vector<1x11xf32>
    %68 = tpu.concatenate %66, %67 in 1 : vector<1x5xf32>, vector<1x11xf32> -> vector<1x16xf32>
    %69 = arith.addf %64, %68 : vector<1x16xf32>
    %70 = vector.extract_strided_slice %13 {offsets = [12, 0], sizes = [1, 16], strides = [1, 1]} : vector<16x16xf32> to vector<1x16xf32>
    %71 = vector.extract_strided_slice %70 {offsets = [0, 12], sizes = [1, 4], strides = [1, 1]} : vector<1x16xf32> to vector<1x4xf32>
    %72 = vector.extract_strided_slice %70 {offsets = [0, 0], sizes = [1, 12], strides = [1, 1]} : vector<1x16xf32> to vector<1x12xf32>
    %73 = tpu.concatenate %71, %72 in 1 : vector<1x4xf32>, vector<1x12xf32> -> vector<1x16xf32>
    %74 = arith.addf %69, %73 : vector<1x16xf32>
    %75 = vector.extract_strided_slice %13 {offsets = [13, 0], sizes = [1, 16], strides = [1, 1]} : vector<16x16xf32> to vector<1x16xf32>
    %76 = vector.extract_strided_slice %75 {offsets = [0, 13], sizes = [1, 3], strides = [1, 1]} : vector<1x16xf32> to vector<1x3xf32>
    %77 = vector.extract_strided_slice %75 {offsets = [0, 0], sizes = [1, 13], strides = [1, 1]} : vector<1x16xf32> to vector<1x13xf32>
    %78 = tpu.concatenate %76, %77 in 1 : vector<1x3xf32>, vector<1x13xf32> -> vector<1x16xf32>
    %79 = arith.addf %74, %78 : vector<1x16xf32>
    %80 = vector.extract_strided_slice %13 {offsets = [14, 0], sizes = [1, 16], strides = [1, 1]} : vector<16x16xf32> to vector<1x16xf32>
    %81 = vector.extract_strided_slice %80 {offsets = [0, 14], sizes = [1, 2], strides = [1, 1]} : vector<1x16xf32> to vector<1x2xf32>
    %82 = vector.extract_strided_slice %80 {offsets = [0, 0], sizes = [1, 14], strides = [1, 1]} : vector<1x16xf32> to vector<1x14xf32>
    %83 = tpu.concatenate %81, %82 in 1 : vector<1x2xf32>, vector<1x14xf32> -> vector<1x16xf32>
    %84 = arith.addf %79, %83 : vector<1x16xf32>
    %85 = vector.extract_strided_slice %13 {offsets = [15, 0], sizes = [1, 16], strides = [1, 1]} : vector<16x16xf32> to vector<1x16xf32>
    %86 = vector.extract_strided_slice %85 {offsets = [0, 15], sizes = [1, 1], strides = [1, 1]} : vector<1x16xf32> to vector<1x1xf32>
    %87 = vector.extract_strided_slice %85 {offsets = [0, 0], sizes = [1, 15], strides = [1, 1]} : vector<1x16xf32> to vector<1x15xf32>
    %88 = tpu.concatenate %86, %87 in 1 : vector<1x1xf32>, vector<1x15xf32> -> vector<1x16xf32>
    %89 = arith.addf %84, %88 : vector<1x16xf32>
    %cst_10 = arith.constant 3.125000e-02 : f32
    %90 = vector.broadcast %cst_10 : f32 to vector<1x16xf32>
    %91 = arith.mulf %89, %90 : vector<1x16xf32>
    %c0_11 = arith.constant 0 : index
    %c0_12 = arith.constant 0 : index
    %c0_13 = arith.constant 0 : index
    %92 = vector.load %arg5[%c0_11, %c0_12, %c0_13] : memref<1x1x16xf32, #tpu.memory_space<vmem>>, vector<1x1x16xf32>
    %93 = vector.shape_cast %92 : vector<1x1x16xf32> to vector<1x16xf32>
    %94 = vector.shape_cast %91 : vector<1x16xf32> to vector<1x1x16xf32>
    tpu.vector_store %arg5[%c0_11, %c0_12, %c0_13], %94 {strides = array<i32>} : memref<1x1x16xf32, #tpu.memory_space<vmem>>, vector<1x1x16xf32>,
    return
  }
  func.func @transform_0(%arg0: i32) -> (i32, i32, i32) {
    %c0_i32 = arith.constant 0 : i32
    %c0_i32_0 = arith.constant 0 : i32
    %c0_i32_1 = arith.constant 0 : i32
    return %arg0, %c0_i32, %c0_i32_0 : i32, i32, i32
  }
  func.func @transform_1(%arg0: i32) -> (i32, i32) {
    %c0_i32 = arith.constant 0 : i32
    %c0_i32_0 = arith.constant 0 : i32
    %c0_i32_1 = arith.constant 0 : i32
    return %c0_i32, %c0_i32_0 : i32, i32
  }
  func.func @transform_2(%arg0: i32) -> (i32, i32) {
    %c0_i32 = arith.constant 0 : i32
    %c0_i32_0 = arith.constant 0 : i32
    %c0_i32_1 = arith.constant 0 : i32
    return %c0_i32, %c0_i32_0 : i32, i32
  }
  func.func @transform_3(%arg0: i32) -> (i32, i32, i32) {
    %c0_i32 = arith.constant 0 : i32
    %c0_i32_0 = arith.constant 0 : i32
    %c0_i32_1 = arith.constant 0 : i32
    return %arg0, %c0_i32, %c0_i32_0 : i32, i32, i32
  }
  func.func @transform_4(%arg0: i32) -> (i32, i32, i32) {
    %c0_i32 = arith.constant 0 : i32
    %c0_i32_0 = arith.constant 0 : i32
    %c0_i32_1 = arith.constant 0 : i32
    return %arg0, %c0_i32, %c0_i32_0 : i32, i32, i32
  }
}

module attributes {stable_mosaic.version = 11 : i64} {
  func.func @_enc_tail_kernel(%arg0: i32, %arg1: memref<2x2xi32, #tpu.memory_space<smem>>, %arg2: memref<2x2xf32, #tpu.memory_space<smem>>, %arg3: memref<1x16x32xf32, #tpu.memory_space<vmem>>, %arg4: memref<1x16x32xf32, #tpu.memory_space<vmem>>, %arg5: memref<32x32xf32, #tpu.memory_space<vmem>>, %arg6: memref<1x32xf32, #tpu.memory_space<vmem>>, %arg7: memref<16x16xf32, #tpu.memory_space<vmem>>, %arg8: memref<32x32xf32, #tpu.memory_space<vmem>>, %arg9: memref<32x32xf32, #tpu.memory_space<vmem>>, %arg10: memref<1x16x32xf32, #tpu.memory_space<vmem>>, %arg11: memref<32x32xf32, #tpu.memory_space<vmem>>) attributes {dimension_semantics = [#tpu.dimension_semantics<parallel>], iteration_bounds = array<i64: 2>, scalar_prefetch = 2 : i64, scratch_operands = 1 : i64, tpu.core_type = #tpu.core_type<tc>, window_params = [{transform_indices = @transform_0, window_bounds = array<i64: 1, 16, 32>}, {transform_indices = @transform_1, window_bounds = array<i64: 1, 16, 32>}, {pipeline_mode = #tpu.pipeline_mode<synchronous>, transform_indices = @transform_2, window_bounds = array<i64: 32, 32>}, {pipeline_mode = #tpu.pipeline_mode<synchronous>, transform_indices = @transform_3, window_bounds = array<i64: 1, 32>}, {pipeline_mode = #tpu.pipeline_mode<synchronous>, transform_indices = @transform_4, window_bounds = array<i64: 16, 16>}, {pipeline_mode = #tpu.pipeline_mode<synchronous>, transform_indices = @transform_5, window_bounds = array<i64: 32, 32>}, {pipeline_mode = #tpu.pipeline_mode<synchronous>, transform_indices = @transform_6, window_bounds = array<i64: 32, 32>}, {transform_indices = @transform_7, window_bounds = array<i64: 1, 16, 32>}]} {
    %c0 = arith.constant 0 : index
    %c0_0 = arith.constant 0 : index
    %c0_1 = arith.constant 0 : index
    %0 = vector.load %arg3[%c0, %c0_0, %c0_1] : memref<1x16x32xf32, #tpu.memory_space<vmem>>, vector<1x16x32xf32>
    %1 = vector.shape_cast %0 : vector<1x16x32xf32> to vector<16x32xf32>
    %c0_2 = arith.constant 0 : index
    %c0_3 = arith.constant 0 : index
    %2 = vector.load %arg7[%c0_2, %c0_3] : memref<16x16xf32, #tpu.memory_space<vmem>>, vector<16x16xf32>
    %c0_4 = arith.constant 0 : index
    %c0_5 = arith.constant 0 : index
    %c0_6 = arith.constant 0 : index
    %3 = vector.load %arg4[%c0_4, %c0_5, %c0_6] : memref<1x16x32xf32, #tpu.memory_space<vmem>>, vector<1x16x32xf32>
    %4 = vector.shape_cast %3 : vector<1x16x32xf32> to vector<16x32xf32>
    %c0_7 = arith.constant 0 : index
    %c0_8 = arith.constant 0 : index
    %5 = vector.load %arg11[%c0_7, %c0_8] : memref<32x32xf32, #tpu.memory_space<vmem>>, vector<16x32xf32>
    tpu.vector_store %arg11[%c0_7, %c0_8], %4 {strides = array<i32>} : memref<32x32xf32, #tpu.memory_space<vmem>>, vector<16x32xf32>,
    %c16 = arith.constant 16 : index
    %c0_9 = arith.constant 0 : index
    %6 = vector.load %arg11[%c16, %c0_9] : memref<32x32xf32, #tpu.memory_space<vmem>>, vector<16x32xf32>
    tpu.vector_store %arg11[%c16, %c0_9], %4 {strides = array<i32>} : memref<32x32xf32, #tpu.memory_space<vmem>>, vector<16x32xf32>,
    %7 = arith.index_cast %arg0 : i32 to index
    %c0_10 = arith.constant 0 : index
    %8 = memref.load %arg2[%7, %c0_10] : memref<2x2xf32, #tpu.memory_space<smem>>
    %9 = arith.index_cast %arg0 : i32 to index
    %c0_11 = arith.constant 0 : index
    %10 = memref.load %arg1[%9, %c0_11] : memref<2x2xi32, #tpu.memory_space<smem>>
    %11 = arith.index_cast %10 : i32 to index
    %c0_12 = arith.constant 0 : index
    %12 = vector.load %arg11[%11, %c0_12] : memref<32x32xf32, #tpu.memory_space<vmem>>, vector<16x32xf32>
    %13 = vector.broadcast %8 : f32 to vector<16x32xf32>
    %14 = arith.mulf %13, %12 : vector<16x32xf32>
    %15 = arith.index_cast %arg0 : i32 to index
    %c1 = arith.constant 1 : index
    %16 = memref.load %arg2[%15, %c1] : memref<2x2xf32, #tpu.memory_space<smem>>
    %17 = arith.index_cast %arg0 : i32 to index
    %c1_13 = arith.constant 1 : index
    %18 = memref.load %arg1[%17, %c1_13] : memref<2x2xi32, #tpu.memory_space<smem>>
    %19 = arith.index_cast %18 : i32 to index
    %c0_14 = arith.constant 0 : index
    %20 = vector.load %arg11[%19, %c0_14] : memref<32x32xf32, #tpu.memory_space<vmem>>, vector<16x32xf32>
    %21 = vector.broadcast %16 : f32 to vector<16x32xf32>
    %22 = arith.mulf %21, %20 : vector<16x32xf32>
    %23 = arith.addf %14, %22 : vector<16x32xf32>
    %c0_15 = arith.constant 0 : index
    %c0_16 = arith.constant 0 : index
    %24 = vector.load %arg5[%c0_15, %c0_16] : memref<32x32xf32, #tpu.memory_space<vmem>>, vector<32x32xf32>
    %cst = arith.constant dense<0.000000e+00> : vector<16x32xf32>
    %25 = tpu.matmul %23, %24, %cst {dimension_numbers = #tpu.dot_dimension_numbers<[1], [0], [0], [1], [0, 0, 1, 1], [], []>} : vector<16x32xf32>, vector<32x32xf32>, vector<16x32xf32> -> vector<16x32xf32>
    %c0_17 = arith.constant 0 : index
    %c0_18 = arith.constant 0 : index
    %26 = vector.load %arg6[%c0_17, %c0_18] : memref<1x32xf32, #tpu.memory_space<vmem>>, vector<1x32xf32>
    %27 = vector.broadcast %26 : vector<1x32xf32> to vector<16x32xf32>
    %28 = arith.addf %25, %27 : vector<16x32xf32>
    %29 = arith.addf %1, %28 : vector<16x32xf32>
    %cst_19 = arith.constant dense<0.000000e+00> : vector<16x32xf32>
    %30 = tpu.matmul %2, %29, %cst_19 {dimension_numbers = #tpu.dot_dimension_numbers<[1], [0], [0], [1], [0, 0, 1, 1], [], []>} : vector<16x16xf32>, vector<16x32xf32>, vector<16x32xf32> -> vector<16x32xf32>
    %31 = arith.subf %29, %30 : vector<16x32xf32>
    %c0_20 = arith.constant 0 : index
    %c0_21 = arith.constant 0 : index
    %32 = vector.load %arg8[%c0_20, %c0_21] : memref<32x32xf32, #tpu.memory_space<vmem>>, vector<32x32xf32>
    %cst_22 = arith.constant dense<0.000000e+00> : vector<16x32xf32>
    %33 = tpu.matmul %31, %32, %cst_22 {dimension_numbers = #tpu.dot_dimension_numbers<[1], [0], [0], [1], [0, 0, 1, 1], [], []>} : vector<16x32xf32>, vector<32x32xf32>, vector<16x32xf32> -> vector<16x32xf32>
    %cst_23 = arith.constant 0.000000e+00 : f32
    %34 = vector.broadcast %cst_23 : f32 to vector<16x32xf32>
    %35 = arith.maximumf %33, %34 : vector<16x32xf32>
    %c0_24 = arith.constant 0 : index
    %c0_25 = arith.constant 0 : index
    %36 = vector.load %arg9[%c0_24, %c0_25] : memref<32x32xf32, #tpu.memory_space<vmem>>, vector<32x32xf32>
    %cst_26 = arith.constant dense<0.000000e+00> : vector<16x32xf32>
    %37 = tpu.matmul %35, %36, %cst_26 {dimension_numbers = #tpu.dot_dimension_numbers<[1], [0], [0], [1], [0, 0, 1, 1], [], []>} : vector<16x32xf32>, vector<32x32xf32>, vector<16x32xf32> -> vector<16x32xf32>
    %38 = arith.addf %31, %37 : vector<16x32xf32>
    %cst_27 = arith.constant dense<0.000000e+00> : vector<16x32xf32>
    %39 = tpu.matmul %2, %38, %cst_27 {dimension_numbers = #tpu.dot_dimension_numbers<[1], [0], [0], [1], [0, 0, 1, 1], [], []>} : vector<16x16xf32>, vector<16x32xf32>, vector<16x32xf32> -> vector<16x32xf32>
    %40 = arith.subf %38, %39 : vector<16x32xf32>
    %c0_28 = arith.constant 0 : index
    %c0_29 = arith.constant 0 : index
    %c0_30 = arith.constant 0 : index
    %41 = vector.load %arg10[%c0_28, %c0_29, %c0_30] : memref<1x16x32xf32, #tpu.memory_space<vmem>>, vector<1x16x32xf32>
    %42 = vector.shape_cast %41 : vector<1x16x32xf32> to vector<16x32xf32>
    %43 = vector.shape_cast %40 : vector<16x32xf32> to vector<1x16x32xf32>
    tpu.vector_store %arg10[%c0_28, %c0_29, %c0_30], %43 {strides = array<i32>} : memref<1x16x32xf32, #tpu.memory_space<vmem>>, vector<1x16x32xf32>,
    return
  }
  func.func @transform_0(%arg0: i32, %arg1: memref<2x2xi32, #tpu.memory_space<smem>>, %arg2: memref<2x2xf32, #tpu.memory_space<smem>>) -> (i32, i32, i32) {
    %c0_i32 = arith.constant 0 : i32
    %c0_i32_0 = arith.constant 0 : i32
    %c0_i32_1 = arith.constant 0 : i32
    return %arg0, %c0_i32, %c0_i32_0 : i32, i32, i32
  }
  func.func @transform_1(%arg0: i32, %arg1: memref<2x2xi32, #tpu.memory_space<smem>>, %arg2: memref<2x2xf32, #tpu.memory_space<smem>>) -> (i32, i32, i32) {
    %c0_i32 = arith.constant 0 : i32
    %c0_i32_0 = arith.constant 0 : i32
    %c0_i32_1 = arith.constant 0 : i32
    return %arg0, %c0_i32, %c0_i32_0 : i32, i32, i32
  }
  func.func @transform_2(%arg0: i32, %arg1: memref<2x2xi32, #tpu.memory_space<smem>>, %arg2: memref<2x2xf32, #tpu.memory_space<smem>>) -> (i32, i32) {
    %c0_i32 = arith.constant 0 : i32
    %c0_i32_0 = arith.constant 0 : i32
    %c0_i32_1 = arith.constant 0 : i32
    return %c0_i32, %c0_i32_0 : i32, i32
  }
  func.func @transform_3(%arg0: i32, %arg1: memref<2x2xi32, #tpu.memory_space<smem>>, %arg2: memref<2x2xf32, #tpu.memory_space<smem>>) -> (i32, i32) {
    %c0_i32 = arith.constant 0 : i32
    %c0_i32_0 = arith.constant 0 : i32
    %c0_i32_1 = arith.constant 0 : i32
    return %c0_i32, %c0_i32_0 : i32, i32
  }
  func.func @transform_4(%arg0: i32, %arg1: memref<2x2xi32, #tpu.memory_space<smem>>, %arg2: memref<2x2xf32, #tpu.memory_space<smem>>) -> (i32, i32) {
    %c0_i32 = arith.constant 0 : i32
    %c0_i32_0 = arith.constant 0 : i32
    %c0_i32_1 = arith.constant 0 : i32
    return %c0_i32, %c0_i32_0 : i32, i32
  }
  func.func @transform_5(%arg0: i32, %arg1: memref<2x2xi32, #tpu.memory_space<smem>>, %arg2: memref<2x2xf32, #tpu.memory_space<smem>>) -> (i32, i32) {
    %c0_i32 = arith.constant 0 : i32
    %c0_i32_0 = arith.constant 0 : i32
    %c0_i32_1 = arith.constant 0 : i32
    return %c0_i32, %c0_i32_0 : i32, i32
  }
  func.func @transform_6(%arg0: i32, %arg1: memref<2x2xi32, #tpu.memory_space<smem>>, %arg2: memref<2x2xf32, #tpu.memory_space<smem>>) -> (i32, i32) {
    %c0_i32 = arith.constant 0 : i32
    %c0_i32_0 = arith.constant 0 : i32
    %c0_i32_1 = arith.constant 0 : i32
    return %c0_i32, %c0_i32_0 : i32, i32
  }
  func.func @transform_7(%arg0: i32, %arg1: memref<2x2xi32, #tpu.memory_space<smem>>, %arg2: memref<2x2xf32, #tpu.memory_space<smem>>) -> (i32, i32, i32) {
    %c0_i32 = arith.constant 0 : i32
    %c0_i32_0 = arith.constant 0 : i32
    %c0_i32_1 = arith.constant 0 : i32
    return %arg0, %c0_i32, %c0_i32_0 : i32, i32, i32
  }
}

module attributes {stable_mosaic.version = 11 : i64} {
  func.func @_mylayernorm_kernel(%arg0: i32, %arg1: memref<1x16x32xf32, #tpu.memory_space<vmem>>, %arg2: memref<1x32xf32, #tpu.memory_space<vmem>>, %arg3: memref<1x32xf32, #tpu.memory_space<vmem>>, %arg4: memref<1x16x32xf32, #tpu.memory_space<vmem>>) attributes {dimension_semantics = [#tpu.dimension_semantics<parallel>], iteration_bounds = array<i64: 2>, scalar_prefetch = 0 : i64, scratch_operands = 0 : i64, tpu.core_type = #tpu.core_type<tc>, window_params = [{transform_indices = @transform_0, window_bounds = array<i64: 1, 16, 32>}, {pipeline_mode = #tpu.pipeline_mode<synchronous>, transform_indices = @transform_1, window_bounds = array<i64: 1, 32>}, {pipeline_mode = #tpu.pipeline_mode<synchronous>, transform_indices = @transform_2, window_bounds = array<i64: 1, 32>}, {transform_indices = @transform_3, window_bounds = array<i64: 1, 16, 32>}]} {
    %c0 = arith.constant 0 : index
    %c0_0 = arith.constant 0 : index
    %c0_1 = arith.constant 0 : index
    %0 = vector.load %arg1[%c0, %c0_0, %c0_1] : memref<1x16x32xf32, #tpu.memory_space<vmem>>, vector<1x16x32xf32>
    %1 = vector.shape_cast %0 : vector<1x16x32xf32> to vector<16x32xf32>
    %c0_2 = arith.constant 0 : index
    %c0_3 = arith.constant 0 : index
    %2 = vector.load %arg2[%c0_2, %c0_3] : memref<1x32xf32, #tpu.memory_space<vmem>>, vector<1x32xf32>
    %c0_4 = arith.constant 0 : index
    %c0_5 = arith.constant 0 : index
    %3 = vector.load %arg3[%c0_4, %c0_5] : memref<1x32xf32, #tpu.memory_space<vmem>>, vector<1x32xf32>
    %cst = arith.constant dense<0.000000e+00> : vector<16xf32>
    %4 = vector.multi_reduction <add>, %1, %cst [1] : vector<16x32xf32> to vector<16xf32>
    %5 = vector.shape_cast %4 : vector<16xf32> to vector<16x1xf32>
    %cst_6 = arith.constant 3.200000e+01 : f32
    %6 = vector.broadcast %cst_6 : f32 to vector<16x1xf32>
    %7 = arith.divf %5, %6 : vector<16x1xf32>
    %8 = vector.broadcast %7 : vector<16x1xf32> to vector<16x32xf32>
    %9 = arith.subf %1, %8 : vector<16x32xf32>
    %10 = arith.mulf %9, %9 : vector<16x32xf32>
    %cst_7 = arith.constant dense<0.000000e+00> : vector<16xf32>
    %11 = vector.multi_reduction <add>, %10, %cst_7 [1] : vector<16x32xf32> to vector<16xf32>
    %12 = vector.shape_cast %11 : vector<16xf32> to vector<16x1xf32>
    %cst_8 = arith.constant 3.200000e+01 : f32
    %13 = vector.broadcast %cst_8 : f32 to vector<16x1xf32>
    %14 = arith.divf %12, %13 : vector<16x1xf32>
    %cst_9 = arith.constant 9.99999974E-6 : f32
    %15 = vector.broadcast %cst_9 : f32 to vector<16x1xf32>
    %16 = arith.addf %14, %15 : vector<16x1xf32>
    %17 = math.rsqrt %16 : vector<16x1xf32>
    %18 = vector.broadcast %17 : vector<16x1xf32> to vector<16x32xf32>
    %19 = arith.mulf %9, %18 : vector<16x32xf32>
    %20 = vector.broadcast %2 : vector<1x32xf32> to vector<16x32xf32>
    %21 = arith.mulf %19, %20 : vector<16x32xf32>
    %22 = vector.broadcast %3 : vector<1x32xf32> to vector<16x32xf32>
    %23 = arith.addf %21, %22 : vector<16x32xf32>
    %cst_10 = arith.constant dense<0.000000e+00> : vector<32xf32>
    %24 = vector.multi_reduction <add>, %23, %cst_10 [0] : vector<16x32xf32> to vector<32xf32>
    %25 = vector.shape_cast %24 : vector<32xf32> to vector<1x32xf32>
    %cst_11 = arith.constant 1.600000e+01 : f32
    %26 = vector.broadcast %cst_11 : f32 to vector<1x32xf32>
    %27 = arith.divf %25, %26 : vector<1x32xf32>
    %28 = vector.broadcast %27 : vector<1x32xf32> to vector<16x32xf32>
    %29 = arith.subf %23, %28 : vector<16x32xf32>
    %c0_12 = arith.constant 0 : index
    %c0_13 = arith.constant 0 : index
    %c0_14 = arith.constant 0 : index
    %30 = vector.load %arg4[%c0_12, %c0_13, %c0_14] : memref<1x16x32xf32, #tpu.memory_space<vmem>>, vector<1x16x32xf32>
    %31 = vector.shape_cast %30 : vector<1x16x32xf32> to vector<16x32xf32>
    %32 = vector.shape_cast %29 : vector<16x32xf32> to vector<1x16x32xf32>
    tpu.vector_store %arg4[%c0_12, %c0_13, %c0_14], %32 {strides = array<i32>} : memref<1x16x32xf32, #tpu.memory_space<vmem>>, vector<1x16x32xf32>,
    return
  }
  func.func @transform_0(%arg0: i32) -> (i32, i32, i32) {
    %c0_i32 = arith.constant 0 : i32
    %c0_i32_0 = arith.constant 0 : i32
    %c0_i32_1 = arith.constant 0 : i32
    return %arg0, %c0_i32, %c0_i32_0 : i32, i32, i32
  }
  func.func @transform_1(%arg0: i32) -> (i32, i32) {
    %c0_i32 = arith.constant 0 : i32
    %c0_i32_0 = arith.constant 0 : i32
    %c0_i32_1 = arith.constant 0 : i32
    return %c0_i32, %c0_i32_0 : i32, i32
  }
  func.func @transform_2(%arg0: i32) -> (i32, i32) {
    %c0_i32 = arith.constant 0 : i32
    %c0_i32_0 = arith.constant 0 : i32
    %c0_i32_1 = arith.constant 0 : i32
    return %c0_i32, %c0_i32_0 : i32, i32
  }
  func.func @transform_3(%arg0: i32) -> (i32, i32, i32) {
    %c0_i32 = arith.constant 0 : i32
    %c0_i32_0 = arith.constant 0 : i32
    %c0_i32_1 = arith.constant 0 : i32
    return %arg0, %c0_i32, %c0_i32_0 : i32, i32, i32
  }
}

module attributes {stable_mosaic.version = 11 : i64} {
  func.func @_dec_mid_kernel(%arg0: i32, %arg1: memref<2x2xi32, #tpu.memory_space<smem>>, %arg2: memref<2x2xf32, #tpu.memory_space<smem>>, %arg3: memref<1x16x32xf32, #tpu.memory_space<vmem>>, %arg4: memref<1x16x32xf32, #tpu.memory_space<vmem>>, %arg5: memref<1x16x32xf32, #tpu.memory_space<vmem>>, %arg6: memref<32x32xf32, #tpu.memory_space<vmem>>, %arg7: memref<1x32xf32, #tpu.memory_space<vmem>>, %arg8: memref<16x16xf32, #tpu.memory_space<vmem>>, %arg9: memref<32x32xf32, #tpu.memory_space<vmem>>, %arg10: memref<1x32xf32, #tpu.memory_space<vmem>>, %arg11: memref<32x64xf32, #tpu.memory_space<vmem>>, %arg12: memref<1x64xf32, #tpu.memory_space<vmem>>, %arg13: memref<1x16x32xf32, #tpu.memory_space<vmem>>, %arg14: memref<1x16x32xf32, #tpu.memory_space<vmem>>, %arg15: memref<1x16x32xf32, #tpu.memory_space<vmem>>, %arg16: memref<1x1x16xf32, #tpu.memory_space<vmem>>, %arg17: memref<32x32xf32, #tpu.memory_space<vmem>>) attributes {dimension_semantics = [#tpu.dimension_semantics<parallel>], iteration_bounds = array<i64: 2>, scalar_prefetch = 2 : i64, scratch_operands = 1 : i64, tpu.core_type = #tpu.core_type<tc>, window_params = [{transform_indices = @transform_0, window_bounds = array<i64: 1, 16, 32>}, {transform_indices = @transform_1, window_bounds = array<i64: 1, 16, 32>}, {transform_indices = @transform_2, window_bounds = array<i64: 1, 16, 32>}, {pipeline_mode = #tpu.pipeline_mode<synchronous>, transform_indices = @transform_3, window_bounds = array<i64: 32, 32>}, {pipeline_mode = #tpu.pipeline_mode<synchronous>, transform_indices = @transform_4, window_bounds = array<i64: 1, 32>}, {pipeline_mode = #tpu.pipeline_mode<synchronous>, transform_indices = @transform_5, window_bounds = array<i64: 16, 16>}, {pipeline_mode = #tpu.pipeline_mode<synchronous>, transform_indices = @transform_6, window_bounds = array<i64: 32, 32>}, {pipeline_mode = #tpu.pipeline_mode<synchronous>, transform_indices = @transform_7, window_bounds = array<i64: 1, 32>}, {pipeline_mode = #tpu.pipeline_mode<synchronous>, transform_indices = @transform_8, window_bounds = array<i64: 32, 64>}, {pipeline_mode = #tpu.pipeline_mode<synchronous>, transform_indices = @transform_9, window_bounds = array<i64: 1, 64>}, {transform_indices = @transform_10, window_bounds = array<i64: 1, 16, 32>}, {transform_indices = @transform_11, window_bounds = array<i64: 1, 16, 32>}, {transform_indices = @transform_12, window_bounds = array<i64: 1, 16, 32>}, {transform_indices = @transform_13, window_bounds = array<i64: 1, 1, 16>}]} {
    %c0 = arith.constant 0 : index
    %c0_0 = arith.constant 0 : index
    %c0_1 = arith.constant 0 : index
    %0 = vector.load %arg3[%c0, %c0_0, %c0_1] : memref<1x16x32xf32, #tpu.memory_space<vmem>>, vector<1x16x32xf32>
    %1 = vector.shape_cast %0 : vector<1x16x32xf32> to vector<16x32xf32>
    %c0_2 = arith.constant 0 : index
    %c0_3 = arith.constant 0 : index
    %2 = vector.load %arg8[%c0_2, %c0_3] : memref<16x16xf32, #tpu.memory_space<vmem>>, vector<16x16xf32>
    %c0_4 = arith.constant 0 : index
    %c0_5 = arith.constant 0 : index
    %c0_6 = arith.constant 0 : index
    %3 = vector.load %arg4[%c0_4, %c0_5, %c0_6] : memref<1x16x32xf32, #tpu.memory_space<vmem>>, vector<1x16x32xf32>
    %4 = vector.shape_cast %3 : vector<1x16x32xf32> to vector<16x32xf32>
    %c0_7 = arith.constant 0 : index
    %c0_8 = arith.constant 0 : index
    %5 = vector.load %arg17[%c0_7, %c0_8] : memref<32x32xf32, #tpu.memory_space<vmem>>, vector<16x32xf32>
    tpu.vector_store %arg17[%c0_7, %c0_8], %4 {strides = array<i32>} : memref<32x32xf32, #tpu.memory_space<vmem>>, vector<16x32xf32>,
    %c16 = arith.constant 16 : index
    %c0_9 = arith.constant 0 : index
    %6 = vector.load %arg17[%c16, %c0_9] : memref<32x32xf32, #tpu.memory_space<vmem>>, vector<16x32xf32>
    tpu.vector_store %arg17[%c16, %c0_9], %4 {strides = array<i32>} : memref<32x32xf32, #tpu.memory_space<vmem>>, vector<16x32xf32>,
    %7 = arith.index_cast %arg0 : i32 to index
    %c0_10 = arith.constant 0 : index
    %8 = memref.load %arg2[%7, %c0_10] : memref<2x2xf32, #tpu.memory_space<smem>>
    %9 = arith.index_cast %arg0 : i32 to index
    %c0_11 = arith.constant 0 : index
    %10 = memref.load %arg1[%9, %c0_11] : memref<2x2xi32, #tpu.memory_space<smem>>
    %11 = arith.index_cast %10 : i32 to index
    %c0_12 = arith.constant 0 : index
    %12 = vector.load %arg17[%11, %c0_12] : memref<32x32xf32, #tpu.memory_space<vmem>>, vector<16x32xf32>
    %13 = vector.broadcast %8 : f32 to vector<16x32xf32>
    %14 = arith.mulf %13, %12 : vector<16x32xf32>
    %15 = arith.index_cast %arg0 : i32 to index
    %c1 = arith.constant 1 : index
    %16 = memref.load %arg2[%15, %c1] : memref<2x2xf32, #tpu.memory_space<smem>>
    %17 = arith.index_cast %arg0 : i32 to index
    %c1_13 = arith.constant 1 : index
    %18 = memref.load %arg1[%17, %c1_13] : memref<2x2xi32, #tpu.memory_space<smem>>
    %19 = arith.index_cast %18 : i32 to index
    %c0_14 = arith.constant 0 : index
    %20 = vector.load %arg17[%19, %c0_14] : memref<32x32xf32, #tpu.memory_space<vmem>>, vector<16x32xf32>
    %21 = vector.broadcast %16 : f32 to vector<16x32xf32>
    %22 = arith.mulf %21, %20 : vector<16x32xf32>
    %23 = arith.addf %14, %22 : vector<16x32xf32>
    %c0_15 = arith.constant 0 : index
    %c0_16 = arith.constant 0 : index
    %24 = vector.load %arg6[%c0_15, %c0_16] : memref<32x32xf32, #tpu.memory_space<vmem>>, vector<32x32xf32>
    %cst = arith.constant dense<0.000000e+00> : vector<16x32xf32>
    %25 = tpu.matmul %23, %24, %cst {dimension_numbers = #tpu.dot_dimension_numbers<[1], [0], [0], [1], [0, 0, 1, 1], [], []>} : vector<16x32xf32>, vector<32x32xf32>, vector<16x32xf32> -> vector<16x32xf32>
    %c0_17 = arith.constant 0 : index
    %c0_18 = arith.constant 0 : index
    %26 = vector.load %arg7[%c0_17, %c0_18] : memref<1x32xf32, #tpu.memory_space<vmem>>, vector<1x32xf32>
    %27 = vector.broadcast %26 : vector<1x32xf32> to vector<16x32xf32>
    %28 = arith.addf %25, %27 : vector<16x32xf32>
    %29 = arith.addf %1, %28 : vector<16x32xf32>
    %cst_19 = arith.constant dense<0.000000e+00> : vector<16x32xf32>
    %30 = tpu.matmul %2, %29, %cst_19 {dimension_numbers = #tpu.dot_dimension_numbers<[1], [0], [0], [1], [0, 0, 1, 1], [], []>} : vector<16x16xf32>, vector<16x32xf32>, vector<16x32xf32> -> vector<16x32xf32>
    %31 = arith.subf %29, %30 : vector<16x32xf32>
    %c0_20 = arith.constant 0 : index
    %c0_21 = arith.constant 0 : index
    %c0_22 = arith.constant 0 : index
    %32 = vector.load %arg13[%c0_20, %c0_21, %c0_22] : memref<1x16x32xf32, #tpu.memory_space<vmem>>, vector<1x16x32xf32>
    %33 = vector.shape_cast %32 : vector<1x16x32xf32> to vector<16x32xf32>
    %34 = vector.shape_cast %31 : vector<16x32xf32> to vector<1x16x32xf32>
    tpu.vector_store %arg13[%c0_20, %c0_21, %c0_22], %34 {strides = array<i32>} : memref<1x16x32xf32, #tpu.memory_space<vmem>>, vector<1x16x32xf32>,
    %c0_23 = arith.constant 0 : index
    %c0_24 = arith.constant 0 : index
    %c0_25 = arith.constant 0 : index
    %35 = vector.load %arg14[%c0_23, %c0_24, %c0_25] : memref<1x16x32xf32, #tpu.memory_space<vmem>>, vector<1x16x32xf32>
    %36 = vector.shape_cast %35 : vector<1x16x32xf32> to vector<16x32xf32>
    %37 = vector.shape_cast %30 : vector<16x32xf32> to vector<1x16x32xf32>
    tpu.vector_store %arg14[%c0_23, %c0_24, %c0_25], %37 {strides = array<i32>} : memref<1x16x32xf32, #tpu.memory_space<vmem>>, vector<1x16x32xf32>,
    %c0_26 = arith.constant 0 : index
    %c0_27 = arith.constant 0 : index
    %38 = vector.load %arg9[%c0_26, %c0_27] : memref<32x32xf32, #tpu.memory_space<vmem>>, vector<32x32xf32>
    %cst_28 = arith.constant dense<0.000000e+00> : vector<16x32xf32>
    %39 = tpu.matmul %31, %38, %cst_28 {dimension_numbers = #tpu.dot_dimension_numbers<[1], [0], [0], [1], [0, 0, 1, 1], [], []>} : vector<16x32xf32>, vector<32x32xf32>, vector<16x32xf32> -> vector<16x32xf32>
    %c0_29 = arith.constant 0 : index
    %c0_30 = arith.constant 0 : index
    %40 = vector.load %arg10[%c0_29, %c0_30] : memref<1x32xf32, #tpu.memory_space<vmem>>, vector<1x32xf32>
    %41 = vector.broadcast %40 : vector<1x32xf32> to vector<16x32xf32>
    %42 = arith.addf %39, %41 : vector<16x32xf32>
    %c0_31 = arith.constant 0 : index
    %c0_32 = arith.constant 0 : index
    %c0_33 = arith.constant 0 : index
    %43 = vector.load %arg5[%c0_31, %c0_32, %c0_33] : memref<1x16x32xf32, #tpu.memory_space<vmem>>, vector<1x16x32xf32>
    %44 = vector.shape_cast %43 : vector<1x16x32xf32> to vector<16x32xf32>
    %c0_34 = arith.constant 0 : index
    %c0_35 = arith.constant 0 : index
    %45 = vector.load %arg11[%c0_34, %c0_35] : memref<32x64xf32, #tpu.memory_space<vmem>>, vector<32x64xf32>
    %cst_36 = arith.constant dense<0.000000e+00> : vector<16x64xf32>
    %46 = tpu.matmul %44, %45, %cst_36 {dimension_numbers = #tpu.dot_dimension_numbers<[1], [0], [0], [1], [0, 0, 1, 1], [], []>} : vector<16x32xf32>, vector<32x64xf32>, vector<16x64xf32> -> vector<16x64xf32>
    %c0_37 = arith.constant 0 : index
    %c0_38 = arith.constant 0 : index
    %47 = vector.load %arg12[%c0_37, %c0_38] : memref<1x64xf32, #tpu.memory_space<vmem>>, vector<1x64xf32>
    %48 = vector.broadcast %47 : vector<1x64xf32> to vector<16x64xf32>
    %49 = arith.addf %46, %48 : vector<16x64xf32>
    %50 = vector.extract_strided_slice %49 {offsets = [0, 0], sizes = [16, 32], strides = [1, 1]} : vector<16x64xf32> to vector<16x32xf32>
    %51 = vector.extract_strided_slice %49 {offsets = [0, 32], sizes = [16, 32], strides = [1, 1]} : vector<16x64xf32> to vector<16x32xf32>
    %c0_39 = arith.constant 0 : index
    %c0_40 = arith.constant 0 : index
    %c0_41 = arith.constant 0 : index
    %52 = vector.load %arg15[%c0_39, %c0_40, %c0_41] : memref<1x16x32xf32, #tpu.memory_space<vmem>>, vector<1x16x32xf32>
    %53 = vector.shape_cast %52 : vector<1x16x32xf32> to vector<16x32xf32>
    %54 = vector.shape_cast %51 : vector<16x32xf32> to vector<1x16x32xf32>
    tpu.vector_store %arg15[%c0_39, %c0_40, %c0_41], %54 {strides = array<i32>} : memref<1x16x32xf32, #tpu.memory_space<vmem>>, vector<1x16x32xf32>,
    %cst_42 = arith.constant dense<0.000000e+00> : vector<16x16xf32>
    %55 = tpu.matmul %50, %42, %cst_42 {dimension_numbers = #tpu.dot_dimension_numbers<[1], [1], [0], [0], [0, 0, 1, 0], [], []>} : vector<16x32xf32>, vector<16x32xf32>, vector<16x16xf32> -> vector<16x16xf32>
    %56 = vector.extract_strided_slice %55 {offsets = [0, 0], sizes = [1, 16], strides = [1, 1]} : vector<16x16xf32> to vector<1x16xf32>
    %57 = vector.extract_strided_slice %55 {offsets = [1, 0], sizes = [1, 16], strides = [1, 1]} : vector<16x16xf32> to vector<1x16xf32>
    %58 = vector.extract_strided_slice %57 {offsets = [0, 1], sizes = [1, 15], strides = [1, 1]} : vector<1x16xf32> to vector<1x15xf32>
    %59 = vector.extract_strided_slice %57 {offsets = [0, 0], sizes = [1, 1], strides = [1, 1]} : vector<1x16xf32> to vector<1x1xf32>
    %60 = tpu.concatenate %58, %59 in 1 : vector<1x15xf32>, vector<1x1xf32> -> vector<1x16xf32>
    %61 = arith.addf %56, %60 : vector<1x16xf32>
    %62 = vector.extract_strided_slice %55 {offsets = [2, 0], sizes = [1, 16], strides = [1, 1]} : vector<16x16xf32> to vector<1x16xf32>
    %63 = vector.extract_strided_slice %62 {offsets = [0, 2], sizes = [1, 14], strides = [1, 1]} : vector<1x16xf32> to vector<1x14xf32>
    %64 = vector.extract_strided_slice %62 {offsets = [0, 0], sizes = [1, 2], strides = [1, 1]} : vector<1x16xf32> to vector<1x2xf32>
    %65 = tpu.concatenate %63, %64 in 1 : vector<1x14xf32>, vector<1x2xf32> -> vector<1x16xf32>
    %66 = arith.addf %61, %65 : vector<1x16xf32>
    %67 = vector.extract_strided_slice %55 {offsets = [3, 0], sizes = [1, 16], strides = [1, 1]} : vector<16x16xf32> to vector<1x16xf32>
    %68 = vector.extract_strided_slice %67 {offsets = [0, 3], sizes = [1, 13], strides = [1, 1]} : vector<1x16xf32> to vector<1x13xf32>
    %69 = vector.extract_strided_slice %67 {offsets = [0, 0], sizes = [1, 3], strides = [1, 1]} : vector<1x16xf32> to vector<1x3xf32>
    %70 = tpu.concatenate %68, %69 in 1 : vector<1x13xf32>, vector<1x3xf32> -> vector<1x16xf32>
    %71 = arith.addf %66, %70 : vector<1x16xf32>
    %72 = vector.extract_strided_slice %55 {offsets = [4, 0], sizes = [1, 16], strides = [1, 1]} : vector<16x16xf32> to vector<1x16xf32>
    %73 = vector.extract_strided_slice %72 {offsets = [0, 4], sizes = [1, 12], strides = [1, 1]} : vector<1x16xf32> to vector<1x12xf32>
    %74 = vector.extract_strided_slice %72 {offsets = [0, 0], sizes = [1, 4], strides = [1, 1]} : vector<1x16xf32> to vector<1x4xf32>
    %75 = tpu.concatenate %73, %74 in 1 : vector<1x12xf32>, vector<1x4xf32> -> vector<1x16xf32>
    %76 = arith.addf %71, %75 : vector<1x16xf32>
    %77 = vector.extract_strided_slice %55 {offsets = [5, 0], sizes = [1, 16], strides = [1, 1]} : vector<16x16xf32> to vector<1x16xf32>
    %78 = vector.extract_strided_slice %77 {offsets = [0, 5], sizes = [1, 11], strides = [1, 1]} : vector<1x16xf32> to vector<1x11xf32>
    %79 = vector.extract_strided_slice %77 {offsets = [0, 0], sizes = [1, 5], strides = [1, 1]} : vector<1x16xf32> to vector<1x5xf32>
    %80 = tpu.concatenate %78, %79 in 1 : vector<1x11xf32>, vector<1x5xf32> -> vector<1x16xf32>
    %81 = arith.addf %76, %80 : vector<1x16xf32>
    %82 = vector.extract_strided_slice %55 {offsets = [6, 0], sizes = [1, 16], strides = [1, 1]} : vector<16x16xf32> to vector<1x16xf32>
    %83 = vector.extract_strided_slice %82 {offsets = [0, 6], sizes = [1, 10], strides = [1, 1]} : vector<1x16xf32> to vector<1x10xf32>
    %84 = vector.extract_strided_slice %82 {offsets = [0, 0], sizes = [1, 6], strides = [1, 1]} : vector<1x16xf32> to vector<1x6xf32>
    %85 = tpu.concatenate %83, %84 in 1 : vector<1x10xf32>, vector<1x6xf32> -> vector<1x16xf32>
    %86 = arith.addf %81, %85 : vector<1x16xf32>
    %87 = vector.extract_strided_slice %55 {offsets = [7, 0], sizes = [1, 16], strides = [1, 1]} : vector<16x16xf32> to vector<1x16xf32>
    %88 = vector.extract_strided_slice %87 {offsets = [0, 7], sizes = [1, 9], strides = [1, 1]} : vector<1x16xf32> to vector<1x9xf32>
    %89 = vector.extract_strided_slice %87 {offsets = [0, 0], sizes = [1, 7], strides = [1, 1]} : vector<1x16xf32> to vector<1x7xf32>
    %90 = tpu.concatenate %88, %89 in 1 : vector<1x9xf32>, vector<1x7xf32> -> vector<1x16xf32>
    %91 = arith.addf %86, %90 : vector<1x16xf32>
    %92 = vector.extract_strided_slice %55 {offsets = [8, 0], sizes = [1, 16], strides = [1, 1]} : vector<16x16xf32> to vector<1x16xf32>
    %93 = vector.extract_strided_slice %92 {offsets = [0, 8], sizes = [1, 8], strides = [1, 1]} : vector<1x16xf32> to vector<1x8xf32>
    %94 = vector.extract_strided_slice %92 {offsets = [0, 0], sizes = [1, 8], strides = [1, 1]} : vector<1x16xf32> to vector<1x8xf32>
    %95 = tpu.concatenate %93, %94 in 1 : vector<1x8xf32>, vector<1x8xf32> -> vector<1x16xf32>
    %96 = arith.addf %91, %95 : vector<1x16xf32>
    %97 = vector.extract_strided_slice %55 {offsets = [9, 0], sizes = [1, 16], strides = [1, 1]} : vector<16x16xf32> to vector<1x16xf32>
    %98 = vector.extract_strided_slice %97 {offsets = [0, 9], sizes = [1, 7], strides = [1, 1]} : vector<1x16xf32> to vector<1x7xf32>
    %99 = vector.extract_strided_slice %97 {offsets = [0, 0], sizes = [1, 9], strides = [1, 1]} : vector<1x16xf32> to vector<1x9xf32>
    %100 = tpu.concatenate %98, %99 in 1 : vector<1x7xf32>, vector<1x9xf32> -> vector<1x16xf32>
    %101 = arith.addf %96, %100 : vector<1x16xf32>
    %102 = vector.extract_strided_slice %55 {offsets = [10, 0], sizes = [1, 16], strides = [1, 1]} : vector<16x16xf32> to vector<1x16xf32>
    %103 = vector.extract_strided_slice %102 {offsets = [0, 10], sizes = [1, 6], strides = [1, 1]} : vector<1x16xf32> to vector<1x6xf32>
    %104 = vector.extract_strided_slice %102 {offsets = [0, 0], sizes = [1, 10], strides = [1, 1]} : vector<1x16xf32> to vector<1x10xf32>
    %105 = tpu.concatenate %103, %104 in 1 : vector<1x6xf32>, vector<1x10xf32> -> vector<1x16xf32>
    %106 = arith.addf %101, %105 : vector<1x16xf32>
    %107 = vector.extract_strided_slice %55 {offsets = [11, 0], sizes = [1, 16], strides = [1, 1]} : vector<16x16xf32> to vector<1x16xf32>
    %108 = vector.extract_strided_slice %107 {offsets = [0, 11], sizes = [1, 5], strides = [1, 1]} : vector<1x16xf32> to vector<1x5xf32>
    %109 = vector.extract_strided_slice %107 {offsets = [0, 0], sizes = [1, 11], strides = [1, 1]} : vector<1x16xf32> to vector<1x11xf32>
    %110 = tpu.concatenate %108, %109 in 1 : vector<1x5xf32>, vector<1x11xf32> -> vector<1x16xf32>
    %111 = arith.addf %106, %110 : vector<1x16xf32>
    %112 = vector.extract_strided_slice %55 {offsets = [12, 0], sizes = [1, 16], strides = [1, 1]} : vector<16x16xf32> to vector<1x16xf32>
    %113 = vector.extract_strided_slice %112 {offsets = [0, 12], sizes = [1, 4], strides = [1, 1]} : vector<1x16xf32> to vector<1x4xf32>
    %114 = vector.extract_strided_slice %112 {offsets = [0, 0], sizes = [1, 12], strides = [1, 1]} : vector<1x16xf32> to vector<1x12xf32>
    %115 = tpu.concatenate %113, %114 in 1 : vector<1x4xf32>, vector<1x12xf32> -> vector<1x16xf32>
    %116 = arith.addf %111, %115 : vector<1x16xf32>
    %117 = vector.extract_strided_slice %55 {offsets = [13, 0], sizes = [1, 16], strides = [1, 1]} : vector<16x16xf32> to vector<1x16xf32>
    %118 = vector.extract_strided_slice %117 {offsets = [0, 13], sizes = [1, 3], strides = [1, 1]} : vector<1x16xf32> to vector<1x3xf32>
    %119 = vector.extract_strided_slice %117 {offsets = [0, 0], sizes = [1, 13], strides = [1, 1]} : vector<1x16xf32> to vector<1x13xf32>
    %120 = tpu.concatenate %118, %119 in 1 : vector<1x3xf32>, vector<1x13xf32> -> vector<1x16xf32>
    %121 = arith.addf %116, %120 : vector<1x16xf32>
    %122 = vector.extract_strided_slice %55 {offsets = [14, 0], sizes = [1, 16], strides = [1, 1]} : vector<16x16xf32> to vector<1x16xf32>
    %123 = vector.extract_strided_slice %122 {offsets = [0, 14], sizes = [1, 2], strides = [1, 1]} : vector<1x16xf32> to vector<1x2xf32>
    %124 = vector.extract_strided_slice %122 {offsets = [0, 0], sizes = [1, 14], strides = [1, 1]} : vector<1x16xf32> to vector<1x14xf32>
    %125 = tpu.concatenate %123, %124 in 1 : vector<1x2xf32>, vector<1x14xf32> -> vector<1x16xf32>
    %126 = arith.addf %121, %125 : vector<1x16xf32>
    %127 = vector.extract_strided_slice %55 {offsets = [15, 0], sizes = [1, 16], strides = [1, 1]} : vector<16x16xf32> to vector<1x16xf32>
    %128 = vector.extract_strided_slice %127 {offsets = [0, 15], sizes = [1, 1], strides = [1, 1]} : vector<1x16xf32> to vector<1x1xf32>
    %129 = vector.extract_strided_slice %127 {offsets = [0, 0], sizes = [1, 15], strides = [1, 1]} : vector<1x16xf32> to vector<1x15xf32>
    %130 = tpu.concatenate %128, %129 in 1 : vector<1x1xf32>, vector<1x15xf32> -> vector<1x16xf32>
    %131 = arith.addf %126, %130 : vector<1x16xf32>
    %cst_43 = arith.constant 3.125000e-02 : f32
    %132 = vector.broadcast %cst_43 : f32 to vector<1x16xf32>
    %133 = arith.mulf %131, %132 : vector<1x16xf32>
    %c0_44 = arith.constant 0 : index
    %c0_45 = arith.constant 0 : index
    %c0_46 = arith.constant 0 : index
    %134 = vector.load %arg16[%c0_44, %c0_45, %c0_46] : memref<1x1x16xf32, #tpu.memory_space<vmem>>, vector<1x1x16xf32>
    %135 = vector.shape_cast %134 : vector<1x1x16xf32> to vector<1x16xf32>
    %136 = vector.shape_cast %133 : vector<1x16xf32> to vector<1x1x16xf32>
    tpu.vector_store %arg16[%c0_44, %c0_45, %c0_46], %136 {strides = array<i32>} : memref<1x1x16xf32, #tpu.memory_space<vmem>>, vector<1x1x16xf32>,
    return
  }
  func.func @transform_0(%arg0: i32, %arg1: memref<2x2xi32, #tpu.memory_space<smem>>, %arg2: memref<2x2xf32, #tpu.memory_space<smem>>) -> (i32, i32, i32) {
    %c0_i32 = arith.constant 0 : i32
    %c0_i32_0 = arith.constant 0 : i32
    %c0_i32_1 = arith.constant 0 : i32
    return %arg0, %c0_i32, %c0_i32_0 : i32, i32, i32
  }
  func.func @transform_1(%arg0: i32, %arg1: memref<2x2xi32, #tpu.memory_space<smem>>, %arg2: memref<2x2xf32, #tpu.memory_space<smem>>) -> (i32, i32, i32) {
    %c0_i32 = arith.constant 0 : i32
    %c0_i32_0 = arith.constant 0 : i32
    %c0_i32_1 = arith.constant 0 : i32
    return %arg0, %c0_i32, %c0_i32_0 : i32, i32, i32
  }
  func.func @transform_2(%arg0: i32, %arg1: memref<2x2xi32, #tpu.memory_space<smem>>, %arg2: memref<2x2xf32, #tpu.memory_space<smem>>) -> (i32, i32, i32) {
    %c0_i32 = arith.constant 0 : i32
    %c0_i32_0 = arith.constant 0 : i32
    %c0_i32_1 = arith.constant 0 : i32
    return %arg0, %c0_i32, %c0_i32_0 : i32, i32, i32
  }
  func.func @transform_3(%arg0: i32, %arg1: memref<2x2xi32, #tpu.memory_space<smem>>, %arg2: memref<2x2xf32, #tpu.memory_space<smem>>) -> (i32, i32) {
    %c0_i32 = arith.constant 0 : i32
    %c0_i32_0 = arith.constant 0 : i32
    %c0_i32_1 = arith.constant 0 : i32
    return %c0_i32, %c0_i32_0 : i32, i32
  }
  func.func @transform_4(%arg0: i32, %arg1: memref<2x2xi32, #tpu.memory_space<smem>>, %arg2: memref<2x2xf32, #tpu.memory_space<smem>>) -> (i32, i32) {
    %c0_i32 = arith.constant 0 : i32
    %c0_i32_0 = arith.constant 0 : i32
    %c0_i32_1 = arith.constant 0 : i32
    return %c0_i32, %c0_i32_0 : i32, i32
  }
  func.func @transform_5(%arg0: i32, %arg1: memref<2x2xi32, #tpu.memory_space<smem>>, %arg2: memref<2x2xf32, #tpu.memory_space<smem>>) -> (i32, i32) {
    %c0_i32 = arith.constant 0 : i32
    %c0_i32_0 = arith.constant 0 : i32
    %c0_i32_1 = arith.constant 0 : i32
    return %c0_i32, %c0_i32_0 : i32, i32
  }
  func.func @transform_6(%arg0: i32, %arg1: memref<2x2xi32, #tpu.memory_space<smem>>, %arg2: memref<2x2xf32, #tpu.memory_space<smem>>) -> (i32, i32) {
    %c0_i32 = arith.constant 0 : i32
    %c0_i32_0 = arith.constant 0 : i32
    %c0_i32_1 = arith.constant 0 : i32
    return %c0_i32, %c0_i32_0 : i32, i32
  }
  func.func @transform_7(%arg0: i32, %arg1: memref<2x2xi32, #tpu.memory_space<smem>>, %arg2: memref<2x2xf32, #tpu.memory_space<smem>>) -> (i32, i32) {
    %c0_i32 = arith.constant 0 : i32
    %c0_i32_0 = arith.constant 0 : i32
    %c0_i32_1 = arith.constant 0 : i32
    return %c0_i32, %c0_i32_0 : i32, i32
  }
  func.func @transform_8(%arg0: i32, %arg1: memref<2x2xi32, #tpu.memory_space<smem>>, %arg2: memref<2x2xf32, #tpu.memory_space<smem>>) -> (i32, i32) {
    %c0_i32 = arith.constant 0 : i32
    %c0_i32_0 = arith.constant 0 : i32
    %c0_i32_1 = arith.constant 0 : i32
    return %c0_i32, %c0_i32_0 : i32, i32
  }
  func.func @transform_9(%arg0: i32, %arg1: memref<2x2xi32, #tpu.memory_space<smem>>, %arg2: memref<2x2xf32, #tpu.memory_space<smem>>) -> (i32, i32) {
    %c0_i32 = arith.constant 0 : i32
    %c0_i32_0 = arith.constant 0 : i32
    %c0_i32_1 = arith.constant 0 : i32
    return %c0_i32, %c0_i32_0 : i32, i32
  }
  func.func @transform_10(%arg0: i32, %arg1: memref<2x2xi32, #tpu.memory_space<smem>>, %arg2: memref<2x2xf32, #tpu.memory_space<smem>>) -> (i32, i32, i32) {
    %c0_i32 = arith.constant 0 : i32
    %c0_i32_0 = arith.constant 0 : i32
    %c0_i32_1 = arith.constant 0 : i32
    return %arg0, %c0_i32, %c0_i32_0 : i32, i32, i32
  }
  func.func @transform_11(%arg0: i32, %arg1: memref<2x2xi32, #tpu.memory_space<smem>>, %arg2: memref<2x2xf32, #tpu.memory_space<smem>>) -> (i32, i32, i32) {
    %c0_i32 = arith.constant 0 : i32
    %c0_i32_0 = arith.constant 0 : i32
    %c0_i32_1 = arith.constant 0 : i32
    return %arg0, %c0_i32, %c0_i32_0 : i32, i32, i32
  }
  func.func @transform_12(%arg0: i32, %arg1: memref<2x2xi32, #tpu.memory_space<smem>>, %arg2: memref<2x2xf32, #tpu.memory_space<smem>>) -> (i32, i32, i32) {
    %c0_i32 = arith.constant 0 : i32
    %c0_i32_0 = arith.constant 0 : i32
    %c0_i32_1 = arith.constant 0 : i32
    return %arg0, %c0_i32, %c0_i32_0 : i32, i32, i32
  }
  func.func @transform_13(%arg0: i32, %arg1: memref<2x2xi32, #tpu.memory_space<smem>>, %arg2: memref<2x2xf32, #tpu.memory_space<smem>>) -> (i32, i32, i32) {
    %c0_i32 = arith.constant 0 : i32
    %c0_i32_0 = arith.constant 0 : i32
    %c0_i32_1 = arith.constant 0 : i32
    return %arg0, %c0_i32, %c0_i32_0 : i32, i32, i32
  }
}

module attributes {stable_mosaic.version = 11 : i64} {
  func.func @_dec_tail_kernel(%arg0: i32, %arg1: memref<2x2xi32, #tpu.memory_space<smem>>, %arg2: memref<2x2xf32, #tpu.memory_space<smem>>, %arg3: memref<1x16x32xf32, #tpu.memory_space<vmem>>, %arg4: memref<1x16x32xf32, #tpu.memory_space<vmem>>, %arg5: memref<1x16x32xf32, #tpu.memory_space<vmem>>, %arg6: memref<32x32xf32, #tpu.memory_space<vmem>>, %arg7: memref<1x32xf32, #tpu.memory_space<vmem>>, %arg8: memref<16x16xf32, #tpu.memory_space<vmem>>, %arg9: memref<32x32xf32, #tpu.memory_space<vmem>>, %arg10: memref<32x32xf32, #tpu.memory_space<vmem>>, %arg11: memref<96x4xf32, #tpu.memory_space<vmem>>, %arg12: memref<1x16x32xf32, #tpu.memory_space<vmem>>, %arg13: memref<1x16x4xf32, #tpu.memory_space<vmem>>, %arg14: memref<32x32xf32, #tpu.memory_space<vmem>>) attributes {dimension_semantics = [#tpu.dimension_semantics<parallel>], iteration_bounds = array<i64: 2>, scalar_prefetch = 2 : i64, scratch_operands = 1 : i64, tpu.core_type = #tpu.core_type<tc>, window_params = [{transform_indices = @transform_0, window_bounds = array<i64: 1, 16, 32>}, {transform_indices = @transform_1, window_bounds = array<i64: 1, 16, 32>}, {transform_indices = @transform_2, window_bounds = array<i64: 1, 16, 32>}, {pipeline_mode = #tpu.pipeline_mode<synchronous>, transform_indices = @transform_3, window_bounds = array<i64: 32, 32>}, {pipeline_mode = #tpu.pipeline_mode<synchronous>, transform_indices = @transform_4, window_bounds = array<i64: 1, 32>}, {pipeline_mode = #tpu.pipeline_mode<synchronous>, transform_indices = @transform_5, window_bounds = array<i64: 16, 16>}, {pipeline_mode = #tpu.pipeline_mode<synchronous>, transform_indices = @transform_6, window_bounds = array<i64: 32, 32>}, {pipeline_mode = #tpu.pipeline_mode<synchronous>, transform_indices = @transform_7, window_bounds = array<i64: 32, 32>}, {pipeline_mode = #tpu.pipeline_mode<synchronous>, transform_indices = @transform_8, window_bounds = array<i64: 96, 4>}, {transform_indices = @transform_9, window_bounds = array<i64: 1, 16, 32>}, {transform_indices = @transform_10, window_bounds = array<i64: 1, 16, 4>}]} {
    %c0 = arith.constant 0 : index
    %c0_0 = arith.constant 0 : index
    %c0_1 = arith.constant 0 : index
    %0 = vector.load %arg3[%c0, %c0_0, %c0_1] : memref<1x16x32xf32, #tpu.memory_space<vmem>>, vector<1x16x32xf32>
    %1 = vector.shape_cast %0 : vector<1x16x32xf32> to vector<16x32xf32>
    %c0_2 = arith.constant 0 : index
    %c0_3 = arith.constant 0 : index
    %2 = vector.load %arg8[%c0_2, %c0_3] : memref<16x16xf32, #tpu.memory_space<vmem>>, vector<16x16xf32>
    %c0_4 = arith.constant 0 : index
    %c0_5 = arith.constant 0 : index
    %c0_6 = arith.constant 0 : index
    %3 = vector.load %arg5[%c0_4, %c0_5, %c0_6] : memref<1x16x32xf32, #tpu.memory_space<vmem>>, vector<1x16x32xf32>
    %4 = vector.shape_cast %3 : vector<1x16x32xf32> to vector<16x32xf32>
    %c0_7 = arith.constant 0 : index
    %c0_8 = arith.constant 0 : index
    %5 = vector.load %arg14[%c0_7, %c0_8] : memref<32x32xf32, #tpu.memory_space<vmem>>, vector<16x32xf32>
    tpu.vector_store %arg14[%c0_7, %c0_8], %4 {strides = array<i32>} : memref<32x32xf32, #tpu.memory_space<vmem>>, vector<16x32xf32>,
    %c16 = arith.constant 16 : index
    %c0_9 = arith.constant 0 : index
    %6 = vector.load %arg14[%c16, %c0_9] : memref<32x32xf32, #tpu.memory_space<vmem>>, vector<16x32xf32>
    tpu.vector_store %arg14[%c16, %c0_9], %4 {strides = array<i32>} : memref<32x32xf32, #tpu.memory_space<vmem>>, vector<16x32xf32>,
    %7 = arith.index_cast %arg0 : i32 to index
    %c0_10 = arith.constant 0 : index
    %8 = memref.load %arg2[%7, %c0_10] : memref<2x2xf32, #tpu.memory_space<smem>>
    %9 = arith.index_cast %arg0 : i32 to index
    %c0_11 = arith.constant 0 : index
    %10 = memref.load %arg1[%9, %c0_11] : memref<2x2xi32, #tpu.memory_space<smem>>
    %11 = arith.index_cast %10 : i32 to index
    %c0_12 = arith.constant 0 : index
    %12 = vector.load %arg14[%11, %c0_12] : memref<32x32xf32, #tpu.memory_space<vmem>>, vector<16x32xf32>
    %13 = vector.broadcast %8 : f32 to vector<16x32xf32>
    %14 = arith.mulf %13, %12 : vector<16x32xf32>
    %15 = arith.index_cast %arg0 : i32 to index
    %c1 = arith.constant 1 : index
    %16 = memref.load %arg2[%15, %c1] : memref<2x2xf32, #tpu.memory_space<smem>>
    %17 = arith.index_cast %arg0 : i32 to index
    %c1_13 = arith.constant 1 : index
    %18 = memref.load %arg1[%17, %c1_13] : memref<2x2xi32, #tpu.memory_space<smem>>
    %19 = arith.index_cast %18 : i32 to index
    %c0_14 = arith.constant 0 : index
    %20 = vector.load %arg14[%19, %c0_14] : memref<32x32xf32, #tpu.memory_space<vmem>>, vector<16x32xf32>
    %21 = vector.broadcast %16 : f32 to vector<16x32xf32>
    %22 = arith.mulf %21, %20 : vector<16x32xf32>
    %23 = arith.addf %14, %22 : vector<16x32xf32>
    %c0_15 = arith.constant 0 : index
    %c0_16 = arith.constant 0 : index
    %24 = vector.load %arg6[%c0_15, %c0_16] : memref<32x32xf32, #tpu.memory_space<vmem>>, vector<32x32xf32>
    %cst = arith.constant dense<0.000000e+00> : vector<16x32xf32>
    %25 = tpu.matmul %23, %24, %cst {dimension_numbers = #tpu.dot_dimension_numbers<[1], [0], [0], [1], [0, 0, 1, 1], [], []>} : vector<16x32xf32>, vector<32x32xf32>, vector<16x32xf32> -> vector<16x32xf32>
    %c0_17 = arith.constant 0 : index
    %c0_18 = arith.constant 0 : index
    %26 = vector.load %arg7[%c0_17, %c0_18] : memref<1x32xf32, #tpu.memory_space<vmem>>, vector<1x32xf32>
    %27 = vector.broadcast %26 : vector<1x32xf32> to vector<16x32xf32>
    %28 = arith.addf %25, %27 : vector<16x32xf32>
    %29 = arith.addf %1, %28 : vector<16x32xf32>
    %cst_19 = arith.constant dense<0.000000e+00> : vector<16x32xf32>
    %30 = tpu.matmul %2, %29, %cst_19 {dimension_numbers = #tpu.dot_dimension_numbers<[1], [0], [0], [1], [0, 0, 1, 1], [], []>} : vector<16x16xf32>, vector<16x32xf32>, vector<16x32xf32> -> vector<16x32xf32>
    %31 = arith.subf %29, %30 : vector<16x32xf32>
    %c0_20 = arith.constant 0 : index
    %c0_21 = arith.constant 0 : index
    %32 = vector.load %arg9[%c0_20, %c0_21] : memref<32x32xf32, #tpu.memory_space<vmem>>, vector<32x32xf32>
    %cst_22 = arith.constant dense<0.000000e+00> : vector<16x32xf32>
    %33 = tpu.matmul %31, %32, %cst_22 {dimension_numbers = #tpu.dot_dimension_numbers<[1], [0], [0], [1], [0, 0, 1, 1], [], []>} : vector<16x32xf32>, vector<32x32xf32>, vector<16x32xf32> -> vector<16x32xf32>
    %cst_23 = arith.constant 0.000000e+00 : f32
    %34 = vector.broadcast %cst_23 : f32 to vector<16x32xf32>
    %35 = arith.maximumf %33, %34 : vector<16x32xf32>
    %c0_24 = arith.constant 0 : index
    %c0_25 = arith.constant 0 : index
    %36 = vector.load %arg10[%c0_24, %c0_25] : memref<32x32xf32, #tpu.memory_space<vmem>>, vector<32x32xf32>
    %cst_26 = arith.constant dense<0.000000e+00> : vector<16x32xf32>
    %37 = tpu.matmul %35, %36, %cst_26 {dimension_numbers = #tpu.dot_dimension_numbers<[1], [0], [0], [1], [0, 0, 1, 1], [], []>} : vector<16x32xf32>, vector<32x32xf32>, vector<16x32xf32> -> vector<16x32xf32>
    %38 = arith.addf %31, %37 : vector<16x32xf32>
    %cst_27 = arith.constant dense<0.000000e+00> : vector<16x32xf32>
    %39 = tpu.matmul %2, %38, %cst_27 {dimension_numbers = #tpu.dot_dimension_numbers<[1], [0], [0], [1], [0, 0, 1, 1], [], []>} : vector<16x16xf32>, vector<16x32xf32>, vector<16x32xf32> -> vector<16x32xf32>
    %40 = arith.subf %38, %39 : vector<16x32xf32>
    %c0_28 = arith.constant 0 : index
    %c0_29 = arith.constant 0 : index
    %c0_30 = arith.constant 0 : index
    %41 = vector.load %arg12[%c0_28, %c0_29, %c0_30] : memref<1x16x32xf32, #tpu.memory_space<vmem>>, vector<1x16x32xf32>
    %42 = vector.shape_cast %41 : vector<1x16x32xf32> to vector<16x32xf32>
    %43 = vector.shape_cast %40 : vector<16x32xf32> to vector<1x16x32xf32>
    tpu.vector_store %arg12[%c0_28, %c0_29, %c0_30], %43 {strides = array<i32>} : memref<1x16x32xf32, #tpu.memory_space<vmem>>, vector<1x16x32xf32>,
    %c0_31 = arith.constant 0 : index
    %c0_32 = arith.constant 0 : index
    %c0_33 = arith.constant 0 : index
    %44 = vector.load %arg4[%c0_31, %c0_32, %c0_33] : memref<1x16x32xf32, #tpu.memory_space<vmem>>, vector<1x16x32xf32>
    %45 = vector.shape_cast %44 : vector<1x16x32xf32> to vector<16x32xf32>
    %46 = arith.addf %45, %30 : vector<16x32xf32>
    %47 = arith.addf %46, %39 : vector<16x32xf32>
    %48 = vector.extract_strided_slice %47 {offsets = [15, 0], sizes = [1, 32], strides = [1, 1]} : vector<16x32xf32> to vector<1x32xf32>
    %49 = vector.extract_strided_slice %47 {offsets = [0, 0], sizes = [15, 32], strides = [1, 1]} : vector<16x32xf32> to vector<15x32xf32>
    %50 = tpu.concatenate %48, %49 in 0 : vector<1x32xf32>, vector<15x32xf32> -> vector<16x32xf32>
    %51 = vector.extract_strided_slice %47 {offsets = [1, 0], sizes = [15, 32], strides = [1, 1]} : vector<16x32xf32> to vector<15x32xf32>
    %52 = vector.extract_strided_slice %47 {offsets = [0, 0], sizes = [1, 32], strides = [1, 1]} : vector<16x32xf32> to vector<1x32xf32>
    %53 = tpu.concatenate %51, %52 in 0 : vector<15x32xf32>, vector<1x32xf32> -> vector<16x32xf32>
    %54 = tpu.concatenate %50, %47, %53 in 1 : vector<16x32xf32>, vector<16x32xf32>, vector<16x32xf32> -> vector<16x96xf32>
    %c0_34 = arith.constant 0 : index
    %c0_35 = arith.constant 0 : index
    %55 = vector.load %arg11[%c0_34, %c0_35] : memref<96x4xf32, #tpu.memory_space<vmem>>, vector<96x4xf32>
    %cst_36 = arith.constant dense<0.000000e+00> : vector<16x4xf32>
    %56 = tpu.matmul %54, %55, %cst_36 {dimension_numbers = #tpu.dot_dimension_numbers<[1], [0], [0], [1], [0, 0, 1, 1], [], []>} : vector<16x96xf32>, vector<96x4xf32>, vector<16x4xf32> -> vector<16x4xf32>
    %c0_37 = arith.constant 0 : index
    %c0_38 = arith.constant 0 : index
    %c0_39 = arith.constant 0 : index
    %57 = vector.load %arg13[%c0_37, %c0_38, %c0_39] : memref<1x16x4xf32, #tpu.memory_space<vmem>>, vector<1x16x4xf32>
    %58 = vector.shape_cast %57 : vector<1x16x4xf32> to vector<16x4xf32>
    %59 = vector.shape_cast %56 : vector<16x4xf32> to vector<1x16x4xf32>
    tpu.vector_store %arg13[%c0_37, %c0_38, %c0_39], %59 {strides = array<i32>} : memref<1x16x4xf32, #tpu.memory_space<vmem>>, vector<1x16x4xf32>,
    return
  }
  func.func @transform_0(%arg0: i32, %arg1: memref<2x2xi32, #tpu.memory_space<smem>>, %arg2: memref<2x2xf32, #tpu.memory_space<smem>>) -> (i32, i32, i32) {
    %c0_i32 = arith.constant 0 : i32
    %c0_i32_0 = arith.constant 0 : i32
    %c0_i32_1 = arith.constant 0 : i32
    return %arg0, %c0_i32, %c0_i32_0 : i32, i32, i32
  }
  func.func @transform_1(%arg0: i32, %arg1: memref<2x2xi32, #tpu.memory_space<smem>>, %arg2: memref<2x2xf32, #tpu.memory_space<smem>>) -> (i32, i32, i32) {
    %c0_i32 = arith.constant 0 : i32
    %c0_i32_0 = arith.constant 0 : i32
    %c0_i32_1 = arith.constant 0 : i32
    return %arg0, %c0_i32, %c0_i32_0 : i32, i32, i32
  }
  func.func @transform_2(%arg0: i32, %arg1: memref<2x2xi32, #tpu.memory_space<smem>>, %arg2: memref<2x2xf32, #tpu.memory_space<smem>>) -> (i32, i32, i32) {
    %c0_i32 = arith.constant 0 : i32
    %c0_i32_0 = arith.constant 0 : i32
    %c0_i32_1 = arith.constant 0 : i32
    return %arg0, %c0_i32, %c0_i32_0 : i32, i32, i32
  }
  func.func @transform_3(%arg0: i32, %arg1: memref<2x2xi32, #tpu.memory_space<smem>>, %arg2: memref<2x2xf32, #tpu.memory_space<smem>>) -> (i32, i32) {
    %c0_i32 = arith.constant 0 : i32
    %c0_i32_0 = arith.constant 0 : i32
    %c0_i32_1 = arith.constant 0 : i32
    return %c0_i32, %c0_i32_0 : i32, i32
  }
  func.func @transform_4(%arg0: i32, %arg1: memref<2x2xi32, #tpu.memory_space<smem>>, %arg2: memref<2x2xf32, #tpu.memory_space<smem>>) -> (i32, i32) {
    %c0_i32 = arith.constant 0 : i32
    %c0_i32_0 = arith.constant 0 : i32
    %c0_i32_1 = arith.constant 0 : i32
    return %c0_i32, %c0_i32_0 : i32, i32
  }
  func.func @transform_5(%arg0: i32, %arg1: memref<2x2xi32, #tpu.memory_space<smem>>, %arg2: memref<2x2xf32, #tpu.memory_space<smem>>) -> (i32, i32) {
    %c0_i32 = arith.constant 0 : i32
    %c0_i32_0 = arith.constant 0 : i32
    %c0_i32_1 = arith.constant 0 : i32
    return %c0_i32, %c0_i32_0 : i32, i32
  }
  func.func @transform_6(%arg0: i32, %arg1: memref<2x2xi32, #tpu.memory_space<smem>>, %arg2: memref<2x2xf32, #tpu.memory_space<smem>>) -> (i32, i32) {
    %c0_i32 = arith.constant 0 : i32
    %c0_i32_0 = arith.constant 0 : i32
    %c0_i32_1 = arith.constant 0 : i32
    return %c0_i32, %c0_i32_0 : i32, i32
  }
  func.func @transform_7(%arg0: i32, %arg1: memref<2x2xi32, #tpu.memory_space<smem>>, %arg2: memref<2x2xf32, #tpu.memory_space<smem>>) -> (i32, i32) {
    %c0_i32 = arith.constant 0 : i32
    %c0_i32_0 = arith.constant 0 : i32
    %c0_i32_1 = arith.constant 0 : i32
    return %c0_i32, %c0_i32_0 : i32, i32
  }
  func.func @transform_8(%arg0: i32, %arg1: memref<2x2xi32, #tpu.memory_space<smem>>, %arg2: memref<2x2xf32, #tpu.memory_space<smem>>) -> (i32, i32) {
    %c0_i32 = arith.constant 0 : i32
    %c0_i32_0 = arith.constant 0 : i32
    %c0_i32_1 = arith.constant 0 : i32
    return %c0_i32, %c0_i32_0 : i32, i32
  }
  func.func @transform_9(%arg0: i32, %arg1: memref<2x2xi32, #tpu.memory_space<smem>>, %arg2: memref<2x2xf32, #tpu.memory_space<smem>>) -> (i32, i32, i32) {
    %c0_i32 = arith.constant 0 : i32
    %c0_i32_0 = arith.constant 0 : i32
    %c0_i32_1 = arith.constant 0 : i32
    return %arg0, %c0_i32, %c0_i32_0 : i32, i32, i32
  }
  func.func @transform_10(%arg0: i32, %arg1: memref<2x2xi32, #tpu.memory_space<smem>>, %arg2: memref<2x2xf32, #tpu.memory_space<smem>>) -> (i32, i32, i32) {
    %c0_i32 = arith.constant 0 : i32
    %c0_i32_0 = arith.constant 0 : i32
    %c0_i32_1 = arith.constant 0 : i32
    return %arg0, %c0_i32, %c0_i32_0 : i32, i32, i32
  }
}

module attributes {stable_mosaic.version = 11 : i64} {
  func.func @_dec_final_kernel(%arg0: i32, %arg1: memref<1x16x32xf32, #tpu.memory_space<vmem>>, %arg2: memref<1x32xf32, #tpu.memory_space<vmem>>, %arg3: memref<1x32xf32, #tpu.memory_space<vmem>>, %arg4: memref<32x4xf32, #tpu.memory_space<vmem>>, %arg5: memref<1x4xf32, #tpu.memory_space<vmem>>, %arg6: memref<1x16x4xf32, #tpu.memory_space<vmem>>, %arg7: memref<1x16x4xf32, #tpu.memory_space<vmem>>) attributes {dimension_semantics = [#tpu.dimension_semantics<parallel>], iteration_bounds = array<i64: 2>, scalar_prefetch = 0 : i64, scratch_operands = 0 : i64, tpu.core_type = #tpu.core_type<tc>, window_params = [{transform_indices = @transform_0, window_bounds = array<i64: 1, 16, 32>}, {pipeline_mode = #tpu.pipeline_mode<synchronous>, transform_indices = @transform_1, window_bounds = array<i64: 1, 32>}, {pipeline_mode = #tpu.pipeline_mode<synchronous>, transform_indices = @transform_2, window_bounds = array<i64: 1, 32>}, {pipeline_mode = #tpu.pipeline_mode<synchronous>, transform_indices = @transform_3, window_bounds = array<i64: 32, 4>}, {pipeline_mode = #tpu.pipeline_mode<synchronous>, transform_indices = @transform_4, window_bounds = array<i64: 1, 4>}, {transform_indices = @transform_5, window_bounds = array<i64: 1, 16, 4>}, {transform_indices = @transform_6, window_bounds = array<i64: 1, 16, 4>}]} {
    %c0 = arith.constant 0 : index
    %c0_0 = arith.constant 0 : index
    %c0_1 = arith.constant 0 : index
    %0 = vector.load %arg1[%c0, %c0_0, %c0_1] : memref<1x16x32xf32, #tpu.memory_space<vmem>>, vector<1x16x32xf32>
    %1 = vector.shape_cast %0 : vector<1x16x32xf32> to vector<16x32xf32>
    %c0_2 = arith.constant 0 : index
    %c0_3 = arith.constant 0 : index
    %2 = vector.load %arg2[%c0_2, %c0_3] : memref<1x32xf32, #tpu.memory_space<vmem>>, vector<1x32xf32>
    %c0_4 = arith.constant 0 : index
    %c0_5 = arith.constant 0 : index
    %3 = vector.load %arg3[%c0_4, %c0_5] : memref<1x32xf32, #tpu.memory_space<vmem>>, vector<1x32xf32>
    %cst = arith.constant dense<0.000000e+00> : vector<16xf32>
    %4 = vector.multi_reduction <add>, %1, %cst [1] : vector<16x32xf32> to vector<16xf32>
    %5 = vector.shape_cast %4 : vector<16xf32> to vector<16x1xf32>
    %cst_6 = arith.constant 3.200000e+01 : f32
    %6 = vector.broadcast %cst_6 : f32 to vector<16x1xf32>
    %7 = arith.divf %5, %6 : vector<16x1xf32>
    %8 = vector.broadcast %7 : vector<16x1xf32> to vector<16x32xf32>
    %9 = arith.subf %1, %8 : vector<16x32xf32>
    %10 = arith.mulf %9, %9 : vector<16x32xf32>
    %cst_7 = arith.constant dense<0.000000e+00> : vector<16xf32>
    %11 = vector.multi_reduction <add>, %10, %cst_7 [1] : vector<16x32xf32> to vector<16xf32>
    %12 = vector.shape_cast %11 : vector<16xf32> to vector<16x1xf32>
    %cst_8 = arith.constant 3.200000e+01 : f32
    %13 = vector.broadcast %cst_8 : f32 to vector<16x1xf32>
    %14 = arith.divf %12, %13 : vector<16x1xf32>
    %cst_9 = arith.constant 9.99999974E-6 : f32
    %15 = vector.broadcast %cst_9 : f32 to vector<16x1xf32>
    %16 = arith.addf %14, %15 : vector<16x1xf32>
    %17 = math.rsqrt %16 : vector<16x1xf32>
    %18 = vector.broadcast %17 : vector<16x1xf32> to vector<16x32xf32>
    %19 = arith.mulf %9, %18 : vector<16x32xf32>
    %20 = vector.broadcast %2 : vector<1x32xf32> to vector<16x32xf32>
    %21 = arith.mulf %19, %20 : vector<16x32xf32>
    %22 = vector.broadcast %3 : vector<1x32xf32> to vector<16x32xf32>
    %23 = arith.addf %21, %22 : vector<16x32xf32>
    %cst_10 = arith.constant dense<0.000000e+00> : vector<32xf32>
    %24 = vector.multi_reduction <add>, %23, %cst_10 [0] : vector<16x32xf32> to vector<32xf32>
    %25 = vector.shape_cast %24 : vector<32xf32> to vector<1x32xf32>
    %cst_11 = arith.constant 1.600000e+01 : f32
    %26 = vector.broadcast %cst_11 : f32 to vector<1x32xf32>
    %27 = arith.divf %25, %26 : vector<1x32xf32>
    %28 = vector.broadcast %27 : vector<1x32xf32> to vector<16x32xf32>
    %29 = arith.subf %23, %28 : vector<16x32xf32>
    %c0_12 = arith.constant 0 : index
    %c0_13 = arith.constant 0 : index
    %c0_14 = arith.constant 0 : index
    %30 = vector.load %arg6[%c0_12, %c0_13, %c0_14] : memref<1x16x4xf32, #tpu.memory_space<vmem>>, vector<1x16x4xf32>
    %31 = vector.shape_cast %30 : vector<1x16x4xf32> to vector<16x4xf32>
    %c0_15 = arith.constant 0 : index
    %c0_16 = arith.constant 0 : index
    %32 = vector.load %arg4[%c0_15, %c0_16] : memref<32x4xf32, #tpu.memory_space<vmem>>, vector<32x4xf32>
    %cst_17 = arith.constant dense<0.000000e+00> : vector<16x4xf32>
    %33 = tpu.matmul %29, %32, %cst_17 {dimension_numbers = #tpu.dot_dimension_numbers<[1], [0], [0], [1], [0, 0, 1, 1], [], []>} : vector<16x32xf32>, vector<32x4xf32>, vector<16x4xf32> -> vector<16x4xf32>
    %c0_18 = arith.constant 0 : index
    %c0_19 = arith.constant 0 : index
    %34 = vector.load %arg5[%c0_18, %c0_19] : memref<1x4xf32, #tpu.memory_space<vmem>>, vector<1x4xf32>
    %35 = vector.broadcast %34 : vector<1x4xf32> to vector<16x4xf32>
    %36 = arith.addf %33, %35 : vector<16x4xf32>
    %37 = arith.addf %31, %36 : vector<16x4xf32>
    %c0_20 = arith.constant 0 : index
    %c0_21 = arith.constant 0 : index
    %c0_22 = arith.constant 0 : index
    %38 = vector.load %arg7[%c0_20, %c0_21, %c0_22] : memref<1x16x4xf32, #tpu.memory_space<vmem>>, vector<1x16x4xf32>
    %39 = vector.shape_cast %38 : vector<1x16x4xf32> to vector<16x4xf32>
    %40 = vector.shape_cast %37 : vector<16x4xf32> to vector<1x16x4xf32>
    tpu.vector_store %arg7[%c0_20, %c0_21, %c0_22], %40 {strides = array<i32>} : memref<1x16x4xf32, #tpu.memory_space<vmem>>, vector<1x16x4xf32>,
    return
  }
  func.func @transform_0(%arg0: i32) -> (i32, i32, i32) {
    %c0_i32 = arith.constant 0 : i32
    %c0_i32_0 = arith.constant 0 : i32
    %c0_i32_1 = arith.constant 0 : i32
    return %arg0, %c0_i32, %c0_i32_0 : i32, i32, i32
  }
  func.func @transform_1(%arg0: i32) -> (i32, i32) {
    %c0_i32 = arith.constant 0 : i32
    %c0_i32_0 = arith.constant 0 : i32
    %c0_i32_1 = arith.constant 0 : i32
    return %c0_i32, %c0_i32_0 : i32, i32
  }
  func.func @transform_2(%arg0: i32) -> (i32, i32) {
    %c0_i32 = arith.constant 0 : i32
    %c0_i32_0 = arith.constant 0 : i32
    %c0_i32_1 = arith.constant 0 : i32
    return %c0_i32, %c0_i32_0 : i32, i32
  }
  func.func @transform_3(%arg0: i32) -> (i32, i32) {
    %c0_i32 = arith.constant 0 : i32
    %c0_i32_0 = arith.constant 0 : i32
    %c0_i32_1 = arith.constant 0 : i32
    return %c0_i32, %c0_i32_0 : i32, i32
  }
  func.func @transform_4(%arg0: i32) -> (i32, i32) {
    %c0_i32 = arith.constant 0 : i32
    %c0_i32_0 = arith.constant 0 : i32
    %c0_i32_1 = arith.constant 0 : i32
    return %c0_i32, %c0_i32_0 : i32, i32
  }
  func.func @transform_5(%arg0: i32) -> (i32, i32, i32) {
    %c0_i32 = arith.constant 0 : i32
    %c0_i32_0 = arith.constant 0 : i32
    %c0_i32_1 = arith.constant 0 : i32
    return %arg0, %c0_i32, %c0_i32_0 : i32, i32, i32
  }
  func.func @transform_6(%arg0: i32) -> (i32, i32, i32) {
    %c0_i32 = arith.constant 0 : i32
    %c0_i32_0 = arith.constant 0 : i32
    %c0_i32_1 = arith.constant 0 : i32
    return %arg0, %c0_i32, %c0_i32_0 : i32, i32, i32
  }
}

</mosaic_0001>

<bundles_post_ra>
// kernel: _lambda_.10
= control target key start
LH: loop header
LB: loop body
LE: loop exit
PB: predicated region body
PF: predicated region fallthrough
CT: control target
= control target key end

     0   :  { %s434_s12 = smov 0   ;;  %s460_s0 = inlined_call_operand.vmem [shape: f32[2,16,4], index: 0, kind: input, shape index: {}]   ;;  %s461_s1 = inlined_call_operand.vmem [shape: f32[16,16], index: 1, kind: input, shape index: {}]   ;;  %s462_s2 = inlined_call_operand.vmem [shape: f32[2,16,4], index: 2, kind: output, shape index: {0}]   ;;  %s463_s3 = inlined_call_operand.vmem [shape: f32[2,16,4], index: 3, kind: output, shape index: {1}]  }
   0x1 LB: > { %s365_s13 = sadd.s32 4294967295, %s412_s12   ;;  %p369_p0 = scmp.ge.s32.totalorder %s412_s12, 1  ;;  %s412_s12 = sphi %s434_s12, %s14_s12  }
   0x2   : > { %p140_p1 = scmp.lt.s32.totalorder %s412_s12, 3 }
   0x4   : > { %p141_p2 = pnand %p369_p0, %p140_p1 }
   0x5   : > { %p169_p3 = scmp.lt.s32.totalorder (!%p141_p2), %s365_s13, 1  ;;  %v186_v0 = vld [vmem:[%s461_s1] sm:$0xff] (!%p141_p2)  ;;  %vm188_vm0 = vcmask (!%p141_p2), 130048   ;;  %v187_v4 = vld [vmem:[%s461_s1 + $0x8] sm:$0xff] (!%p141_p2)  ;;  %vm270_vm1 = vcmask (!%p141_p2), 31744  }
   0x6   : > { %144 = sbr.rel (%p141_p2) target bundleno = 239 (0xef), region = 28  ;;  %391 = vmatprep.mubr.msk.f32.mxu0 (!%p141_p2), %vm188_vm0, %v186_v0 }
   0xd   : > { %s465_s13 = smov (!%p169_p3, %s365_s13), 1 }
   0xe   : > { %s380_s16 = sshll.u32 %s465_s13, 4 }
   0xf   : > { %s173_s19 = scalar_lea.vmem %s460_s0, %s380_s16  ;;  %s183_s24 = scalar_lea.vmem %s463_s3, %s380_s16 }
  0x10   : > { %v184_v1 = vld [vmem:[%s173_s19] sm:$0xff]  ;;  %v185_v2 = vld [vmem:[%s173_s19 + $0x8] sm:$0xff]  ;;  %s178_s27 = scalar_lea.vmem %s462_s2, %s380_s16 }
  0x11   : > { %v394_v3 = vpack.c.bf16 %v185_v2, %v184_v1 }
  0x13   : > { %395 = vmatprep.subr.bf16.mxu0 %v394_v3 }
  0x14   : > { %397 = vmatpush3.bf16.msra.mxu0 %v394_v3 }
  0x17   : > { %392 = vmatmul.mubr.msk.f32.vlgmr.msra.gmra.mrb[0].mxu0 %vm188_vm0, %v187_v4 }
  0xea   : > { %v393_v5 = vpop.f32.mrb[0].mxu0 }
  0xeb   : > { %272 = vst.msk [vmem:[%s183_s24 + $0x8] sm:$0xff] %vm270_vm1, %v393_v5  ;;  %v274_v6 = vsub.f32 %v185_v2, %v393_v5  ;;  %v261_v7 = vpop.f32.mrb[1].mxu0 }
  0xec   : > { %271 = vst.msk [vmem:[%s183_s24] sm:$0xff] %vm270_vm1, %v261_v7  ;;  %v273_v8 = vsub.f32 %v184_v1, %v261_v7 }
  0xed   : > { %276 = vst.msk [vmem:[%s178_s27 + $0x8] sm:$0xff] %vm270_vm1, %v274_v6 }
  0xee   : > { %275 = vst.msk [vmem:[%s178_s27] sm:$0xff] %vm270_vm1, %v273_v8 }
  0xef PF: > { %s14_s12 = sadd.s32 1, %s412_s12  }
  0xf0   : > { %p11_p4 = scmp.ge.s32.totalorder %s14_s12, 4  }
  0xf2   :  { %13 = sbr.rel (!%p11_p4) target bundleno = 1 (0x1), region = 70 }

// kernel: _lambda_.15
= control target key start
LH: loop header
LB: loop body
LE: loop exit
PB: predicated region body
PF: predicated region fallthrough
CT: control target
= control target key end

     0   :  { %s471_s12 = smov 0   ;;  %s502_s0 = inlined_call_operand.vmem [shape: f32[2,16,4], index: 0, kind: input, shape index: {}]   ;;  %s503_s1 = inlined_call_operand.vmem [shape: f32[2,16,4], index: 1, kind: input, shape index: {}]   ;;  %s504_s2 = inlined_call_operand.vmem [shape: f32[16,32], index: 2, kind: input, shape index: {}]   ;;  %s505_s3 = inlined_call_operand.vmem [shape: f32[2,16,32], index: 3, kind: output, shape index: {}]  }
   0x1 LB: > { %s396_s13 = sadd.s32 4294967295, %s446_s12   ;;  %p400_p0 = scmp.ge.s32.totalorder %s446_s12, 1  ;;  %s446_s12 = sphi %s471_s12, %s13_s12  }
   0x2   : > { %p147_p1 = scmp.lt.s32.totalorder %s446_s12, 3 }
   0x4   : > { %p148_p2 = pnand %p400_p0, %p147_p1 }
   0x5   : > { %p176_p3 = scmp.lt.s32.totalorder (!%p148_p2), %s396_s13, 1  ;;  %v242_v0 = vld [vmem:[%s504_s2] sm:$0xff] (!%p148_p2)  ;;  %v243_v1 = vld [vmem:[%s504_s2 + $0x8] sm:$0xff] (!%p148_p2)  ;;  %vm203_vm0 = vcmask (!%p148_p2), 1046528   ;;  %vm197_vm1 = vcmask (!%p148_p2), 1040384   ;;  %s448_s22 = smov (!%p148_p2), 4  }
   0x6   : > { %151 = sbr.rel (%p148_p2) target bundleno = 358 (0x166), region = 32  ;;  %v425_v2 = vpack.c.bf16 (!%p148_p2), %v243_v1, %v242_v0  ;;  %s449_s26 = smov (!%p148_p2), 8   ;;  %vm233_vm2 = vcmask (!%p148_p2), 31744   ;;  %vm236_vm3 = vcmask (!%p148_p2), 64512   ;;  %vm239_vm4 = vcmask (!%p148_p2), 97280  }
   0x7   : > { %s450_s27 = smov (!%p148_p2), 12   ;;  %vm244_vm5 = vcmask (!%p148_p2), 130048   ;;  %vm326_vm6 = vcmask (!%p148_p2), 261120  }
   0x8   : > { %426 = vmatprep.subr.bf16.mxu0 (!%p148_p2), %v425_v2 }
   0x9   : > { %428 = vmatpush3.bf16.msra.mxu0 (!%p148_p2), %v425_v2 }
   0xd   : > { %s507_s13 = smov (!%p176_p3, %s396_s13), 1 }
   0xe   : > { %s485_s18 = sshll.u32 %s507_s13, 4 }
   0xf   : > { %s180_s21 = scalar_lea.vmem %s502_s0, %s485_s18  ;;  %s185_s25 = scalar_lea.vmem %s503_s1, %s485_s18 }
  0x10   : > { %v191_v3 = vld [vmem:[%s180_s21] sm:$0xff]  ;;  %v192_v4 = vld [vmem:[%s180_s21 + $0x8] sm:$0xff]  ;;  %s190_s30 = scalar_lea.vmem %s505_s3, %s485_s18 }
  0x11   : > { %v194_v5 = vrot.slane %v192_v4, 7  ;;  %212 = vrot.lane.b32.xlu0 %v191_v3, %s448_s22  ;;  %v198_v6 = vrot.slane %v191_v3, 7  ;;  %v204_v7 = vrot.slane %v191_v3, 1  ;;  %v205_v8 = vrot.slane %v192_v4, 1  ;;  %v210_v13 = vld [vmem:[%s185_s25] sm:$0xff]  ;;  %v211_v14 = vld [vmem:[%s185_s25 + $0x8] sm:$0xff] }
  0x13   : > { %v206_v9 = vsel %vm203_vm0, %v204_v7, %v205_v8  ;;  %v202_v10 = vsel %vm197_vm1, %v194_v5, %v198_v6  ;;  %v199_v11 = vsel %vm197_vm1, %v198_v6, %v194_v5  ;;  %v209_v12 = vsel %vm203_vm0, %v205_v8, %v204_v7 }
  0x14   : > { %219 = vrot.lane.b32.xlu1 %v206_v9, %s449_s26 }
  0x15   : > { %214 = vrot.lane.b32.xlu0 %v192_v4, %s448_s22 }
  0x18   : > { %221 = vrot.lane.b32.xlu1 %v209_v12, %s449_s26 }
  0x19   : > { %227 = vrot.lane.b32.xlu0 %v210_v13, %s450_s27 }
  0x1c   : > { %229 = vrot.lane.b32.xlu1 %v211_v14, %s450_s27 }
  0x83   : > { %v213_v15 = vpop.permute.xlu0 %212 }
  0x84   : > { %v234_v18 = vsel %vm233_vm2, %v202_v10, %v213_v15 }
  0x86   : > { %v220_v16 = vpop.permute.xlu1 %219 }
  0x87   : > { %v215_v17 = vpop.permute.xlu0 %214  ;;  %v237_v20 = vsel %vm236_vm3, %v234_v18, %v220_v16 }
  0x88   : > { %v235_v21 = vsel %vm233_vm2, %v199_v11, %v215_v17 }
  0x8a   : > { %v222_v19 = vpop.permute.xlu1 %221 }
  0x8b   : > { %v228_v22 = vpop.permute.xlu0 %227  ;;  %v238_v24 = vsel %vm236_vm3, %v235_v21, %v222_v19 }
  0x8c   : > { %v240_v23 = vsel %vm239_vm4, %v237_v20, %v228_v22 }
  0x8d   : > { %422 = vmatprep.mubr.msk.f32.mxu0 %vm244_vm5, %v240_v23 }
  0x8e   : > { %v230_v25 = vpop.permute.xlu1 %229 }
  0x8f   : > { %v241_v26 = vsel %vm239_vm4, %v238_v24, %v230_v25 }
  0x90   : > { %423 = vmatmul.mubr.msk.f32.vlgmr.msra.gmra.mrb[0].mxu0 %vm244_vm5, %v241_v26 }
 0x163   : > { %v424_v27 = vpop.f32.mrb[0].mxu0 }
 0x164   : > { %328 = vst.msk [vmem:[%s190_s30 + $0x8] sm:$0xff] %vm326_vm6, %v424_v27  ;;  %v317_v28 = vpop.f32.mrb[1].mxu0 }
 0x165   : > { %327 = vst.msk [vmem:[%s190_s30] sm:$0xff] %vm326_vm6, %v317_v28 }
 0x166 PF: > { %s13_s12 = sadd.s32 1, %s446_s12  }
 0x167   : > { %p10_p4 = scmp.ge.s32.totalorder %s13_s12, 4  }
 0x169   :  { %12 = sbr.rel (!%p10_p4) target bundleno = 1 (0x1), region = 65 }

// kernel: _lambda_.16
= control target key start
LH: loop header
LB: loop body
LE: loop exit
PB: predicated region body
PF: predicated region fallthrough
CT: control target
= control target key end

     0   :  { %s828_s15 = smov 0   ;;  %s906_s0 = inlined_call_operand.vmem [shape: f32[2,16,32], index: 0, kind: input, shape index: {}]   ;;  %s907_s1 = inlined_call_operand.vmem [shape: f32[32,96], index: 1, kind: input, shape index: {}]   ;;  %s908_s2 = inlined_call_operand.vmem [shape: f32[1,96], index: 2, kind: input, shape index: {}]   ;;  %s909_s3 = inlined_call_operand.vmem [shape: f32[2,16,32], index: 3, kind: output, shape index: {0}]   ;;  %s910_s4 = inlined_call_operand.vmem [shape: f32[2,1,16], index: 4, kind: output, shape index: {1}]  }
   0x1 LB: > { %s661_s16 = sadd.s32 4294967295, %s769_s15   ;;  %p665_p0 = scmp.ge.s32.totalorder %s769_s15, 1  ;;  %s769_s15 = sphi %s828_s15, %s15_s15  }
   0x2   : > { %p165_p1 = scmp.lt.s32.totalorder %s769_s15, 3 }
   0x4   : > { %p166_p2 = pnand %p665_p0, %p165_p1 }
   0x5   : > { %v209_v0 = vld [vmem:[%s907_s1] sm:$0xff] (!%p166_p2)  ;;  %v210_v1 = vld [vmem:[%s907_s1 + $0x8] sm:$0xff] (!%p166_p2)  ;;  %v211_v2 = vld [vmem:[%s907_s1 + $0x10] sm:$0xff] (!%p166_p2)  ;;  %p194_p3 = scmp.lt.s32.totalorder (!%p166_p2), %s661_s16, 1  ;;  %vm220_vm0 = vcmask (!%p166_p2), 261120   ;;  %s771_s5 = smov (!%p166_p2), 96  }
   0x6   : > { %169 = sbr.rel (%p166_p2) target bundleno = 747 (0x2eb), region = 32  ;;  %v709_v3 = vpack.c.bf16 (!%p166_p2), %v210_v1, %v209_v0  ;;  %v212_v4 = vld [vmem:[%s907_s1 + $0x18] sm:$0xff] (!%p166_p2)  ;;  %v670_v8 = vld [vmem:[%s908_s2] ss:$0 sm:$0xff] (!%p166_p2)  ;;  %vm718_vm1 = vmpackc.low (!%p166_p2), %vm220_vm0, %vm220_vm0  ;;  %s772_s6 = smov (!%p166_p2), 8   ;;  %vm406_vm2 = vcmask (!%p166_p2), 121856  }
   0x7   : > { %v713_v5 = vpack.c.bf16 (!%p166_p2), %v212_v4, %v211_v2  ;;  %s773_s7 = smov (!%p166_p2), 120   ;;  %s774_s8 = smov (!%p166_p2), 7   ;;  %vm418_vm3 = vcmask (!%p166_p2), 113664   ;;  %vm430_vm4 = vcmask (!%p166_p2), 105472   ;;  %vm442_vm5 = vcmask (!%p166_p2), 97280  }
   0x8   : > { %710 = vmatprep.subr.bf16.mxu0 (!%p166_p2), %v709_v3  ;;  %s775_s9 = smov (!%p166_p2), 119   ;;  %s776_s10 = smov (!%p166_p2), 6   ;;  %vm454_vm6 = vcmask (!%p166_p2), 89088   ;;  %vm466_vm7 = vcmask (!%p166_p2), 80896   ;;  %vm478_vm8 = vcmask (!%p166_p2), 72704   ;;  %vm500_vm9 = vcmask (!%p166_p2), 56320  }
   0x9   : > { %712 = vmatpush3.bf16.msra.mxu0 (!%p166_p2), %v709_v3  ;;  %s777_s11 = smov (!%p166_p2), 118   ;;  %s778_s12 = smov (!%p166_p2), 5   ;;  %vm491_vm10 = vcmask (!%p166_p2), 64512   ;;  %vm512_vm11 = vcmask (!%p166_p2), 48128   ;;  %vm524_vm12 = vcmask (!%p166_p2), 39936   ;;  %vm536_vm13 = vcmask (!%p166_p2), 31744  }
   0xa   : > { %714 = vmatprep.subr.bf16.mxu0 (!%p166_p2), %v713_v5  ;;  %s779_s13 = smov (!%p166_p2), 117   ;;  %s780_s14 = smov (!%p166_p2), 126   ;;  %vm548_vm14 = vcmask (!%p166_p2), 23552   ;;  %vm560_vm15 = vcmask (!%p166_p2), 15360  }
   0xb   : > { %s781_s17 = smov (!%p166_p2), 127   ;;  %s782_s18 = smov (!%p166_p2), 125  }
   0xc   : > { %s783_s19 = smov (!%p166_p2), 15   ;;  %s784_s20 = smov (!%p166_p2), 124  }
   0xd   : > { %s912_s16 = smov (!%p194_p3, %s661_s16), 1  ;;  %716 = vmatpush3.bf16.msra.mxu0 %v713_v5  ;;  %s785_s21 = smov 14  }
   0xe   : > { %s679_s25 = sshll.u32 %s912_s16, 4  ;;  %s786_s22 = smov 123  }
   0xf   : > { %s198_s28 = scalar_lea.vmem %s906_s0, %s679_s25  ;;  %s787_s23 = smov 13  }
  0x10   : > { %v207_v6 = vld [vmem:[%s198_s28] sm:$0xff]  ;;  %v208_v7 = vld [vmem:[%s198_s28 + $0x8] sm:$0xff]  ;;  %s788_s24 = smov 122   ;;  %s789_s26 = smov 12  }
  0x11   : > { %699 = vmatprep.mubr.msk.f32.mxu0 %vm220_vm0, %v207_v6  ;;  %s790_s27 = smov 121   ;;  %s791_s28 = smov 11  }
  0x12   : > { %700 = vmatmul.mubr.msk.f32.vlgmr.msra.gmra.mrb[0].mxu0 %vm220_vm0, %v208_v7  ;;  %s792_s29 = smov 116   ;;  %s793_s30 = smov 10  }
  0xe5   : > { %v701_v9 = vpop.f32.mrb[0].mxu0 }
  0xe6   : > { %v861_v10 = vadd.f32 %v701_v9, %v670_v8  ;;  %v293_v11 = vpop.f32.mrb[1].mxu0 }
  0xe7   : > { %v863_v12 = vadd.f32 %v670_v8, %v293_v11 }
  0xe9   : > { %312 = vrot.lane.b32.xlu0 %v863_v12, %s771_s5  ;;  %v717_v13 = vpack.c.bf16 %v861_v10, %v863_v12 }
  0xeb   : > { %719 = vmatprep.subr.msk.bf16.mxu1 %vm718_vm1, %v717_v13 }
  0xec   : > { %722 = vmatpush3.bf16.xpose.msk.msra.mxu1 %vm718_vm1, %v717_v13  ;;  %vm572_vm1 = vcmask 7168  }
  0xed   : > { %314 = vrot.lane.b32.xlu0 %v861_v10, %s771_s5  ;;  %s794_s5 = smov 115  }
 0x15b   : > { %v313_v14 = vpop.permute.xlu0 %312 }
 0x15c   : > { %706 = vmatprep.mubr.msk.f32.mxu1 %vm220_vm0, %v313_v14 }
 0x15f   : > { %v315_v15 = vpop.permute.xlu0 %314 }
 0x160   : > { %707 = vmatmul.mubr.msk.f32.vlgmr.msra.gmra.mrb[0].mxu1 %vm220_vm0, %v315_v15 }
 0x233   : > { %v708_v16 = vpop.f32.mrb[0].mxu1 }
 0x234   : > { %488 = vrot.lane.b32.xlu1 %v708_v16, %s772_s6  ;;  %485 = vrot.lane.b32.xlu0 %v708_v16, %s773_s7  ;;  %v873_v17 = vpop.f32.mrb[1].mxu1  ;;  %s795_s6 = smov 9   ;;  %s796_s7 = smov 114  }
 0x238   : > { %497 = vrot.lane.b32.xlu1 %v708_v16, %s774_s8  ;;  %494 = vrot.lane.b32.xlu0 %v708_v16, %s775_s9  ;;  %s797_s8 = smov 4   ;;  %s798_s9 = smov 113  }
 0x23c   : > { %509 = vrot.lane.b32.xlu1 %v708_v16, %s776_s10  ;;  %506 = vrot.lane.b32.xlu0 %v708_v16, %s777_s11  ;;  %s799_s10 = smov 3   ;;  %s800_s11 = smov 64  }
 0x240   : > { %521 = vrot.lane.b32.xlu1 %v708_v16, %s778_s12  ;;  %518 = vrot.lane.b32.xlu0 %v708_v16, %s779_s13  ;;  %s801_s12 = smov 2   ;;  %s802_s13 = smov 1  }
 0x244   : > { %412 = vrot.lane.b32.xlu0 %v873_v17, %s780_s14  ;;  %400 = vrot.lane.b32.xlu1 %v873_v17, %s781_s17 }
 0x248   : > { %424 = vrot.lane.b32.xlu0 %v873_v17, %s782_s18  ;;  %403 = vrot.lane.b32.xlu1 %v873_v17, %s783_s19  ;;  %s203_s18 = scalar_lea.vmem %s909_s3, %s679_s25 }
 0x24c   : > { %436 = vrot.lane.b32.xlu0 %v873_v17, %s784_s20  ;;  %415 = vrot.lane.b32.xlu1 %v873_v17, %s785_s21  ;;  %s206_s20 = scalar_lea.vmem %s910_s4, %s912_s16 }
 0x250   : > { %448 = vrot.lane.b32.xlu0 %v873_v17, %s786_s22  ;;  %427 = vrot.lane.b32.xlu1 %v873_v17, %s787_s23 }
 0x254   : > { %460 = vrot.lane.b32.xlu0 %v873_v17, %s788_s24  ;;  %439 = vrot.lane.b32.xlu1 %v873_v17, %s789_s26 }
 0x258   : > { %472 = vrot.lane.b32.xlu0 %v873_v17, %s790_s27  ;;  %451 = vrot.lane.b32.xlu1 %v873_v17, %s791_s28 }
 0x25c   : > { %530 = vrot.lane.b32.xlu0 %v708_v16, %s792_s29  ;;  %463 = vrot.lane.b32.xlu1 %v873_v17, %s793_s30 }
 0x260   : > { %542 = vrot.lane.b32.xlu0 %v708_v16, %s794_s5  ;;  %475 = vrot.lane.b32.xlu1 %v873_v17, %s795_s6 }
 0x264   : > { %554 = vrot.lane.b32.xlu0 %v708_v16, %s796_s7  ;;  %533 = vrot.lane.b32.xlu1 %v708_v16, %s797_s8 }
 0x268   : > { %566 = vrot.lane.b32.xlu0 %v708_v16, %s798_s9  ;;  %545 = vrot.lane.b32.xlu1 %v708_v16, %s799_s10 }
 0x26c   : > { %304 = vrot.lane.b32.xlu0 %v863_v12, %s800_s11  ;;  %557 = vrot.lane.b32.xlu1 %v708_v16, %s801_s12 }
 0x270   : > { %569 = vrot.lane.b32.xlu1 %v708_v16, %s802_s13 }
 0x274   : > { %306 = vrot.lane.b32.xlu1 %v861_v10, %s800_s11 }
 0x2a6   : > { %v489_v18 = vpop.permute.xlu1 %488  ;;  %v486_v19 = vpop.permute.xlu0 %485 }
 0x2a7   : > { %v492_v2 = vsel %vm491_vm10, %v486_v19, %v489_v18 }
 0x2aa   : > { %v498_v20 = vpop.permute.xlu1 %497  ;;  %v495_v21 = vpop.permute.xlu0 %494 }
 0x2ab   : > { %v501_v62 = vsel %vm500_vm9, %v495_v21, %v498_v20 }
 0x2ac   : > { %v503_v4 = vrot.slane %v501_v62, 1 }
 0x2ae   : > { %v510_v22 = vpop.permute.xlu1 %509  ;;  %v507_v23 = vpop.permute.xlu0 %506 }
 0x2af   : > { %v513_v3 = vsel %vm512_vm11, %v507_v23, %v510_v22 }
 0x2b0   : > { %v515_v7 = vrot.slane %v513_v3, 2 }
 0x2b2   : > { %v522_v24 = vpop.permute.xlu1 %521  ;;  %v519_v25 = vpop.permute.xlu0 %518 }
 0x2b3   : > { %v525_v6 = vsel %vm524_vm12, %v519_v25, %v522_v24 }
 0x2b4   : > { %v527_v12 = vrot.slane %v525_v6, 3 }
 0x2b6   : > { %v413_v26 = vpop.permute.xlu0 %412  ;;  %v401_v27 = vpop.permute.xlu1 %400 }
 0x2ba   : > { %v425_v28 = vpop.permute.xlu0 %424  ;;  %v404_v29 = vpop.permute.xlu1 %403 }
 0x2bb   : > { %v407_v34 = vsel %vm406_vm2, %v401_v27, %v404_v29  ;;  %vm579_vm2 = vcmask 122880  }
 0x2bc   : > { %v409_v36 = vrot.slane %v407_v34, 1 }
 0x2be   : > { %v437_v30 = vpop.permute.xlu0 %436  ;;  %v416_v31 = vpop.permute.xlu1 %415  ;;  %v411_v42 = vadd.f32 %v409_v36, %v873_v17 }
 0x2bf   : > { %v419_v35 = vsel %vm418_vm3, %v413_v26, %v416_v31 }
 0x2c0   : > { %v421_v40 = vrot.slane %v419_v35, 2 }
 0x2c2   : > { %v449_v32 = vpop.permute.xlu0 %448  ;;  %v428_v33 = vpop.permute.xlu1 %427  ;;  %v423_v47 = vadd.f32 %v421_v40, %v411_v42 }
 0x2c3   : > { %v431_v39 = vsel %vm430_vm4, %v425_v28, %v428_v33 }
 0x2c4   : > { %v433_v43 = vrot.slane %v431_v39, 3 }
 0x2c6   : > { %v461_v37 = vpop.permute.xlu0 %460  ;;  %v440_v38 = vpop.permute.xlu1 %439  ;;  %v435_v49 = vadd.f32 %v433_v43, %v423_v47 }
 0x2c7   : > { %v443_v41 = vsel %vm442_vm5, %v437_v30, %v440_v38 }
 0x2c8   : > { %v445_v48 = vrot.slane %v443_v41, 4 }
 0x2ca   : > { %v473_v44 = vpop.permute.xlu0 %472  ;;  %v452_v45 = vpop.permute.xlu1 %451  ;;  %v447_v54 = vadd.f32 %v445_v48, %v435_v49 }
 0x2cb   : > { %v455_v46 = vsel %vm454_vm6, %v449_v32, %v452_v45 }
 0x2cc   : > { %v457_v50 = vrot.slane %v455_v46, 5 }
 0x2ce   : > { %v531_v51 = vpop.permute.xlu0 %530  ;;  %v464_v52 = vpop.permute.xlu1 %463  ;;  %v459_v56 = vadd.f32 %v457_v50, %v447_v54 }
 0x2cf   : > { %v467_v53 = vsel %vm466_vm7, %v461_v37, %v464_v52 }
 0x2d0   : > { %v469_v55 = vrot.slane %v467_v53, 6 }
 0x2d2   : > { %v543_v57 = vpop.permute.xlu0 %542  ;;  %v476_v58 = vpop.permute.xlu1 %475  ;;  %v471_v60 = vadd.f32 %v469_v55, %v459_v56 }
 0x2d3   : > { %v479_v59 = vsel %vm478_vm8, %v473_v44, %v476_v58 }
 0x2d4   : > { %v481_v61 = vrot.slane %v479_v59, 7 }
 0x2d6   : > { %v483_v63 = vadd.f32 %v481_v61, %v471_v60  ;;  %v555_v0 = vpop.permute.xlu0 %554  ;;  %v534_v1 = vpop.permute.xlu1 %533 }
 0x2d7   : > { %v537_v11 = vsel %vm536_vm13, %v531_v51, %v534_v1 }
 0x2d8   : > { %v493_v5 = vadd.f32 %v492_v2, %v483_v63  ;;  %v539_v16 = vrot.slane %v537_v11, 4 }
 0x2da   : > { %v505_v8 = vadd.f32 %v503_v4, %v493_v5  ;;  %v567_v9 = vpop.permute.xlu0 %566  ;;  %v546_v10 = vpop.permute.xlu1 %545 }
 0x2db   : > { %v549_v14 = vsel %vm548_vm14, %v543_v57, %v546_v10 }
 0x2dc   : > { %v517_v13 = vadd.f32 %v515_v7, %v505_v8  ;;  %v551_v21 = vrot.slane %v549_v14, 5 }
 0x2de   : > { %v529_v15 = vadd.f32 %v527_v12, %v517_v13  ;;  %v305_v17 = vpop.permute.xlu0 %304  ;;  %v558_v18 = vpop.permute.xlu1 %557 }
 0x2df   : > { %310 = vst.msk [vmem:[%s203_s18] sm:$0xff] %vm220_vm0, %v305_v17  ;;  %v561_v19 = vsel %vm560_vm15, %v555_v0, %v558_v18 }
 0x2e0   : > { %v541_v20 = vadd.f32 %v539_v16, %v529_v15  ;;  %v563_v23 = vrot.slane %v561_v19, 6 }
 0x2e2   : > { %v553_v22 = vadd.f32 %v551_v21, %v541_v20  ;;  %v570_v24 = vpop.permute.xlu1 %569 }
 0x2e3   : > { %v573_v25 = vsel %vm572_vm1, %v567_v9, %v570_v24 }
 0x2e4   : > { %v565_v26 = vadd.f32 %v563_v23, %v553_v22  ;;  %v575_v27 = vrot.slane %v573_v25, 7 }
 0x2e6   : > { %v577_v28 = vadd.f32 %v575_v27, %v565_v26  ;;  %v307_v29 = vpop.permute.xlu1 %306 }
 0x2e7   : > { %311 = vst.msk [vmem:[%s203_s18 + $0x8] sm:$0xff] %vm220_vm0, %v307_v29 }
 0x2e8   : > { %v578_v30 = vmul.f32 0.03125, %v577_v28 }
 0x2ea   : > { %580 = vst.msk [vmem:[%s206_s20] sm:$0x1] %vm579_vm2, %v578_v30 }
 0x2eb PF: > { %s15_s15 = sadd.s32 1, %s769_s15  }
 0x2ec   : > { %p12_p4 = scmp.ge.s32.totalorder %s15_s15, 4  }
 0x2ee   :  { %14 = sbr.rel (!%p12_p4) target bundleno = 1 (0x1), region = 74 }

// kernel: _lambda_.14
= control target key start
LH: loop header
LB: loop body
LE: loop exit
PB: predicated region body
PF: predicated region fallthrough
CT: control target
= control target key end

     0   :  { %s344_s12 = smov 0   ;;  %s382_s0 = inlined_call_operand.vmem [shape: f32[2,16,32], index: 0, kind: input, shape index: {}]   ;;  %s383_s1 = inlined_call_operand.vmem [shape: f32[1,32], index: 1, kind: input, shape index: {}]   ;;  %s384_s2 = inlined_call_operand.vmem [shape: f32[1,32], index: 2, kind: input, shape index: {}]   ;;  %s385_s3 = inlined_call_operand.vmem [shape: f32[2,16,32], index: 3, kind: output, shape index: {}]  }
   0x1 LB: > { %s289_s13 = sadd.s32 4294967295, %s322_s12   ;;  %p293_p0 = scmp.ge.s32.totalorder %s322_s12, 1  ;;  %s322_s12 = sphi %s344_s12, %s13_s12  }
   0x2   : > { %p137_p1 = scmp.lt.s32.totalorder %s322_s12, 3 }
   0x4   : > { %p138_p2 = pnand %p293_p0, %p137_p1 }
   0x5   : > { %p161_p3 = scmp.lt.s32.totalorder (!%p138_p2), %s289_s13, 1  ;;  %vm175_vm0 = vcmask (!%p138_p2), 261120   ;;  %v298_v21 = vld [vmem:[%s383_s1] ss:$0 sm:$0xff] (!%p138_p2) }
   0x6   : > { %141 = sbr.rel (%p138_p2) target bundleno = 354 (0x162), region = 32  ;;  %v299_v25 = vld [vmem:[%s384_s2] ss:$0 sm:$0xff] (!%p138_p2) }
   0xd   : > { %s387_s13 = smov (!%p161_p3, %s289_s13), 1 }
   0xe   : > { %s302_s14 = sshll.u32 %s387_s13, 4 }
   0xf   : > { %s165_s17 = scalar_lea.vmem %s382_s0, %s302_s14  ;;  %s170_s24 = scalar_lea.vmem %s385_s3, %s302_s14 }
  0x10   : > { %v171_v0 = vld [vmem:[%s165_s17] sm:$0xff]  ;;  %v172_v1 = vld [vmem:[%s165_s17 + $0x8] sm:$0xff] }
  0x11   : > { %v176_v2 = vsel %vm175_vm0, %v171_v0, 0.0  ;;  %v179_v3 = vsel %vm175_vm0, %v172_v1, 0.0 }
  0x12   : > { %177 = vadd.xlane.f32.xlu0 %v176_v2 }
  0x16   : > { %180 = vadd.xlane.f32.xlu0 %v179_v3 }
  0x9f   : > { %v178_v4 = vpop.xlane.xlu0 %177 }
  0xa0   : > { %v183_v5 = vmul.f32 0.03125, %v178_v4 }
  0xa2   : > { %v185_v6 = vsub.f32 %v171_v0, %v183_v5 }
  0xa3   : > { %v181_v7 = vpop.xlane.xlu0 %180 }
  0xa4   : > { %v184_v8 = vmul.f32 0.03125, %v181_v7  ;;  %v187_v9 = vmul.f32 %v185_v6, %v185_v6 }
  0xa6   : > { %v186_v10 = vsub.f32 %v172_v1, %v184_v8  ;;  %v189_v11 = vsel %vm175_vm0, %v187_v9, 0.0 }
  0xa7   : > { %190 = vadd.xlane.f32.xlu1 %v189_v11 }
  0xa8   : > { %v188_v12 = vmul.f32 %v186_v10, %v186_v10 }
  0xaa   : > { %v192_v13 = vsel %vm175_vm0, %v188_v12, 0.0 }
  0xab   : > { %193 = vadd.xlane.f32.xlu1 %v192_v13 }
 0x134   : > { %v191_v14 = vpop.xlane.xlu1 %190 }
 0x135   : > { %v195_v15 = vmul.f32 0.03125, %v191_v14 }
 0x137   : > { %v197_v16 = vadd.f32 1e-05, %v195_v15 }
 0x138   : > { %v194_v17 = vpop.xlane.xlu1 %193 }
 0x139   : > { %312 = vrsqrt.f32 %v197_v16  ;;  %v196_v18 = vmul.f32 0.03125, %v194_v17 }
 0x13b   : > { %v198_v19 = vadd.f32 1e-05, %v196_v18 }
 0x13d   : > { %314 = vrsqrt.f32 %v198_v19 }
 0x143   : > { %v313_v20 = vpop.eup %312 }
 0x144   : > { %v201_v22 = vmul.f32 %v313_v20, %v185_v6 }
 0x146   : > { %v209_v23 = vmul.f32 %v298_v21, %v201_v22 }
 0x147   : > { %v315_v24 = vpop.eup %314 }
 0x148   : > { %v202_v26 = vmul.f32 %v315_v24, %v186_v10  ;;  %v217_v27 = vadd.f32 %v299_v25, %v209_v23 }
 0x14a   : > { %v210_v28 = vmul.f32 %v298_v21, %v202_v26  ;;  %v219_v30 = vsel %vm175_vm0, %v217_v27, 0.0 }
 0x14c   : > { %v218_v29 = vadd.f32 %v299_v25, %v210_v28 }
 0x14e   : > { %v220_v31 = vsel %vm175_vm0, %v218_v29, 0.0 }
 0x14f   : > { %v221_v32 = vadd.f32 %v220_v31, %v219_v30 }
 0x151   : > { %v222_v33 = vrot.slane %v221_v32, 4 }
 0x153   : > { %v223_v34 = vadd.f32 %v222_v33, %v221_v32 }
 0x155   : > { %v224_v35 = vrot.slane %v223_v34, 2 }
 0x157   : > { %v225_v36 = vadd.f32 %v224_v35, %v223_v34 }
 0x159   : > { %v226_v37 = vrot.slane %v225_v36, 1 }
 0x15b   : > { %v227_v38 = vadd.f32 %v226_v37, %v225_v36 }
 0x15d   : > { %v229_v39 = vmul.f32 0.0625, %v227_v38 }
 0x15f   : > { %v230_v40 = vsub.f32 %v217_v27, %v229_v39  ;;  %v231_v41 = vsub.f32 %v218_v29, %v229_v39 }
 0x161   : > { %232 = vst.msk [vmem:[%s170_s24] sm:$0xff] %vm175_vm0, %v230_v40  ;;  %233 = vst.msk [vmem:[%s170_s24 + $0x8] sm:$0xff] %vm175_vm0, %v231_v41 }
 0x162 PF: > { %s13_s12 = sadd.s32 1, %s322_s12  }
 0x163   : > { %p10_p4 = scmp.ge.s32.totalorder %s13_s12, 4  }
 0x165   :  { %12 = sbr.rel (!%p10_p4) target bundleno = 1 (0x1), region = 62 }

// kernel: _lambda_.13
= control target key start
LH: loop header
LB: loop body
LE: loop exit
PB: predicated region body
PF: predicated region fallthrough
CT: control target
= control target key end

     0   :  { %s1163_s0 = inlined_call_operand.vmem [shape: s32[2,2], index: 0, kind: input, shape index: {}]   ;;  %s1164_s2 = inlined_call_operand.vmem [shape: f32[2,16,32], index: 2, kind: input, shape index: {}]   ;;  %s1165_s3 = inlined_call_operand.vmem [shape: f32[2,16,32], index: 3, kind: input, shape index: {}]   ;;  %s1166_s4 = inlined_call_operand.vmem [shape: f32[32,32], index: 4, kind: input, shape index: {}]   ;;  %s1167_s5 = inlined_call_operand.vmem [shape: f32[1,32], index: 5, kind: input, shape index: {}]   ;;  %s1168_s6 = inlined_call_operand.vmem [shape: f32[16,16], index: 6, kind: input, shape index: {}]   ;;  %s1169_s7 = inlined_call_operand.vmem [shape: f32[32,32], index: 7, kind: input, shape index: {}]   ;;  %s1170_s8 = inlined_call_operand.vmem [shape: f32[32,32], index: 8, kind: input, shape index: {}]   ;;  %s1171_s9 = inlined_call_operand.vmem [shape: f32[2,16,32], index: 9, kind: output, shape index: {}]   ;;  %s1172_s1 = inlined_call_operand.vmem [shape: f32[2,2], index: 1, kind: input, shape index: {}]  }
   0x1   :  { %s14_s11 = sshll.u32 %s1163_s0, 4  ;;  %s18_s14 = sshll.u32 %s1172_s1, 4  ;;  %s15_s11 = int_to_ptr.vmem [resolvable:$true] %s14_s11  ;;  %s19_s14 = int_to_ptr.vmem [resolvable:$true] %s18_s14 }
   0x2   :  { %s985_s15 = scalar_lea.vmem %s15_s11, 32  ;;  %p990_p1 = scmp.lt.s32.totalorder %s15_s11, %s15_s11 }
   0x3   :  { %p986_p0 = scmp.ne.s32.totalorder %s15_s11, %s985_s15  ;;  %p991_p2 = scmp.lt.s32.totalorder %s985_s15, %s985_s15 }
   0x5   :  { %p992_p3 = por %p991_p2, %p990_p1 }
   0x7   :  { %p993_p4 = pnand %p992_p3, %p986_p0 }
   0x9   :  { %996 = shalt.err (!%p993_p4)  }
   0xa   :  { %s1019_s16 = smov [#allocation4]   ;;  %s997_s17 = scalar_lea.vmem %s19_s14, 32 }
   0xb   :  { %17 = dma.vmem_to_smem %s15_s11, 32, %s1019_s16, [#allocation3] }
   0xc   :  { %p998_p5 = scmp.ne.s32.totalorder %s19_s14, %s997_s17  ;;  %p1002_p6 = scmp.lt.s32.totalorder %s19_s14, %s19_s14 }
   0xd   :  { %p1003_p7 = scmp.lt.s32.totalorder %s997_s17, %s997_s17 }
   0xf   :  { %p1004_p8 = por %p1003_p7, %p1002_p6 }
  0x11   :  { %p1005_p9 = pnand %p1004_p8, %p998_p5 }
  0x13   :  { %1008 = shalt.err (!%p1005_p9)  }
  0x14   :  { %s1020_s0 = smov [#allocation5]  }
  0x15   :  { %21 = dma.vmem_to_smem %s19_s14, 32, %s1020_s0, [#allocation3] }
  0x16   :  { %1013 = dma.done.wait [#allocation3], 64 }
  0x17   :  { %1014 = vsyncadd [#allocation3], 4294967232 }
  0x18   :  { %23 = sfence }
  0x19   :  { %s1077_s1 = smov 0  }
  0x1a LB: > { %s842_s18 = sadd.s32 4294967295, %s1017_s1   ;;  %p846_p10 = scmp.ge.s32.totalorder %s1017_s1, 1  ;;  %s1017_s1 = sphi %s1077_s1, %s29_s1  }
  0x1b   : > { %p259_p11 = scmp.lt.s32.totalorder %s1017_s1, 3 }
  0x1d   : > { %p260_p12 = pnand %p846_p10, %p259_p11 }
  0x1e   : > { %v342_v0 = vld [vmem:[%s1166_s4] sm:$0xff] (!%p260_p12)  ;;  %v343_v1 = vld [vmem:[%s1166_s4 + $0x8] sm:$0xff] (!%p260_p12)  ;;  %v344_v2 = vld [vmem:[%s1166_s4 + $0x10] sm:$0xff] (!%p260_p12)  ;;  %p296_p13 = scmp.lt.s32.totalorder (!%p260_p12), %s842_s18, 1  ;;  %s853_s25 = sshll.u32 (!%p260_p12), %s842_s18, 7  ;;  %vm317_vm0 = vcmask (!%p260_p12), 261120  }
  0x1f   : > { %263 = sbr.rel (%p260_p12) target bundleno = 1149 (0x47d), region = 48  ;;  %v943_v3 = vpack.c.bf16 (!%p260_p12), %v343_v1, %v342_v0  ;;  %v345_v4 = vld [vmem:[%s1166_s4 + $0x18] sm:$0xff] (!%p260_p12)  ;;  %s323_s28 = sld [smem:[#allocation5 + %s853_s25]] (!%p260_p12)  ;;  %v313_v20 = vld [vmem:[%s1168_s6] sm:$0xff] (!%p260_p12)  ;;  %vm436_vm1 = vcmask (!%p260_p12), 130048   ;;  %v521_v30 = vld [vmem:[%s1169_s7 + $0x8] sm:$0xff] (!%p260_p12) }
  0x20   : > { %v947_v5 = vpack.c.bf16 (!%p260_p12), %v345_v4, %v344_v2  ;;  %s324_s29 = sld [smem:[#allocation4 + %s853_s25]] (!%p260_p12)  ;;  %s331_s30 = sadd.s32 (!%p260_p12), 1, %s853_s25  ;;  %911 = vmatprep.mubr.msk.f32.mxu1 (!%p260_p12), %vm436_vm1, %v313_v20  ;;  %v854_v21 = vld [vmem:[%s1167_s5] ss:$0 sm:$0xff] (!%p260_p12)  ;;  %v314_v34 = vld [vmem:[%s1168_s6 + $0x8] sm:$0xff] (!%p260_p12)  ;;  %v522_v35 = vld [vmem:[%s1169_s7 + $0x10] sm:$0xff] (!%p260_p12) }
  0x21   : > { %944 = vmatprep.subr.bf16.mxu0 (!%p260_p12), %v943_v3  ;;  %s332_s11 = sld [smem:[#allocation5 + %s331_s30]] (!%p260_p12)  ;;  %v520_v29 = vld [vmem:[%s1169_s7] sm:$0xff] (!%p260_p12)  ;;  %v523_v36 = vld [vmem:[%s1169_s7 + $0x18] sm:$0xff] (!%p260_p12)  ;;  %v608_v39 = vld [vmem:[%s1170_s8 + $0x8] sm:$0xff] (!%p260_p12) }
  0x22   : > { %946 = vmatpush3.bf16.msra.mxu0 (!%p260_p12), %v943_v3  ;;  %s333_s15 = sld [smem:[#allocation4 + %s331_s30]] (!%p260_p12)  ;;  %v955_v33 = vpack.c.bf16 (!%p260_p12), %v521_v30, %v520_v29  ;;  %v959_v37 = vpack.c.bf16 (!%p260_p12), %v523_v36, %v522_v35  ;;  %v607_v38 = vld [vmem:[%s1170_s8] sm:$0xff] (!%p260_p12)  ;;  %v609_v45 = vld [vmem:[%s1170_s8 + $0x10] sm:$0xff] (!%p260_p12)  ;;  %v610_v46 = vld [vmem:[%s1170_s8 + $0x18] sm:$0xff] (!%p260_p12) }
  0x23   : > { %948 = vmatprep.subr.bf16.mxu0 (!%p260_p12), %v947_v5  ;;  %v963_v40 = vpack.c.bf16 (!%p260_p12), %v608_v39, %v607_v38  ;;  %v967_v47 = vpack.c.bf16 (!%p260_p12), %v610_v46, %v609_v45 }
  0x25   : > { %v328_v8 = vstv (!%p260_p12), %s323_s28 }
  0x26   : > { %s1174_s18 = smov (!%p296_p13, %s842_s18), 1  ;;  %950 = vmatpush3.bf16.msra.mxu0 %v947_v5  ;;  %s325_s16 = scalar_lea.vmem [#allocation2], %s324_s29 }
  0x27   : > { %s1097_s10 = sshll.u32 %s1174_s18, 4  ;;  %v337_v9 = vstv %s332_s11  ;;  %964 = vmatprep.subr.bf16.mxu0 %v963_v40 }
  0x28   : > { %s305_s14 = scalar_lea.vmem %s1165_s3, %s1097_s10  ;;  %s334_s17 = scalar_lea.vmem [#allocation2], %s333_s15 }
  0x29   : > { %v315_v6 = vld [vmem:[%s305_s14] sm:$0xff]  ;;  %v316_v7 = vld [vmem:[%s305_s14 + $0x8] sm:$0xff]  ;;  %s300_s21 = scalar_lea.vmem %s1164_s2, %s1097_s10  ;;  %s310_s23 = scalar_lea.vmem %s1171_s9, %s1097_s10 }
  0x2a   : > { %318 = vst.msk [vmem:[#allocation2] sm:$0xff] %vm317_vm0, %v315_v6  ;;  %319 = vst.msk [vmem:[#allocation2 + $0x8] sm:$0xff] %vm317_vm0, %v316_v7  ;;  %v312_v22 = vld [vmem:[%s300_s21 + $0x8] sm:$0xff]  ;;  %v311_v25 = vld [vmem:[%s300_s21] sm:$0xff] }
  0x2b   : > { %320 = vst.msk [vmem:[#allocation2 + $0x10] sm:$0xff] %vm317_vm0, %v315_v6  ;;  %321 = vst.msk [vmem:[#allocation2 + $0x18] sm:$0xff] %vm317_vm0, %v316_v7 }
  0x32   : > { %v326_v10 = vld [vmem:[%s325_s16] sm:$0xff]  ;;  %v327_v11 = vld [vmem:[%s325_s16 + $0x8] sm:$0xff] }
  0x33   : > { %v335_v12 = vld [vmem:[%s334_s17] sm:$0xff]  ;;  %v329_v13 = vmul.f32 %v328_v8, %v326_v10  ;;  %v330_v14 = vmul.f32 %v328_v8, %v327_v11  ;;  %v336_v15 = vld [vmem:[%s334_s17 + $0x8] sm:$0xff] }
  0x34   : > { %v338_v16 = vmul.f32 %v337_v9, %v335_v12  ;;  %v339_v17 = vmul.f32 %v337_v9, %v336_v15 }
  0x36   : > { %v340_v18 = vadd.f32 %v338_v16, %v329_v13  ;;  %v341_v19 = vadd.f32 %v339_v17, %v330_v14 }
  0x38   : > { %904 = vmatprep.mubr.msk.f32.mxu0 %vm317_vm0, %v340_v18 }
  0x39   : > { %905 = vmatmul.mubr.msk.f32.vlgmr.msra.gmra.mrb[0].mxu0 %vm317_vm0, %v341_v19 }
  0x3a   : > { %966 = vmatpush3.bf16.msra.mxu0 %v963_v40 }
  0x3b   : > { %968 = vmatprep.subr.bf16.mxu0 %v967_v47 }
  0x3e   : > { %970 = vmatpush3.bf16.msra.mxu0 %v967_v47 }
 0x10c   : > { %v906_v23 = vpop.f32.mrb[0].mxu0 }
 0x10d   : > { %v431_v24 = vadd.f32 %v906_v23, %v854_v21  ;;  %v425_v26 = vpop.f32.mrb[1].mxu0 }
 0x10e   : > { %v426_v27 = vadd.f32 %v854_v21, %v425_v26 }
 0x10f   : > { %v435_v28 = vadd.f32 %v431_v24, %v312_v22 }
 0x110   : > { %v434_v31 = vadd.f32 %v426_v27, %v311_v25 }
 0x112   : > { %v951_v32 = vpack.c.bf16 %v435_v28, %v434_v31 }
 0x114   : > { %952 = vmatprep.subr.bf16.mxu1 %v951_v32 }
 0x115   : > { %954 = vmatpush3.bf16.msra.mxu1 %v951_v32 }
 0x116   : > { %956 = vmatprep.subr.bf16.mxu1 %v955_v33 }
 0x118   : > { %912 = vmatmul.mubr.msk.f32.vlgmr.msra.gmra.mrb[0].mxu1 %vm436_vm1, %v314_v34 }
 0x119   : > { %958 = vmatpush3.bf16.msra.mxu1 %v955_v33 }
 0x11a   : > { %960 = vmatprep.subr.bf16.mxu1 %v959_v37 }
 0x11d   : > { %962 = vmatpush3.bf16.msra.mxu1 %v959_v37 }
 0x1eb   : > { %v913_v41 = vpop.f32.mrb[0].mxu1 }
 0x1ec   : > { %v509_v42 = vpop.f32.mrb[1].mxu1  ;;  %v519_v44 = vsub.f32 %v435_v28, %v913_v41 }
 0x1ed   : > { %v518_v43 = vsub.f32 %v434_v31, %v509_v42 }
 0x1ef   : > { %922 = vmatprep.mubr.msk.f32.mxu1 %vm317_vm0, %v518_v43 }
 0x1f0   : > { %923 = vmatmul.mubr.msk.f32.vlgmr.msra.gmra.mrb[2].mxu1 %vm317_vm0, %v519_v44 }
 0x1f1   : > { %940 = vmatprep.mubr.msk.f32.mxu1 %vm436_vm1, %v313_v20 }
 0x2c3   : > { %v924_v48 = vpop.f32.mrb[2].mxu1 }
 0x2c4   : > { %v596_v49 = vpop.f32.mrb[3].mxu1  ;;  %v606_v51 = vmax.f32 %v924_v48, 0.0 }
 0x2c5   : > { %v605_v50 = vmax.f32 %v596_v49, 0.0 }
 0x2c7   : > { %933 = vmatprep.mubr.msk.f32.mxu0 %vm317_vm0, %v605_v50 }
 0x2c8   : > { %934 = vmatmul.mubr.msk.f32.vlgmr.msra.gmra.mrb[2].mxu0 %vm317_vm0, %v606_v51 }
 0x39b   : > { %v935_v52 = vpop.f32.mrb[2].mxu0 }
 0x39c   : > { %v693_v53 = vadd.f32 %v935_v52, %v519_v44  ;;  %v683_v54 = vpop.f32.mrb[3].mxu0 }
 0x39d   : > { %v692_v55 = vadd.f32 %v683_v54, %v518_v43 }
 0x39f   : > { %v971_v56 = vpack.c.bf16 %v693_v53, %v692_v55 }
 0x3a1   : > { %972 = vmatprep.subr.bf16.mxu1 %v971_v56 }
 0x3a2   : > { %974 = vmatpush3.bf16.msra.mxu1 %v971_v56 }
 0x3a5   : > { %941 = vmatmul.mubr.msk.f32.vlgmr.msra.gmra.mrb[4].mxu1 %vm436_vm1, %v314_v34 }
 0x478   : > { %v942_v57 = vpop.f32.mrb[4].mxu1 }
 0x479   : > { %v770_v58 = vsub.f32 %v693_v53, %v942_v57  ;;  %v760_v59 = vpop.f32.mrb[5].mxu1 }
 0x47a   : > { %v769_v60 = vsub.f32 %v692_v55, %v760_v59 }
 0x47b   : > { %772 = vst.msk [vmem:[%s310_s23 + $0x8] sm:$0xff] %vm317_vm0, %v770_v58 }
 0x47c   : > { %771 = vst.msk [vmem:[%s310_s23] sm:$0xff] %vm317_vm0, %v769_v60 }
 0x47d PF: > { %s29_s1 = sadd.s32 1, %s1017_s1  }
 0x47e   : > { %p26_p0 = scmp.ge.s32.totalorder %s29_s1, 4  }
 0x480   :  { %28 = sbr.rel (!%p26_p0) target bundleno = 26 (0x1a), region = 83 }

// kernel: _lambda_.17
= control target key start
LH: loop header
LB: loop body
LE: loop exit
PB: predicated region body
PF: predicated region fallthrough
CT: control target
= control target key end

     0   :  { %s1858_s0 = inlined_call_operand.vmem [shape: s32[2,2], index: 0, kind: input, shape index: {}]   ;;  %s1859_s2 = inlined_call_operand.vmem [shape: f32[2,16,32], index: 2, kind: input, shape index: {}]   ;;  %s1860_s3 = inlined_call_operand.vmem [shape: f32[2,16,32], index: 3, kind: input, shape index: {}]   ;;  %s1861_s4 = inlined_call_operand.vmem [shape: f32[2,16,32], index: 4, kind: input, shape index: {}]   ;;  %s1862_s5 = inlined_call_operand.vmem [shape: f32[32,32], index: 5, kind: input, shape index: {}]   ;;  %s1863_s6 = inlined_call_operand.vmem [shape: f32[1,32], index: 6, kind: input, shape index: {}]   ;;  %s1864_s7 = inlined_call_operand.vmem [shape: f32[16,16], index: 7, kind: input, shape index: {}]   ;;  %s1865_s8 = inlined_call_operand.vmem [shape: f32[32,32], index: 8, kind: input, shape index: {}]   ;;  %s1866_s9 = inlined_call_operand.vmem [shape: f32[1,32], index: 9, kind: input, shape index: {}]   ;;  %s1867_s10 = inlined_call_operand.vmem [shape: f32[32,64], index: 10, kind: input, shape index: {}]   ;;  %s1868_s11 = inlined_call_operand.vmem [shape: f32[1,64], index: 11, kind: input, shape index: {}]   ;;  %s1869_s12 = inlined_call_operand.vmem [shape: f32[2,16,32], index: 12, kind: output, shape index: {0}]   ;;  %s1870_s13 = inlined_call_operand.vmem [shape: f32[2,16,32], index: 13, kind: output, shape index: {1}]   ;;  %s1871_s14 = inlined_call_operand.vmem [shape: f32[2,16,32], index: 14, kind: output, shape index: {2}]   ;;  %s1872_s15 = inlined_call_operand.vmem [shape: f32[2,1,16], index: 15, kind: output, shape index: {3}]   ;;  %s1873_s1 = inlined_call_operand.vmem [shape: f32[2,2], index: 1, kind: input, shape index: {}]  }
   0x1   :  { %s21_s20 = sshll.u32 %s1858_s0, 4  ;;  %s25_s23 = sshll.u32 %s1873_s1, 4  ;;  %s22_s20 = int_to_ptr.vmem [resolvable:$true] %s21_s20  ;;  %s26_s23 = int_to_ptr.vmem [resolvable:$true] %s25_s23 }
   0x2   :  { %s1563_s24 = scalar_lea.vmem %s22_s20, 32  ;;  %p1568_p1 = scmp.lt.s32.totalorder %s22_s20, %s22_s20 }
   0x3   :  { %p1564_p0 = scmp.ne.s32.totalorder %s22_s20, %s1563_s24  ;;  %p1569_p2 = scmp.lt.s32.totalorder %s1563_s24, %s1563_s24 }
   0x5   :  { %p1570_p3 = por %p1569_p2, %p1568_p1 }
   0x7   :  { %p1571_p4 = pnand %p1570_p3, %p1564_p0 }
   0x9   :  { %1574 = shalt.err (!%p1571_p4)  }
   0xa   :  { %s1597_s25 = smov [#allocation4]   ;;  %s1575_s26 = scalar_lea.vmem %s26_s23, 32 }
   0xb   :  { %24 = dma.vmem_to_smem %s22_s20, 32, %s1597_s25, [#allocation3] }
   0xc   :  { %p1576_p5 = scmp.ne.s32.totalorder %s26_s23, %s1575_s26  ;;  %p1580_p6 = scmp.lt.s32.totalorder %s26_s23, %s26_s23 }
   0xd   :  { %p1581_p7 = scmp.lt.s32.totalorder %s1575_s26, %s1575_s26 }
   0xf   :  { %p1582_p8 = por %p1581_p7, %p1580_p6 }
  0x11   :  { %p1583_p9 = pnand %p1582_p8, %p1576_p5 }
  0x13   :  { %1586 = shalt.err (!%p1583_p9)  }
  0x14   :  { %s1598_s0 = smov [#allocation5]  }
  0x15   :  { %28 = dma.vmem_to_smem %s26_s23, 32, %s1598_s0, [#allocation3] }
  0x16   :  { %1591 = dma.done.wait [#allocation3], 64 }
  0x17   :  { %1592 = vsyncadd [#allocation3], 4294967232 }
  0x18   :  { %30 = sfence }
  0x19   :  { %s1716_s1 = smov 0  }
  0x1a LB: > { %s1374_s27 = sadd.s32 4294967295, %s1595_s1   ;;  %p1378_p10 = scmp.ge.s32.totalorder %s1595_s1, 1  ;;  %s1595_s1 = sphi %s1716_s1, %s36_s1  }
  0x1b   : > { %p426_p11 = scmp.lt.s32.totalorder %s1595_s1, 3 }
  0x1d   : > { %p427_p12 = pnand %p1378_p10, %p426_p11 }
  0x1e   : > { %v557_v0 = vld [vmem:[%s1862_s5] sm:$0xff] (!%p427_p12)  ;;  %v558_v1 = vld [vmem:[%s1862_s5 + $0x8] sm:$0xff] (!%p427_p12)  ;;  %v559_v2 = vld [vmem:[%s1862_s5 + $0x10] sm:$0xff] (!%p427_p12)  ;;  %p493_p13 = scmp.lt.s32.totalorder (!%p427_p12), %s1374_s27, 1  ;;  %s1391_s19 = sshll.u32 (!%p427_p12), %s1374_s27, 7  ;;  %vm532_vm0 = vcmask (!%p427_p12), 261120  }
  0x1f   : > { %430 = sbr.rel (%p427_p12) target bundleno = 1112 (0x458), region = 60  ;;  %v1488_v3 = vpack.c.bf16 (!%p427_p12), %v558_v1, %v557_v0  ;;  %v560_v4 = vld [vmem:[%s1862_s5 + $0x18] sm:$0xff] (!%p427_p12)  ;;  %s538_s22 = sld [smem:[#allocation5 + %s1391_s19]] (!%p427_p12)  ;;  %v528_v20 = vld [vmem:[%s1864_s7] sm:$0xff] (!%p427_p12)  ;;  %vm651_vm1 = vcmask (!%p427_p12), 130048   ;;  %v740_v30 = vld [vmem:[%s1865_s8 + $0x8] sm:$0xff] (!%p427_p12) }
  0x20   : > { %v1492_v5 = vpack.c.bf16 (!%p427_p12), %v560_v4, %v559_v2  ;;  %s539_s23 = sld [smem:[#allocation4 + %s1391_s19]] (!%p427_p12)  ;;  %s546_s24 = sadd.s32 (!%p427_p12), 1, %s1391_s19  ;;  %1456 = vmatprep.mubr.msk.f32.mxu1 (!%p427_p12), %vm651_vm1, %v528_v20  ;;  %v1392_v21 = vld [vmem:[%s1863_s6] ss:$0 sm:$0xff] (!%p427_p12)  ;;  %v529_v34 = vld [vmem:[%s1864_s7 + $0x8] sm:$0xff] (!%p427_p12)  ;;  %v741_v35 = vld [vmem:[%s1865_s8 + $0x10] sm:$0xff] (!%p427_p12) }
  0x21   : > { %1489 = vmatprep.subr.bf16.mxu0 (!%p427_p12), %v1488_v3  ;;  %s547_s26 = sld [smem:[#allocation5 + %s546_s24]] (!%p427_p12)  ;;  %v739_v29 = vld [vmem:[%s1865_s8] sm:$0xff] (!%p427_p12)  ;;  %v742_v36 = vld [vmem:[%s1865_s8 + $0x18] sm:$0xff] (!%p427_p12)  ;;  %v834_v39 = vld [vmem:[%s1867_s10 + $0x8] sm:$0xff] (!%p427_p12)  ;;  %s1603_s18 = smov (!%p427_p12), 6   ;;  %vm1027_vm3 = vcmask (!%p427_p12), 121856  }
  0x22   : > { %1491 = vmatpush3.bf16.msra.mxu0 (!%p427_p12), %v1488_v3  ;;  %s548_s30 = sld [smem:[#allocation4 + %s546_s24]] (!%p427_p12)  ;;  %v1500_v33 = vpack.c.bf16 (!%p427_p12), %v740_v30, %v739_v29  ;;  %v1504_v37 = vpack.c.bf16 (!%p427_p12), %v742_v36, %v741_v35  ;;  %v833_v38 = vld [vmem:[%s1867_s10] sm:$0xff] (!%p427_p12)  ;;  %v835_v41 = vld [vmem:[%s1867_s10 + $0x10] sm:$0xff] (!%p427_p12)  ;;  %v836_v42 = vld [vmem:[%s1867_s10 + $0x18] sm:$0xff] (!%p427_p12)  ;;  %s1604_s19 = smov (!%p427_p12), 118   ;;  %vm1039_vm4 = vcmask (!%p427_p12), 113664  }
  0x23   : > { %1493 = vmatprep.subr.bf16.mxu0 (!%p427_p12), %v1492_v5  ;;  %v1508_v40 = vpack.c.bf16 (!%p427_p12), %v834_v39, %v833_v38  ;;  %v1512_v43 = vpack.c.bf16 (!%p427_p12), %v836_v42, %v835_v41  ;;  %v1400_v50 = vld [vmem:[%s1868_s11] ss:$0 sm:$0xff] (!%p427_p12)  ;;  %vm1517_vm2 = vmpackc.low (!%p427_p12), %vm532_vm0, %vm532_vm0  ;;  %s1606_s21 = smov (!%p427_p12), 117   ;;  %s1609_s24 = smov (!%p427_p12), 14   ;;  %vm1051_vm5 = vcmask (!%p427_p12), 105472   ;;  %vm1063_vm6 = vcmask (!%p427_p12), 97280  }
  0x24   : > { %v1397_v55 = vld [vmem:[%s1866_s9] ss:$0 sm:$0xff] (!%p427_p12)  ;;  %s1611_s0 = smov (!%p427_p12), 13   ;;  %s1612_s28 = smov (!%p427_p12), 125   ;;  %vm1075_vm7 = vcmask (!%p427_p12), 89088   ;;  %vm1087_vm8 = vcmask (!%p427_p12), 80896  }
  0x25   : > { %v543_v8 = vstv (!%p427_p12), %s538_s22  ;;  %vm1099_vm9 = vcmask (!%p427_p12), 72704   ;;  %vm1121_vm10 = vcmask (!%p427_p12), 56320   ;;  %vm1112_vm11 = vcmask (!%p427_p12), 64512  }
  0x26   : > { %s1875_s27 = smov (!%p493_p13, %s1374_s27), 1  ;;  %1495 = vmatpush3.bf16.msra.mxu0 %v1492_v5  ;;  %s540_s16 = scalar_lea.vmem [#allocation2], %s539_s23  ;;  %vm1133_vm12 = vcmask 48128   ;;  %vm1145_vm13 = vcmask 39936   ;;  %vm1157_vm14 = vcmask 31744   ;;  %vm1169_vm15 = vcmask 23552  }
  0x27   : > { %s1739_s25 = sshll.u32 %s1875_s27, 4  ;;  %v552_v9 = vstv %s547_s26  ;;  %1509 = vmatprep.subr.bf16.mxu0 %v1508_v40  ;;  %s1610_s26 = smov 15  }
  0x28   : > { %s502_s29 = scalar_lea.vmem %s1860_s3, %s1739_s25  ;;  %s549_s17 = scalar_lea.vmem [#allocation2], %s548_s30 }
  0x29   : > { %v530_v6 = vld [vmem:[%s502_s29] sm:$0xff]  ;;  %v531_v7 = vld [vmem:[%s502_s29 + $0x8] sm:$0xff]  ;;  %s497_s22 = scalar_lea.vmem %s1859_s2, %s1739_s25  ;;  %s517_s20 = scalar_lea.vmem %s1870_s13, %s1739_s25 }
  0x2a   : > { %533 = vst.msk [vmem:[#allocation2] sm:$0xff] %vm532_vm0, %v530_v6  ;;  %534 = vst.msk [vmem:[#allocation2 + $0x8] sm:$0xff] %vm532_vm0, %v531_v7  ;;  %v527_v22 = vld [vmem:[%s497_s22 + $0x8] sm:$0xff]  ;;  %v526_v25 = vld [vmem:[%s497_s22] sm:$0xff]  ;;  %s512_s23 = scalar_lea.vmem %s1869_s12, %s1739_s25  ;;  %s1599_s29 = smov 8  }
  0x2b   : > { %535 = vst.msk [vmem:[#allocation2 + $0x10] sm:$0xff] %vm532_vm0, %v530_v6  ;;  %536 = vst.msk [vmem:[#allocation2 + $0x18] sm:$0xff] %vm532_vm0, %v531_v7  ;;  %s1600_s30 = smov 120   ;;  %s1607_s22 = smov 126  }
  0x32   : > { %v541_v10 = vld [vmem:[%s540_s16] sm:$0xff]  ;;  %v542_v11 = vld [vmem:[%s540_s16 + $0x8] sm:$0xff]  ;;  %s1601_s16 = smov 7  }
  0x33   : > { %v550_v12 = vld [vmem:[%s549_s17] sm:$0xff]  ;;  %v544_v13 = vmul.f32 %v543_v8, %v541_v10  ;;  %v545_v14 = vmul.f32 %v543_v8, %v542_v11  ;;  %v551_v15 = vld [vmem:[%s549_s17 + $0x8] sm:$0xff]  ;;  %s507_s17 = scalar_lea.vmem %s1861_s4, %s1739_s25 }
  0x34   : > { %v553_v16 = vmul.f32 %v552_v9, %v550_v12  ;;  %v554_v17 = vmul.f32 %v552_v9, %v551_v15  ;;  %v831_v44 = vld [vmem:[%s507_s17] sm:$0xff]  ;;  %v832_v45 = vld [vmem:[%s507_s17 + $0x8] sm:$0xff]  ;;  %s1602_s17 = smov 119  }
  0x36   : > { %v555_v18 = vadd.f32 %v553_v16, %v544_v13  ;;  %v556_v19 = vadd.f32 %v554_v17, %v545_v14 }
  0x38   : > { %1449 = vmatprep.mubr.msk.f32.mxu0 %vm532_vm0, %v555_v18 }
  0x39   : > { %1450 = vmatmul.mubr.msk.f32.vlgmr.msra.gmra.mrb[0].mxu0 %vm532_vm0, %v556_v19 }
  0x3a   : > { %1511 = vmatpush3.bf16.msra.mxu0 %v1508_v40  ;;  %1478 = vmatprep.mubr.msk.f32.mxu0 %vm532_vm0, %v831_v44 }
  0x3b   : > { %1513 = vmatprep.subr.bf16.mxu0 %v1512_v43 }
  0x3e   : > { %1515 = vmatpush3.bf16.msra.mxu0 %v1512_v43 }
  0x41   : > { %1479 = vmatmul.mubr.msk.f32.vlgmr.msra.gmra.mrb[2].mxu0 %vm532_vm0, %v832_v45 }
 0x10c   : > { %v1451_v23 = vpop.f32.mrb[0].mxu0 }
 0x10d   : > { %v646_v24 = vadd.f32 %v1451_v23, %v1392_v21  ;;  %v640_v26 = vpop.f32.mrb[1].mxu0 }
 0x10e   : > { %v641_v27 = vadd.f32 %v1392_v21, %v640_v26 }
 0x10f   : > { %v650_v28 = vadd.f32 %v646_v24, %v527_v22 }
 0x110   : > { %v649_v31 = vadd.f32 %v641_v27, %v526_v25 }
 0x112   : > { %v1496_v32 = vpack.c.bf16 %v650_v28, %v649_v31 }
 0x114   : > { %1497 = vmatprep.subr.bf16.mxu1 %v1496_v32  ;;  %v1480_v51 = vpop.f32.mrb[2].mxu0 }
 0x115   : > { %1499 = vmatpush3.bf16.msra.mxu1 %v1496_v32  ;;  %v1813_v52 = vadd.f32 %v1480_v51, %v1400_v50  ;;  %v916_v53 = vpop.f32.mrb[3].mxu0 }
 0x116   : > { %1501 = vmatprep.subr.bf16.mxu1 %v1500_v33  ;;  %v1815_v54 = vadd.f32 %v1400_v50, %v916_v53 }
 0x118   : > { %1457 = vmatmul.mubr.msk.f32.vlgmr.msra.gmra.mrb[0].mxu1 %vm651_vm1, %v529_v34  ;;  %vm1181_vm1 = vcmask 15360  }
 0x119   : > { %1503 = vmatpush3.bf16.msra.mxu1 %v1500_v33 }
 0x11a   : > { %1505 = vmatprep.subr.bf16.mxu1 %v1504_v37 }
 0x11d   : > { %1507 = vmatpush3.bf16.msra.mxu1 %v1504_v37 }
 0x1eb   : > { %v1458_v46 = vpop.f32.mrb[0].mxu1 }
 0x1ec   : > { %v734_v47 = vsub.f32 %v650_v28, %v1458_v46  ;;  %738 = vst.msk [vmem:[%s517_s20 + $0x8] sm:$0xff] %vm532_vm0, %v1458_v46  ;;  %v724_v48 = vpop.f32.mrb[1].mxu1 }
 0x1ed   : > { %v733_v49 = vsub.f32 %v649_v31, %v724_v48  ;;  %737 = vst.msk [vmem:[%s517_s20] sm:$0xff] %vm532_vm0, %v724_v48  ;;  %s1605_s20 = smov 5  }
 0x1ee   : > { %736 = vst.msk [vmem:[%s512_s23 + $0x8] sm:$0xff] %vm532_vm0, %v734_v47 }
 0x1ef   : > { %735 = vst.msk [vmem:[%s512_s23] sm:$0xff] %vm532_vm0, %v733_v49  ;;  %1467 = vmatprep.mubr.msk.f32.mxu1 %vm532_vm0, %v733_v49  ;;  %s1608_s23 = smov 127  }
 0x1f0   : > { %1468 = vmatmul.mubr.msk.f32.vlgmr.msra.gmra.mrb[2].mxu1 %vm532_vm0, %v734_v47 }
 0x1f1   : > { %1485 = vmatprep.mubr.msk.f32.mxu1 %vm532_vm0, %v1815_v54 }
 0x2c3   : > { %v1469_v56 = vpop.f32.mrb[2].mxu1 }
 0x2c4   : > { %v828_v57 = vadd.f32 %v1469_v56, %v1397_v55  ;;  %v822_v58 = vpop.f32.mrb[3].mxu1 }
 0x2c5   : > { %v823_v59 = vadd.f32 %v1397_v55, %v822_v58 }
 0x2c7   : > { %v1516_v60 = vpack.c.bf16 %v828_v57, %v823_v59 }
 0x2c9   : > { %1518 = vmatprep.subr.msk.bf16.mxu1 %vm1517_vm2, %v1516_v60 }
 0x2ca   : > { %1521 = vmatpush3.bf16.xpose.msk.msra.mxu1 %vm1517_vm2, %v1516_v60  ;;  %vm1193_vm2 = vcmask 7168  }
 0x2d1   : > { %1486 = vmatmul.mubr.msk.f32.vlgmr.msra.gmra.mrb[4].mxu1 %vm532_vm0, %v1813_v52 }
 0x3a4   : > { %v1487_v61 = vpop.f32.mrb[4].mxu1 }
 0x3a5   : > { %1109 = vrot.lane.b32.xlu1 %v1487_v61, %s1599_s29  ;;  %1106 = vrot.lane.b32.xlu0 %v1487_v61, %s1600_s30  ;;  %v1826_v62 = vpop.f32.mrb[5].mxu1  ;;  %s1613_s29 = smov 12   ;;  %s1614_s30 = smov 124  }
 0x3a9   : > { %1118 = vrot.lane.b32.xlu1 %v1487_v61, %s1601_s16  ;;  %1115 = vrot.lane.b32.xlu0 %v1487_v61, %s1602_s17  ;;  %s1615_s16 = smov 11   ;;  %s1616_s17 = smov 123  }
 0x3ad   : > { %1130 = vrot.lane.b32.xlu1 %v1487_v61, %s1603_s18  ;;  %1127 = vrot.lane.b32.xlu0 %v1487_v61, %s1604_s19  ;;  %s1617_s18 = smov 10   ;;  %s1618_s19 = smov 122  }
 0x3b1   : > { %1142 = vrot.lane.b32.xlu1 %v1487_v61, %s1605_s20  ;;  %1139 = vrot.lane.b32.xlu0 %v1487_v61, %s1606_s21  ;;  %s1619_s20 = smov 9   ;;  %s1620_s21 = smov 121  }
 0x3b5   : > { %1033 = vrot.lane.b32.xlu1 %v1826_v62, %s1607_s22  ;;  %1021 = vrot.lane.b32.xlu0 %v1826_v62, %s1608_s23  ;;  %s1621_s22 = smov 4   ;;  %s1622_s23 = smov 116  }
 0x3b9   : > { %1036 = vrot.lane.b32.xlu1 %v1826_v62, %s1609_s24  ;;  %1024 = vrot.lane.b32.xlu0 %v1826_v62, %s1610_s26  ;;  %s1623_s24 = smov 3   ;;  %s1624_s26 = smov 115  }
 0x3bd   : > { %1048 = vrot.lane.b32.xlu1 %v1826_v62, %s1611_s0  ;;  %1045 = vrot.lane.b32.xlu0 %v1826_v62, %s1612_s28  ;;  %s1625_s0 = smov 2   ;;  %s1626_s28 = smov 114  }
 0x3c1   : > { %1060 = vrot.lane.b32.xlu1 %v1826_v62, %s1613_s29  ;;  %1057 = vrot.lane.b32.xlu0 %v1826_v62, %s1614_s30  ;;  %s1627_s29 = smov 1   ;;  %s1628_s30 = smov 113  }
 0x3c5   : > { %1072 = vrot.lane.b32.xlu1 %v1826_v62, %s1615_s16  ;;  %1069 = vrot.lane.b32.xlu0 %v1826_v62, %s1616_s17  ;;  %s1629_s16 = smov 96  }
 0x3c9   : > { %1084 = vrot.lane.b32.xlu1 %v1826_v62, %s1617_s18  ;;  %1081 = vrot.lane.b32.xlu0 %v1826_v62, %s1618_s19  ;;  %s522_s19 = scalar_lea.vmem %s1871_s14, %s1739_s25 }
 0x3cd   : > { %1096 = vrot.lane.b32.xlu1 %v1826_v62, %s1619_s20  ;;  %1093 = vrot.lane.b32.xlu0 %v1826_v62, %s1620_s21 }
 0x3d1   : > { %1154 = vrot.lane.b32.xlu1 %v1487_v61, %s1621_s22  ;;  %1151 = vrot.lane.b32.xlu0 %v1487_v61, %s1622_s23  ;;  %s525_s22 = scalar_lea.vmem %s1872_s15, %s1875_s27 }
 0x3d5   : > { %1166 = vrot.lane.b32.xlu1 %v1487_v61, %s1623_s24  ;;  %1163 = vrot.lane.b32.xlu0 %v1487_v61, %s1624_s26 }
 0x3d9   : > { %1178 = vrot.lane.b32.xlu1 %v1487_v61, %s1625_s0  ;;  %1175 = vrot.lane.b32.xlu0 %v1487_v61, %s1626_s28 }
 0x3dd   : > { %1190 = vrot.lane.b32.xlu1 %v1487_v61, %s1627_s29  ;;  %1187 = vrot.lane.b32.xlu0 %v1487_v61, %s1628_s30 }
 0x3e1   : > { %929 = vrot.lane.b32.xlu1 %v1813_v52, %s1629_s16  ;;  %927 = vrot.lane.b32.xlu0 %v1815_v54, %s1629_s16 }
 0x417   : > { %v1110_v63 = vpop.permute.xlu1 %1109  ;;  %v1107_v0 = vpop.permute.xlu0 %1106 }
 0x418   : > { %v1113_v45 = vsel %vm1112_vm11, %v1107_v0, %v1110_v63 }
 0x41b   : > { %v1119_v1 = vpop.permute.xlu1 %1118  ;;  %v1116_v2 = vpop.permute.xlu0 %1115 }
 0x41c   : > { %v1122_v41 = vsel %vm1121_vm10, %v1116_v2, %v1119_v1 }
 0x41d   : > { %v1124_v47 = vrot.slane %v1122_v41, 1 }
 0x41f   : > { %v1131_v3 = vpop.permute.xlu1 %1130  ;;  %v1128_v4 = vpop.permute.xlu0 %1127 }
 0x420   : > { %v1134_v46 = vsel %vm1133_vm12, %v1128_v4, %v1131_v3 }
 0x421   : > { %v1136_v50 = vrot.slane %v1134_v46, 2 }
 0x423   : > { %v1143_v5 = vpop.permute.xlu1 %1142  ;;  %v1140_v6 = vpop.permute.xlu0 %1139 }
 0x424   : > { %v1146_v49 = vsel %vm1145_vm13, %v1140_v6, %v1143_v5 }
 0x425   : > { %v1148_v55 = vrot.slane %v1146_v49, 3 }
 0x427   : > { %v1034_v7 = vpop.permute.xlu1 %1033  ;;  %v1022_v8 = vpop.permute.xlu0 %1021 }
 0x42b   : > { %v1037_v9 = vpop.permute.xlu1 %1036  ;;  %v1025_v10 = vpop.permute.xlu0 %1024 }
 0x42c   : > { %v1028_v11 = vsel %vm1027_vm3, %v1022_v8, %v1025_v10  ;;  %v1040_v15 = vsel %vm1039_vm4, %v1034_v7, %v1037_v9  ;;  %vm1200_vm3 = vcmask 122880  }
 0x42d   : > { %v1030_v12 = vrot.slane %v1028_v11, 1  ;;  %v1042_v20 = vrot.slane %v1040_v15, 2 }
 0x42f   : > { %v1049_v13 = vpop.permute.xlu1 %1048  ;;  %v1046_v14 = vpop.permute.xlu0 %1045  ;;  %v1032_v16 = vadd.f32 %v1030_v12, %v1826_v62 }
 0x430   : > { %v1052_v19 = vsel %vm1051_vm5, %v1046_v14, %v1049_v13 }
 0x431   : > { %v1044_v22 = vadd.f32 %v1042_v20, %v1032_v16  ;;  %v1054_v23 = vrot.slane %v1052_v19, 3 }
 0x433   : > { %v1061_v17 = vpop.permute.xlu1 %1060  ;;  %v1058_v18 = vpop.permute.xlu0 %1057  ;;  %v1056_v28 = vadd.f32 %v1054_v23, %v1044_v22 }
 0x434   : > { %v1064_v21 = vsel %vm1063_vm6, %v1058_v18, %v1061_v17 }
 0x435   : > { %v1066_v27 = vrot.slane %v1064_v21, 4 }
 0x437   : > { %v1073_v24 = vpop.permute.xlu1 %1072  ;;  %v1070_v25 = vpop.permute.xlu0 %1069  ;;  %v1068_v33 = vadd.f32 %v1066_v27, %v1056_v28 }
 0x438   : > { %v1076_v26 = vsel %vm1075_vm7, %v1070_v25, %v1073_v24 }
 0x439   : > { %v1078_v29 = vrot.slane %v1076_v26, 5 }
 0x43b   : > { %v1085_v30 = vpop.permute.xlu1 %1084  ;;  %v1082_v31 = vpop.permute.xlu0 %1081  ;;  %v1080_v35 = vadd.f32 %v1078_v29, %v1068_v33 }
 0x43c   : > { %v1088_v32 = vsel %vm1087_vm8, %v1082_v31, %v1085_v30 }
 0x43d   : > { %v1090_v34 = vrot.slane %v1088_v32, 6 }
 0x43f   : > { %v1097_v36 = vpop.permute.xlu1 %1096  ;;  %v1094_v37 = vpop.permute.xlu0 %1093  ;;  %v1092_v39 = vadd.f32 %v1090_v34, %v1080_v35 }
 0x440   : > { %v1100_v38 = vsel %vm1099_vm9, %v1094_v37, %v1097_v36 }
 0x441   : > { %v1102_v40 = vrot.slane %v1100_v38, 7 }
 0x443   : > { %v1104_v42 = vadd.f32 %v1102_v40, %v1092_v39  ;;  %v1155_v43 = vpop.permute.xlu1 %1154  ;;  %v1152_v44 = vpop.permute.xlu0 %1151 }
 0x444   : > { %v1158_v54 = vsel %vm1157_vm14, %v1152_v44, %v1155_v43 }
 0x445   : > { %v1114_v48 = vadd.f32 %v1113_v45, %v1104_v42  ;;  %v1160_v59 = vrot.slane %v1158_v54, 4 }
 0x447   : > { %v1126_v51 = vadd.f32 %v1124_v47, %v1114_v48  ;;  %v1167_v52 = vpop.permute.xlu1 %1166  ;;  %v1164_v53 = vpop.permute.xlu0 %1163 }
 0x448   : > { %v1170_v57 = vsel %vm1169_vm15, %v1164_v53, %v1167_v52 }
 0x449   : > { %v1138_v56 = vadd.f32 %v1136_v50, %v1126_v51  ;;  %v1172_v0 = vrot.slane %v1170_v57, 5 }
 0x44b   : > { %v1150_v58 = vadd.f32 %v1148_v55, %v1138_v56  ;;  %v1179_v60 = vpop.permute.xlu1 %1178  ;;  %v1176_v61 = vpop.permute.xlu0 %1175 }
 0x44c   : > { %v1182_v62 = vsel %vm1181_vm1, %v1176_v61, %v1179_v60 }
 0x44d   : > { %v1162_v63 = vadd.f32 %v1160_v59, %v1150_v58  ;;  %v1184_v2 = vrot.slane %v1182_v62, 6 }
 0x44f   : > { %v1174_v1 = vadd.f32 %v1172_v0, %v1162_v63  ;;  %v1191_v3 = vpop.permute.xlu1 %1190  ;;  %v1188_v4 = vpop.permute.xlu0 %1187 }
 0x450   : > { %v1194_v5 = vsel %vm1193_vm2, %v1188_v4, %v1191_v3 }
 0x451   : > { %v1186_v6 = vadd.f32 %v1184_v2, %v1174_v1  ;;  %v1196_v7 = vrot.slane %v1194_v5, 7 }
 0x453   : > { %v1198_v8 = vadd.f32 %v1196_v7, %v1186_v6  ;;  %v930_v9 = vpop.permute.xlu1 %929  ;;  %v928_v10 = vpop.permute.xlu0 %927 }
 0x454   : > { %934 = vst.msk [vmem:[%s522_s19 + $0x8] sm:$0xff] %vm532_vm0, %v930_v9  ;;  %933 = vst.msk [vmem:[%s522_s19] sm:$0xff] %vm532_vm0, %v928_v10 }
 0x455   : > { %v1199_v11 = vmul.f32 0.03125, %v1198_v8 }
 0x457   : > { %1201 = vst.msk [vmem:[%s525_s22] sm:$0x1] %vm1200_vm3, %v1199_v11 }
 0x458 PF: > { %s36_s1 = sadd.s32 1, %s1595_s1  }
 0x459   : > { %p33_p0 = scmp.ge.s32.totalorder %s36_s1, 4  }
 0x45b   :  { %35 = sbr.rel (!%p33_p0) target bundleno = 26 (0x1a), region = 134 }

// kernel: _lambda_.19
= control target key start
LH: loop header
LB: loop body
LE: loop exit
PB: predicated region body
PF: predicated region fallthrough
CT: control target
= control target key end

     0   :  { %s600_s21 = smov 0   ;;  %s654_s0 = inlined_call_operand.vmem [shape: f32[2,16,32], index: 0, kind: input, shape index: {}]   ;;  %s655_s1 = inlined_call_operand.vmem [shape: f32[1,32], index: 1, kind: input, shape index: {}]   ;;  %s656_s2 = inlined_call_operand.vmem [shape: f32[1,32], index: 2, kind: input, shape index: {}]   ;;  %s657_s3 = inlined_call_operand.vmem [shape: f32[32,4], index: 3, kind: input, shape index: {}]   ;;  %s658_s4 = inlined_call_operand.vmem [shape: f32[1,4], index: 4, kind: input, shape index: {}]   ;;  %s659_s5 = inlined_call_operand.vmem [shape: f32[2,16,4], index: 5, kind: input, shape index: {}]   ;;  %s660_s6 = inlined_call_operand.vmem [shape: f32[2,16,4], index: 6, kind: output, shape index: {}]  }
   0x1 LB: > { %s499_s22 = sadd.s32 4294967295, %s563_s21   ;;  %p503_p0 = scmp.ge.s32.totalorder %s563_s21, 1  ;;  %s563_s21 = sphi %s600_s21, %s16_s21  }
   0x2   : > { %p222_p1 = scmp.lt.s32.totalorder %s563_s21, 3 }
   0x4   : > { %p223_p2 = pnand %p503_p0, %p222_p1 }
   0x5   : > { %p257_p3 = scmp.lt.s32.totalorder (!%p223_p2), %s499_s22, 1  ;;  %vm276_vm0 = vcmask (!%p223_p2), 261120   ;;  %v335_v14 = vld [vmem:[%s657_s3] sm:$0xff] (!%p223_p2)  ;;  %v336_v15 = vld [vmem:[%s657_s3 + $0x8] sm:$0xff] (!%p223_p2)  ;;  %v337_v16 = vld [vmem:[%s657_s3 + $0x10] sm:$0xff] (!%p223_p2)  ;;  %vm429_vm1 = vcmask (!%p223_p2), 31744  }
   0x6   : > { %226 = sbr.rel (%p223_p2) target bundleno = 572 (0x23c), region = 44  ;;  %v537_v17 = vpack.c.bf16 (!%p223_p2), %v336_v15, %v335_v14  ;;  %v338_v18 = vld [vmem:[%s657_s3 + $0x18] sm:$0xff] (!%p223_p2)  ;;  %v510_v27 = vld [vmem:[%s655_s1] ss:$0 sm:$0xff] (!%p223_p2) }
   0x7   : > { %v541_v19 = vpack.c.bf16 (!%p223_p2), %v338_v18, %v337_v16  ;;  %v511_v31 = vld [vmem:[%s656_s2] ss:$0 sm:$0xff] (!%p223_p2) }
   0x8   : > { %538 = vmatprep.subr.bf16.mxu0 (!%p223_p2), %v537_v17  ;;  %v512_v48 = vld [vmem:[%s658_s4] ss:$0 sm:$0xff] (!%p223_p2) }
   0x9   : > { %540 = vmatpush3.bf16.msra.mxu0 (!%p223_p2), %v537_v17 }
   0xa   : > { %542 = vmatprep.subr.bf16.mxu0 (!%p223_p2), %v541_v19 }
   0xd   : > { %s662_s22 = smov (!%p257_p3, %s499_s22), 1  ;;  %544 = vmatpush3.bf16.msra.mxu0 %v541_v19 }
   0xe   : > { %s608_s23 = sshll.u32 %s662_s22, 4 }
   0xf   : > { %s261_s26 = scalar_lea.vmem %s654_s0, %s608_s23  ;;  %s266_s17 = scalar_lea.vmem %s659_s5, %s608_s23 }
  0x10   : > { %v272_v0 = vld [vmem:[%s261_s26] sm:$0xff]  ;;  %v273_v1 = vld [vmem:[%s261_s26 + $0x8] sm:$0xff]  ;;  %s271_s24 = scalar_lea.vmem %s660_s6, %s608_s23 }
  0x11   : > { %v277_v2 = vsel %vm276_vm0, %v272_v0, 0.0  ;;  %v280_v3 = vsel %vm276_vm0, %v273_v1, 0.0  ;;  %v334_v49 = vld [vmem:[%s266_s17 + $0x8] sm:$0xff]  ;;  %v333_v52 = vld [vmem:[%s266_s17] sm:$0xff] }
  0x12   : > { %278 = vadd.xlane.f32.xlu0 %v277_v2 }
  0x16   : > { %281 = vadd.xlane.f32.xlu0 %v280_v3 }
  0x9f   : > { %v279_v4 = vpop.xlane.xlu0 %278 }
  0xa0   : > { %v284_v5 = vmul.f32 0.03125, %v279_v4 }
  0xa2   : > { %v286_v6 = vsub.f32 %v272_v0, %v284_v5 }
  0xa3   : > { %v282_v7 = vpop.xlane.xlu0 %281 }
  0xa4   : > { %v285_v8 = vmul.f32 0.03125, %v282_v7  ;;  %v288_v9 = vmul.f32 %v286_v6, %v286_v6 }
  0xa6   : > { %v287_v10 = vsub.f32 %v273_v1, %v285_v8  ;;  %v290_v11 = vsel %vm276_vm0, %v288_v9, 0.0 }
  0xa7   : > { %291 = vadd.xlane.f32.xlu1 %v290_v11 }
  0xa8   : > { %v289_v12 = vmul.f32 %v287_v10, %v287_v10 }
  0xaa   : > { %v293_v13 = vsel %vm276_vm0, %v289_v12, 0.0 }
  0xab   : > { %294 = vadd.xlane.f32.xlu1 %v293_v13 }
 0x134   : > { %v292_v20 = vpop.xlane.xlu1 %291 }
 0x135   : > { %v296_v21 = vmul.f32 0.03125, %v292_v20 }
 0x137   : > { %v298_v22 = vadd.f32 1e-05, %v296_v21 }
 0x138   : > { %v295_v23 = vpop.xlane.xlu1 %294 }
 0x139   : > { %553 = vrsqrt.f32 %v298_v22  ;;  %v297_v24 = vmul.f32 0.03125, %v295_v23 }
 0x13b   : > { %v299_v25 = vadd.f32 1e-05, %v297_v24 }
 0x13d   : > { %555 = vrsqrt.f32 %v299_v25 }
 0x143   : > { %v554_v26 = vpop.eup %553 }
 0x144   : > { %v302_v28 = vmul.f32 %v554_v26, %v286_v6 }
 0x146   : > { %v310_v29 = vmul.f32 %v510_v27, %v302_v28 }
 0x147   : > { %v556_v30 = vpop.eup %555 }
 0x148   : > { %v303_v32 = vmul.f32 %v556_v30, %v287_v10  ;;  %v318_v34 = vadd.f32 %v511_v31, %v310_v29 }
 0x14a   : > { %v311_v33 = vmul.f32 %v510_v27, %v303_v32  ;;  %v320_v36 = vsel %vm276_vm0, %v318_v34, 0.0 }
 0x14c   : > { %v319_v35 = vadd.f32 %v511_v31, %v311_v33 }
 0x14e   : > { %v321_v37 = vsel %vm276_vm0, %v319_v35, 0.0 }
 0x14f   : > { %v322_v38 = vadd.f32 %v321_v37, %v320_v36 }
 0x151   : > { %v323_v39 = vrot.slane %v322_v38, 4 }
 0x153   : > { %v324_v40 = vadd.f32 %v323_v39, %v322_v38 }
 0x155   : > { %v325_v41 = vrot.slane %v324_v40, 2 }
 0x157   : > { %v326_v42 = vadd.f32 %v325_v41, %v324_v40 }
 0x159   : > { %v327_v43 = vrot.slane %v326_v42, 1 }
 0x15b   : > { %v328_v44 = vadd.f32 %v327_v43, %v326_v42 }
 0x15d   : > { %v330_v45 = vmul.f32 0.0625, %v328_v44 }
 0x15f   : > { %v331_v46 = vsub.f32 %v318_v34, %v330_v45  ;;  %v332_v47 = vsub.f32 %v319_v35, %v330_v45 }
 0x161   : > { %534 = vmatprep.mubr.msk.f32.mxu0 %vm276_vm0, %v331_v46 }
 0x162   : > { %535 = vmatmul.mubr.msk.f32.vlgmr.msra.gmra.mrb[0].mxu0 %vm276_vm0, %v332_v47 }
 0x235   : > { %v536_v50 = vpop.f32.mrb[0].mxu0 }
 0x236   : > { %v424_v51 = vadd.f32 %v536_v50, %v512_v48  ;;  %v418_v53 = vpop.f32.mrb[1].mxu0 }
 0x237   : > { %v419_v54 = vadd.f32 %v512_v48, %v418_v53 }
 0x238   : > { %v428_v55 = vadd.f32 %v424_v51, %v334_v49 }
 0x239   : > { %v427_v56 = vadd.f32 %v419_v54, %v333_v52 }
 0x23a   : > { %431 = vst.msk [vmem:[%s271_s24 + $0x8] sm:$0xff] %vm429_vm1, %v428_v55 }
 0x23b   : > { %430 = vst.msk [vmem:[%s271_s24] sm:$0xff] %vm429_vm1, %v427_v56 }
 0x23c PF: > { %s16_s21 = sadd.s32 1, %s563_s21  }
 0x23d   : > { %p13_p4 = scmp.ge.s32.totalorder %s16_s21, 4  }
 0x23f   :  { %15 = sbr.rel (!%p13_p4) target bundleno = 1 (0x1), region = 77 }

// kernel: _lambda_.18
= control target key start
LH: loop header
LB: loop body
LE: loop exit
PB: predicated region body
PF: predicated region fallthrough
CT: control target
= control target key end

     0   :  { %s1598_s0 = inlined_call_operand.vmem [shape: s32[2,2], index: 0, kind: input, shape index: {}]   ;;  %s1599_s2 = inlined_call_operand.vmem [shape: f32[2,16,32], index: 2, kind: input, shape index: {}]   ;;  %s1600_s3 = inlined_call_operand.vmem [shape: f32[2,16,32], index: 3, kind: input, shape index: {}]   ;;  %s1601_s4 = inlined_call_operand.vmem [shape: f32[2,16,32], index: 4, kind: input, shape index: {}]   ;;  %s1602_s5 = inlined_call_operand.vmem [shape: f32[32,32], index: 5, kind: input, shape index: {}]   ;;  %s1603_s6 = inlined_call_operand.vmem [shape: f32[1,32], index: 6, kind: input, shape index: {}]   ;;  %s1604_s7 = inlined_call_operand.vmem [shape: f32[16,16], index: 7, kind: input, shape index: {}]   ;;  %s1605_s8 = inlined_call_operand.vmem [shape: f32[32,32], index: 8, kind: input, shape index: {}]   ;;  %s1606_s9 = inlined_call_operand.vmem [shape: f32[32,32], index: 9, kind: input, shape index: {}]   ;;  %s1607_s10 = inlined_call_operand.vmem [shape: f32[96,4], index: 10, kind: input, shape index: {}]   ;;  %s1608_s11 = inlined_call_operand.vmem [shape: f32[2,16,32], index: 11, kind: output, shape index: {0}]   ;;  %s1609_s12 = inlined_call_operand.vmem [shape: f32[2,16,4], index: 12, kind: output, shape index: {1}]   ;;  %s1610_s1 = inlined_call_operand.vmem [shape: f32[2,2], index: 1, kind: input, shape index: {}]  }
   0x1   :  { %s18_s23 = sshll.u32 %s1598_s0, 4  ;;  %s22_s26 = sshll.u32 %s1610_s1, 4  ;;  %s19_s23 = int_to_ptr.vmem [resolvable:$true] %s18_s23  ;;  %s23_s26 = int_to_ptr.vmem [resolvable:$true] %s22_s26 }
   0x2   :  { %s1357_s27 = scalar_lea.vmem %s19_s23, 32  ;;  %p1362_p1 = scmp.lt.s32.totalorder %s19_s23, %s19_s23 }
   0x3   :  { %p1358_p0 = scmp.ne.s32.totalorder %s19_s23, %s1357_s27  ;;  %p1363_p2 = scmp.lt.s32.totalorder %s1357_s27, %s1357_s27 }
   0x5   :  { %p1364_p3 = por %p1363_p2, %p1362_p1 }
   0x7   :  { %p1365_p4 = pnand %p1364_p3, %p1358_p0 }
   0x9   :  { %1368 = shalt.err (!%p1365_p4)  }
   0xa   :  { %s1391_s28 = smov [#allocation4]   ;;  %s1369_s29 = scalar_lea.vmem %s23_s26, 32 }
   0xb   :  { %21 = dma.vmem_to_smem %s19_s23, 32, %s1391_s28, [#allocation3] }
   0xc   :  { %p1370_p5 = scmp.ne.s32.totalorder %s23_s26, %s1369_s29  ;;  %p1374_p6 = scmp.lt.s32.totalorder %s23_s26, %s23_s26 }
   0xd   :  { %p1375_p7 = scmp.lt.s32.totalorder %s1369_s29, %s1369_s29 }
   0xf   :  { %p1376_p8 = por %p1375_p7, %p1374_p6 }
  0x11   :  { %p1377_p9 = pnand %p1376_p8, %p1370_p5 }
  0x13   :  { %1380 = shalt.err (!%p1377_p9)  }
  0x14   :  { %s1392_s0 = smov [#allocation5]  }
  0x15   :  { %25 = dma.vmem_to_smem %s23_s26, 32, %s1392_s0, [#allocation3] }
  0x16   :  { %1385 = dma.done.wait [#allocation3], 64 }
  0x17   :  { %1386 = vsyncadd [#allocation3], 4294967232 }
  0x18   :  { %27 = sfence }
  0x19   :  { %s1466_s1 = smov 0  }
  0x1a LB: > { %s1139_s30 = sadd.s32 4294967295, %s1389_s1   ;;  %p1143_p10 = scmp.ge.s32.totalorder %s1389_s1, 1  ;;  %s1389_s1 = sphi %s1466_s1, %s33_s1  }
  0x1b   : > { %p347_p11 = scmp.lt.s32.totalorder %s1389_s1, 3 }
  0x1d   : > { %p348_p12 = pnand %p1143_p10, %p347_p11 }
  0x1e   : > { %v456_v0 = vld [vmem:[%s1602_s5] sm:$0xff] (!%p348_p12)  ;;  %v457_v1 = vld [vmem:[%s1602_s5 + $0x8] sm:$0xff] (!%p348_p12)  ;;  %v458_v2 = vld [vmem:[%s1602_s5 + $0x10] sm:$0xff] (!%p348_p12)  ;;  %p400_p13 = scmp.lt.s32.totalorder (!%p348_p12), %s1139_s30, 1  ;;  %s1154_s19 = sshll.u32 (!%p348_p12), %s1139_s30, 7  ;;  %vm431_vm0 = vcmask (!%p348_p12), 261120  }
  0x1f   : > { %351 = sbr.rel (%p348_p12) target bundleno = 1485 (0x5cd), region = 56  ;;  %v1289_v3 = vpack.c.bf16 (!%p348_p12), %v457_v1, %v456_v0  ;;  %v459_v4 = vld [vmem:[%s1602_s5 + $0x18] sm:$0xff] (!%p348_p12)  ;;  %s437_s22 = sld [smem:[#allocation5 + %s1154_s19]] (!%p348_p12)  ;;  %v427_v20 = vld [vmem:[%s1604_s7] sm:$0xff] (!%p348_p12)  ;;  %vm550_vm1 = vcmask (!%p348_p12), 130048   ;;  %v635_v30 = vld [vmem:[%s1605_s8 + $0x8] sm:$0xff] (!%p348_p12) }
  0x20   : > { %v1293_v5 = vpack.c.bf16 (!%p348_p12), %v459_v4, %v458_v2  ;;  %s438_s23 = sld [smem:[#allocation4 + %s1154_s19]] (!%p348_p12)  ;;  %s445_s24 = sadd.s32 (!%p348_p12), 1, %s1154_s19  ;;  %v1155_v21 = vld [vmem:[%s1603_s6] ss:$0 sm:$0xff] (!%p348_p12)  ;;  %v428_v34 = vld [vmem:[%s1604_s7 + $0x8] sm:$0xff] (!%p348_p12)  ;;  %v636_v35 = vld [vmem:[%s1605_s8 + $0x10] sm:$0xff] (!%p348_p12) }
  0x21   : > { %1290 = vmatprep.subr.bf16.mxu1 (!%p348_p12), %v1289_v3  ;;  %s446_s26 = sld [smem:[#allocation5 + %s445_s24]] (!%p348_p12)  ;;  %v634_v29 = vld [vmem:[%s1605_s8] sm:$0xff] (!%p348_p12)  ;;  %v637_v36 = vld [vmem:[%s1605_s8 + $0x18] sm:$0xff] (!%p348_p12)  ;;  %v722_v39 = vld [vmem:[%s1606_s9 + $0x8] sm:$0xff] (!%p348_p12)  ;;  %vm903_vm2 = vcmask (!%p348_p12), 1046528   ;;  %vm897_vm3 = vcmask (!%p348_p12), 1040384  }
  0x22   : > { %1292 = vmatpush3.bf16.msra.mxu1 (!%p348_p12), %v1289_v3  ;;  %s447_s0 = sld [smem:[#allocation4 + %s445_s24]] (!%p348_p12)  ;;  %v1301_v33 = vpack.c.bf16 (!%p348_p12), %v635_v30, %v634_v29  ;;  %v1305_v37 = vpack.c.bf16 (!%p348_p12), %v637_v36, %v636_v35  ;;  %v721_v38 = vld [vmem:[%s1606_s9] sm:$0xff] (!%p348_p12)  ;;  %v723_v45 = vld [vmem:[%s1606_s9 + $0x10] sm:$0xff] (!%p348_p12)  ;;  %v724_v46 = vld [vmem:[%s1606_s9 + $0x18] sm:$0xff] (!%p348_p12)  ;;  %s1393_s15 = smov (!%p348_p12), 32   ;;  %vm925_vm4 = vcmask (!%p348_p12), 523264  }
  0x23   : > { %1294 = vmatprep.subr.bf16.mxu1 (!%p348_p12), %v1293_v5  ;;  %v1309_v40 = vpack.c.bf16 (!%p348_p12), %v722_v39, %v721_v38  ;;  %v1313_v47 = vpack.c.bf16 (!%p348_p12), %v724_v46, %v723_v45  ;;  %v928_v57 = vld [vmem:[%s1607_s10] sm:$0xff] (!%p348_p12)  ;;  %v929_v58 = vld [vmem:[%s1607_s10 + $0x8] sm:$0xff] (!%p348_p12)  ;;  %v930_v59 = vld [vmem:[%s1607_s10 + $0x10] sm:$0xff] (!%p348_p12)  ;;  %s1394_s16 = smov (!%p348_p12), 64   ;;  %vm940_vm5 = vcmask (!%p348_p12), 785408   ;;  %vm1022_vm6 = vcmask (!%p348_p12), 31744  }
  0x24   : > { %v1321_v60 = vpack.c.bf16 (!%p348_p12), %v929_v58, %v928_v57  ;;  %v931_v61 = vld [vmem:[%s1607_s10 + $0x18] sm:$0xff] (!%p348_p12)  ;;  %v932_v63 = vld [vmem:[%s1607_s10 + $0x20] sm:$0xff] (!%p348_p12)  ;;  %v933_v0 = vld [vmem:[%s1607_s10 + $0x28] sm:$0xff] (!%p348_p12) }
  0x25   : > { %v442_v8 = vstv (!%p348_p12), %s437_s22  ;;  %1310 = vmatprep.subr.bf16.mxu0 (!%p348_p12), %v1309_v40  ;;  %v1325_v62 = vpack.c.bf16 (!%p348_p12), %v931_v61, %v930_v59  ;;  %v1329_v1 = vpack.c.bf16 (!%p348_p12), %v933_v0, %v932_v63  ;;  %v934_v2 = vld [vmem:[%s1607_s10 + $0x30] sm:$0xff] (!%p348_p12)  ;;  %v935_v3 = vld [vmem:[%s1607_s10 + $0x38] sm:$0xff] (!%p348_p12) }
  0x26   : > { %s1612_s30 = smov (!%p400_p13, %s1139_s30), 1  ;;  %1296 = vmatpush3.bf16.msra.mxu1 %v1293_v5  ;;  %1312 = vmatpush3.bf16.msra.mxu0 %v1309_v40  ;;  %v1333_v4 = vpack.c.bf16 %v935_v3, %v934_v2  ;;  %v936_v5 = vld [vmem:[%s1607_s10 + $0x40] sm:$0xff] }
  0x27   : > { %s1486_s25 = sshll.u32 %s1612_s30, 4  ;;  %v451_v9 = vstv %s446_s26  ;;  %s439_s30 = scalar_lea.vmem [#allocation2], %s438_s23  ;;  %1314 = vmatprep.subr.bf16.mxu0 %v1313_v47 }
  0x28   : > { %s414_s29 = scalar_lea.vmem %s1601_s4, %s1486_s25  ;;  %s448_s13 = scalar_lea.vmem [#allocation2], %s447_s0 }
  0x29   : > { %v429_v6 = vld [vmem:[%s414_s29] sm:$0xff]  ;;  %v430_v7 = vld [vmem:[%s414_s29 + $0x8] sm:$0xff]  ;;  %s404_s18 = scalar_lea.vmem %s1599_s2, %s1486_s25  ;;  %s409_s0 = scalar_lea.vmem %s1600_s3, %s1486_s25 }
  0x2a   : > { %432 = vst.msk [vmem:[#allocation2] sm:$0xff] %vm431_vm0, %v429_v6  ;;  %433 = vst.msk [vmem:[#allocation2 + $0x8] sm:$0xff] %vm431_vm0, %v430_v7  ;;  %v426_v22 = vld [vmem:[%s404_s18 + $0x8] sm:$0xff]  ;;  %v425_v25 = vld [vmem:[%s404_s18] sm:$0xff]  ;;  %1316 = vmatpush3.bf16.msra.mxu0 %v1313_v47  ;;  %s419_s14 = scalar_lea.vmem %s1608_s11, %s1486_s25  ;;  %s424_s19 = scalar_lea.vmem %s1609_s12, %s1486_s25 }
  0x2b   : > { %434 = vst.msk [vmem:[#allocation2 + $0x10] sm:$0xff] %vm431_vm0, %v429_v6  ;;  %435 = vst.msk [vmem:[#allocation2 + $0x18] sm:$0xff] %vm431_vm0, %v430_v7  ;;  %1322 = vmatprep.subr.bf16.mxu0 %v1321_v60  ;;  %v937_v6 = vld [vmem:[%s1607_s10 + $0x48] sm:$0xff] }
  0x2c   : > { %v1337_v7 = vpack.c.bf16 %v937_v6, %v936_v5 }
  0x32   : > { %v440_v10 = vld [vmem:[%s439_s30] sm:$0xff]  ;;  %v441_v11 = vld [vmem:[%s439_s30 + $0x8] sm:$0xff] }
  0x33   : > { %v449_v12 = vld [vmem:[%s448_s13] sm:$0xff]  ;;  %v443_v13 = vmul.f32 %v442_v8, %v440_v10  ;;  %v444_v14 = vmul.f32 %v442_v8, %v441_v11  ;;  %v450_v15 = vld [vmem:[%s448_s13 + $0x8] sm:$0xff]  ;;  %v938_v8 = vld [vmem:[%s1607_s10 + $0x50] sm:$0xff] }
  0x34   : > { %v452_v16 = vmul.f32 %v451_v9, %v449_v12  ;;  %v453_v17 = vmul.f32 %v451_v9, %v450_v15  ;;  %v939_v9 = vld [vmem:[%s1607_s10 + $0x58] sm:$0xff]  ;;  %v888_v11 = vld [vmem:[%s409_s0 + $0x8] sm:$0xff]  ;;  %v887_v12 = vld [vmem:[%s409_s0] sm:$0xff] }
  0x35   : > { %v1341_v10 = vpack.c.bf16 %v939_v9, %v938_v8 }
  0x36   : > { %v454_v18 = vadd.f32 %v452_v16, %v443_v13  ;;  %v455_v19 = vadd.f32 %v453_v17, %v444_v14 }
  0x38   : > { %1223 = vmatprep.mubr.msk.f32.mxu1 %vm431_vm0, %v454_v18 }
  0x39   : > { %1224 = vmatmul.mubr.msk.f32.vlgmr.msra.gmra.mrb[0].mxu1 %vm431_vm0, %v455_v19 }
  0x3a   : > { %1230 = vmatprep.mubr.msk.f32.mxu1 %vm550_vm1, %v427_v20 }
 0x10c   : > { %v1225_v23 = vpop.f32.mrb[0].mxu1 }
 0x10d   : > { %v545_v24 = vadd.f32 %v1225_v23, %v1155_v21  ;;  %v539_v26 = vpop.f32.mrb[1].mxu1 }
 0x10e   : > { %v540_v27 = vadd.f32 %v1155_v21, %v539_v26 }
 0x10f   : > { %v549_v28 = vadd.f32 %v545_v24, %v426_v22 }
 0x110   : > { %v548_v31 = vadd.f32 %v540_v27, %v425_v25 }
 0x112   : > { %v1297_v32 = vpack.c.bf16 %v549_v28, %v548_v31 }
 0x114   : > { %1298 = vmatprep.subr.bf16.mxu1 %v1297_v32 }
 0x115   : > { %1300 = vmatpush3.bf16.msra.mxu1 %v1297_v32 }
 0x116   : > { %1302 = vmatprep.subr.bf16.mxu1 %v1301_v33 }
 0x118   : > { %1231 = vmatmul.mubr.msk.f32.vlgmr.msra.gmra.mrb[2].mxu1 %vm550_vm1, %v428_v34 }
 0x119   : > { %1304 = vmatpush3.bf16.msra.mxu1 %v1301_v33 }
 0x11a   : > { %1306 = vmatprep.subr.bf16.mxu1 %v1305_v37 }
 0x11d   : > { %1308 = vmatpush3.bf16.msra.mxu1 %v1305_v37 }
 0x1eb   : > { %v1232_v41 = vpop.f32.mrb[2].mxu1 }
 0x1ec   : > { %v623_v42 = vpop.f32.mrb[3].mxu1  ;;  %v633_v44 = vsub.f32 %v549_v28, %v1232_v41  ;;  %v890_v13 = vadd.f32 %v1232_v41, %v888_v11 }
 0x1ed   : > { %v632_v43 = vsub.f32 %v548_v31, %v623_v42  ;;  %v889_v14 = vadd.f32 %v887_v12, %v623_v42 }
 0x1ef   : > { %1241 = vmatprep.mubr.msk.f32.mxu1 %vm431_vm0, %v632_v43 }
 0x1f0   : > { %1242 = vmatmul.mubr.msk.f32.vlgmr.msra.gmra.mrb[4].mxu1 %vm431_vm0, %v633_v44 }
 0x1f1   : > { %1259 = vmatprep.mubr.msk.f32.mxu1 %vm550_vm1, %v427_v20 }
 0x2c3   : > { %v1243_v48 = vpop.f32.mrb[4].mxu1 }
 0x2c4   : > { %v710_v49 = vpop.f32.mrb[5].mxu1  ;;  %v720_v51 = vmax.f32 %v1243_v48, 0.0 }
 0x2c5   : > { %v719_v50 = vmax.f32 %v710_v49, 0.0 }
 0x2c7   : > { %1252 = vmatprep.mubr.msk.f32.mxu0 %vm431_vm0, %v719_v50 }
 0x2c8   : > { %1253 = vmatmul.mubr.msk.f32.vlgmr.msra.gmra.mrb[0].mxu0 %vm431_vm0, %v720_v51 }
 0x2c9   : > { %1324 = vmatpush3.bf16.msra.mxu0 %v1321_v60 }
 0x2ca   : > { %1326 = vmatprep.subr.bf16.mxu0 %v1325_v62 }
 0x2cd   : > { %1328 = vmatpush3.bf16.msra.mxu0 %v1325_v62 }
 0x2ce   : > { %1330 = vmatprep.subr.bf16.mxu0 %v1329_v1 }
 0x2d1   : > { %1332 = vmatpush3.bf16.msra.mxu0 %v1329_v1 }
 0x2d2   : > { %1334 = vmatprep.subr.bf16.mxu0 %v1333_v4 }
 0x2d5   : > { %1336 = vmatpush3.bf16.msra.mxu0 %v1333_v4 }
 0x2d6   : > { %1338 = vmatprep.subr.bf16.mxu0 %v1337_v7 }
 0x2d9   : > { %1340 = vmatpush3.bf16.msra.mxu0 %v1337_v7 }
 0x2da   : > { %1342 = vmatprep.subr.bf16.mxu0 %v1341_v10 }
 0x2dd   : > { %1344 = vmatpush3.bf16.msra.mxu0 %v1341_v10 }
 0x39b   : > { %v1254_v52 = vpop.f32.mrb[0].mxu0 }
 0x39c   : > { %v807_v53 = vadd.f32 %v1254_v52, %v633_v44  ;;  %v797_v54 = vpop.f32.mrb[1].mxu0 }
 0x39d   : > { %v806_v55 = vadd.f32 %v797_v54, %v632_v43 }
 0x39f   : > { %v1317_v56 = vpack.c.bf16 %v807_v53, %v806_v55 }
 0x3a1   : > { %1318 = vmatprep.subr.bf16.mxu1 %v1317_v56 }
 0x3a2   : > { %1320 = vmatpush3.bf16.msra.mxu1 %v1317_v56 }
 0x3a5   : > { %1260 = vmatmul.mubr.msk.f32.vlgmr.msra.gmra.mrb[6].mxu1 %vm550_vm1, %v428_v34 }
 0x478   : > { %v1261_v15 = vpop.f32.mrb[6].mxu1 }
 0x479   : > { %v884_v16 = vsub.f32 %v807_v53, %v1261_v15  ;;  %v892_v17 = vadd.f32 %v1261_v15, %v890_v13  ;;  %v874_v18 = vpop.f32.mrb[7].mxu1 }
 0x47a   : > { %v883_v19 = vsub.f32 %v806_v55, %v874_v18  ;;  %v891_v20 = vadd.f32 %v889_v14, %v874_v18 }
 0x47b   : > { %886 = vst.msk [vmem:[%s419_s14 + $0x8] sm:$0xff] %vm431_vm0, %v884_v16  ;;  %v894_v21 = vrot.slane %v892_v17, 7  ;;  %v905_v22 = vrot.slane %v892_v17, 1 }
 0x47c   : > { %885 = vst.msk [vmem:[%s419_s14] sm:$0xff] %vm431_vm0, %v883_v19  ;;  %v898_v23 = vrot.slane %v891_v20, 7  ;;  %910 = vrot.lane.b32.xlu0 %v891_v20, %s1393_s15  ;;  %v904_v24 = vrot.slane %v891_v20, 1 }
 0x47e   : > { %v906_v25 = vsel %vm903_vm2, %v904_v24, %v905_v22  ;;  %v909_v26 = vsel %vm903_vm2, %v905_v22, %v904_v24  ;;  %v902_v27 = vsel %vm897_vm3, %v894_v21, %v898_v23  ;;  %v899_v28 = vsel %vm897_vm3, %v898_v23, %v894_v21 }
 0x47f   : > { %917 = vrot.lane.b32.xlu1 %v906_v25, %s1394_s16 }
 0x480   : > { %912 = vrot.lane.b32.xlu0 %v892_v17, %s1393_s15 }
 0x483   : > { %919 = vrot.lane.b32.xlu1 %v909_v26, %s1394_s16 }
 0x4ee   : > { %v911_v29 = vpop.permute.xlu0 %910 }
 0x4ef   : > { %v923_v30 = vsel %vm431_vm0, %v902_v27, %v911_v29 }
 0x4f1   : > { %v918_v31 = vpop.permute.xlu1 %917 }
 0x4f2   : > { %v926_v32 = vsel %vm925_vm4, %v923_v30, %v918_v31  ;;  %v913_v33 = vpop.permute.xlu0 %912 }
 0x4f3   : > { %1286 = vmatprep.mubr.msk.f32.mxu0 %vm940_vm5, %v926_v32  ;;  %v924_v34 = vsel %vm431_vm0, %v899_v28, %v913_v33 }
 0x4f5   : > { %v920_v35 = vpop.permute.xlu1 %919 }
 0x4f6   : > { %v927_v36 = vsel %vm925_vm4, %v924_v34, %v920_v35 }
 0x4f7   : > { %1287 = vmatmul.mubr.msk.f32.vlgmr.msra.gmra.mrb[2].mxu0 %vm940_vm5, %v927_v36 }
 0x5ca   : > { %v1288_v37 = vpop.f32.mrb[2].mxu0 }
 0x5cb   : > { %1024 = vst.msk [vmem:[%s424_s19 + $0x8] sm:$0xff] %vm1022_vm6, %v1288_v37  ;;  %v1013_v38 = vpop.f32.mrb[3].mxu0 }
 0x5cc   : > { %1023 = vst.msk [vmem:[%s424_s19] sm:$0xff] %vm1022_vm6, %v1013_v38 }
 0x5cd PF: > { %s33_s1 = sadd.s32 1, %s1389_s1  }
 0x5ce   : > { %p30_p0 = scmp.ge.s32.totalorder %s33_s1, 4  }
 0x5d0   :  { %32 = sbr.rel (!%p30_p0) target bundleno = 26 (0x1a), region = 106 }

</bundles_post_ra>
